<compile_context>
chip_gen: v7x
topology: tpu7x:2x2x1
jax: 0.10.0
libtpu: 0.0.40
codegen_flags: <defaults>
</compile_context>

<pallas_src>
import functools

import numpy as np
import jax
import jax.numpy as jnp
from jax.experimental import pallas as pl
from jax.experimental.pallas import tpu as pltpu

_LANE = 128
_MAX_BATCH_TILE = 8   # keeps the padded VMEM working set small on all chips


def _round_up(x, m):
    return (x + m - 1) // m * m


def _conv_out(size, k, s):
    return (size - k) // s + 1


def _u8_to_bf16(x):
    # Conservative cast chain (u8 -> i32 -> f32 -> bf16): every hop is a plain
    # Mosaic-supported convert; avoids relying on a direct u8->bf16 lowering.
    return x.astype(jnp.int32).astype(jnp.float32).astype(jnp.bfloat16)


def _pick_batch_tile(batch):
    if batch <= 1:
        return 1
    # >= 2 grid steps so both v7x TensorCores get work even at small batch.
    return max(1, min(_MAX_BATCH_TILE, pl.cdiv(batch, 2)))


# ----------------------------------------------------------------------------
# Fused NatureCNN kernel: conv1 -> conv2 -> conv3 -> fc -> actor/value heads.
# All intermediates live in VMEM; the only HBM I/O per grid step is the uint8
# obs tile, the weights, and one lane-dense (TB, 1, NPAD) f32 output block.
# ----------------------------------------------------------------------------
def _nature_cnn_kernel(obs_ref, w1_ref, b1_ref, w2_ref, b2_ref, w3_ref, b3_ref,
                       wfc_ref, bfc_ref, wh_ref, bh_ref, out_ref,
                       a1_ref, a2_ref, *,
                       tb, c_in,
                       k1, s1, oh1, ow1, c1,
                       k2, s2, oh2, ow2, c2,
                       k3, oh3, ow3, c3,
                       hidden, n_pad):
    f32 = jnp.float32
    bf16 = jnp.bfloat16

    # -------- conv1 (k=8, stride 4): uint8 obs -> (tb*oh1*ow1, c1) ----------
    # obs_ref is (tb, H/s1, s1, W/s1, s1*c_in): the H/W axes are pre-split by
    # the stride, so each tap is a contiguous slice; the s1 horizontal taps
    # sharing the same outer-W index are fused into one K = s1*c_in matmul.
    m1 = tb * oh1 * ow1
    acc1 = jnp.zeros((m1, c1), f32) + b1_ref[...]
    for i in range(k1):
        qi, ri = divmod(i, s1)
        for qj in range(k1 // s1):
            row0 = (i * k1 + qj * s1) * c_in
            tap = obs_ref[:, pl.ds(qi, oh1), pl.ds(ri, 1), pl.ds(qj, ow1), :]
            lhs = _u8_to_bf16(tap).reshape(m1, s1 * c_in)
            acc1 = acc1 + jnp.dot(lhs, w1_ref[pl.ds(row0, s1 * c_in), :],
                                  preferred_element_type=f32)
    h1 = jnp.maximum(acc1, 0.0).astype(bf16)
    # Store with H/W split by conv2's stride so conv2's taps are contiguous.
    a1_ref[...] = h1.reshape(tb, oh1 // s2, s2, ow1 // s2, s2, c1)

    # -------- conv2 (k=4, stride 2) ------------------------------------------
    m2 = tb * oh2 * ow2
    acc2 = jnp.zeros((m2, c2), f32) + b2_ref[...]
    for i in range(k2):
        qi, ri = divmod(i, s2)
        for j in range(k2):
            qj, rj = divmod(j, s2)
            row0 = (i * k2 + j) * c1
            tap = a1_ref[:, pl.ds(qi, oh2), pl.ds(ri, 1),
                         pl.ds(qj, ow2), pl.ds(rj, 1), :]
            lhs = tap.reshape(m2, c1)
            acc2 = acc2 + jnp.dot(lhs, w2_ref[pl.ds(row0, c1), :],
                                  preferred_element_type=f32)
    h2 = jnp.maximum(acc2, 0.0).astype(bf16)
    a2_ref[...] = h2.reshape(tb, oh2, ow2, c2)

    # -------- conv3 (k=3, stride 1) ------------------------------------------
    m3 = tb * oh3 * ow3
    acc3 = jnp.zeros((m3, c3), f32) + b3_ref[...]
    for i in range(k3):
        for j in range(k3):
            row0 = (i * k3 + j) * c2
            tap = a2_ref[:, pl.ds(i, oh3), pl.ds(j, ow3), :]
            lhs = tap.reshape(m3, c2)
            acc3 = acc3 + jnp.dot(lhs, w3_ref[pl.ds(row0, c2), :],
                                  preferred_element_type=f32)
    h3 = jnp.maximum(acc3, 0.0).astype(bf16).reshape(tb, oh3, ow3, c3)

    # -------- fc (flatten fused as per-spatial-position accumulation) --------
    acc_fc = jnp.zeros((tb, hidden), f32) + bfc_ref[...]
    for ph in range(oh3):
        for pw in range(ow3):
            row0 = (ph * ow3 + pw) * c3
            lhs = h3[:, ph:ph + 1, pw:pw + 1, :].reshape(tb, c3)
            acc_fc = acc_fc + jnp.dot(lhs, wfc_ref[pl.ds(row0, c3), :],
                                      preferred_element_type=f32)
    hid = jnp.maximum(acc_fc, 0.0)            # keep f32 for the heads

    # -------- actor + value heads (f32, lane-dense 128-wide output) ----------
    out = jnp.dot(hid, wh_ref[...], preferred_element_type=f32) + bh_ref[...]
    out_ref[...] = out.reshape(tb, 1, n_pad)


# ----------------------------------------------------------------------------
# Parameter init (PyTorch layout, mirrors pufferlib.pytorch.layer_init)
# ----------------------------------------------------------------------------
def init_params(key, framestack, flat_size, hidden_size, n_actions):
    ks = jax.random.split(key, 6)
    orth = jax.nn.initializers.orthogonal
    return {
        "w1": orth(np.sqrt(2))(ks[0], (32, framestack, 8, 8), jnp.float32),
        "b1": jnp.zeros((32,), jnp.float32),
        "w2": orth(np.sqrt(2))(ks[1], (64, 32, 4, 4), jnp.float32),
        "b2": jnp.zeros((64,), jnp.float32),
        "w3": orth(np.sqrt(2))(ks[2], (64, 64, 3, 3), jnp.float32),
        "b3": jnp.zeros((64,), jnp.float32),
        "w_fc": orth(np.sqrt(2))(ks[3], (hidden_size, flat_size), jnp.float32),
        "b_fc": jnp.zeros((hidden_size,), jnp.float32),
        "w_actor": orth(0.01)(ks[4], (n_actions, hidden_size), jnp.float32),
        "b_actor": jnp.zeros((n_actions,), jnp.float32),
        "w_value": orth(1.0)(ks[5], (1, hidden_size), jnp.float32),
        "b_value": jnp.zeros((1,), jnp.float32),
    }


def _conv_w_to_mat(w_oihw):
    # PyTorch OIHW -> (KH, KW, I, O) -> [KH*KW*I, O]  (matches in-kernel order)
    O, I, KH, KW = w_oihw.shape
    return jnp.transpose(w_oihw, (2, 3, 1, 0)).reshape(KH * KW * I, O)


def prepare_params(p, *, obs_hw, downsample=1):
    """One-time repack of the PyTorch-layout params into TPU-friendly layout."""
    H, W = obs_hw
    if downsample > 1:
        H, W = -(-H // downsample), -(-W // downsample)
    H1, W1 = _conv_out(H, 8, 4), _conv_out(W, 8, 4)
    H2, W2 = _conv_out(H1, 4, 2), _conv_out(W1, 4, 2)
    H3, W3 = _conv_out(H2, 3, 1), _conv_out(W2, 3, 1)

    hidden = p["w_fc"].shape[0]
    assert p["w_fc"].shape[1] == 64 * H3 * W3, (p["w_fc"].shape, 64 * H3 * W3)
    n_act = p["w_actor"].shape[0]

    # Conv weights: fold /255 into conv1, pack as (KH*KW*Cin, Cout), bf16.
    w1m = _conv_w_to_mat(p["w1"] / 255.0).astype(jnp.bfloat16)
    w2m = _conv_w_to_mat(p["w2"]).astype(jnp.bfloat16)
    w3m = _conv_w_to_mat(p["w3"]).astype(jnp.bfloat16)

    # fc weight reordered from torch's NCHW flatten to the kernel's (h, w, c).
    w_fc = p["w_fc"].reshape(hidden, 64, H3, W3)
    w_fc = jnp.transpose(w_fc, (2, 3, 1, 0)).reshape(H3 * W3 * 64, hidden)
    w_fc = w_fc.astype(jnp.bfloat16)

    # actor + value packed into one lane-dense head, kept in f32 (critic
    # precision; the head GEMM is tiny so f32 on the MXU is free here).
    n_pad = _round_up(n_act + 1, _LANE)
    w_head = jnp.zeros((hidden, n_pad), jnp.float32)
    w_head = w_head.at[:, :n_act].set(p["w_actor"].T)
    w_head = w_head.at[:, n_act].set(p["w_value"][0])
    b_head = jnp.zeros((n_pad,), jnp.float32)
    b_head = b_head.at[:n_act].set(p["b_actor"])
    b_head = b_head.at[n_act].set(p["b_value"][0])

    return {
        "w1m": w1m, "b1": p["b1"].reshape(1, -1).astype(jnp.float32),
        "w2m": w2m, "b2": p["b2"].reshape(1, -1).astype(jnp.float32),
        "w3m": w3m, "b3": p["b3"].reshape(1, -1).astype(jnp.float32),
        "w_fc": w_fc, "b_fc": p["b_fc"].reshape(1, -1).astype(jnp.float32),
        "w_head": w_head, "b_head": b_head.reshape(1, -1),
    }


# ----------------------------------------------------------------------------
# Forward pass (== Convolutional.forward)
# ----------------------------------------------------------------------------
def nature_cnn_forward(params, observations, *, n_actions,
                       channels_last=False, downsample=1):
    obs = observations
    if channels_last:
        obs = jnp.transpose(obs, (0, 3, 1, 2))              # NHWC -> NCHW
    if downsample > 1:
        obs = obs[:, :, ::downsample, ::downsample]
    if obs.dtype != jnp.uint8:
        obs = obs.astype(jnp.uint8)                         # raw byte frames

    B, C, H, W = obs.shape
    K1, S1, C1 = 8, 4, 32
    K2, S2, C2 = 4, 2, 64
    K3, S3, C3 = 3, 1, 64
    OH1, OW1 = _conv_out(H, K1, S1), _conv_out(W, K1, S1)
    OH2, OW2 = _conv_out(OH1, K2, S2), _conv_out(OW1, K2, S2)
    OH3, OW3 = _conv_out(OH2, K3, S3), _conv_out(OW2, K3, S3)

    # Preconditions for the fused in-kernel im2col (hold for Atari 84x84 and
    # the toy 36x36 below).  TODO(synk): pad+mask for other observation sizes.
    assert H % S1 == 0 and W % S1 == 0
    assert K1 % S1 == 0
    assert OH1 + (K1 - 1) // S1 <= H // S1 and OW1 + (K1 - 1) // S1 <= W // S1
    assert OH1 % S2 == 0 and OW1 % S2 == 0
    assert OH2 + (K2 - 1) // S2 <= OH1 // S2 and OW2 + (K2 - 1) // S2 <= OW1 // S2

    hidden = params["w_fc"].shape[1]
    n_pad = params["w_head"].shape[1]
    assert params["w_fc"].shape[0] == OH3 * OW3 * C3
    assert n_actions + 1 <= n_pad

    # NCHW -> NHWC in uint8 (single byte-wide copy; channels become minor so
    # the kernel contracts over them), then split H/W by conv1's stride so all
    # in-kernel tap reads are contiguous.  The reshape is row-major-free.
    obs_r = jnp.transpose(obs, (0, 2, 3, 1)).reshape(
        B, H // S1, S1, W // S1, S1 * C)

    TB = _pick_batch_tile(B)
    grid = (pl.cdiv(B, TB),)

    kernel = functools.partial(
        _nature_cnn_kernel,
        tb=TB, c_in=C,
        k1=K1, s1=S1, oh1=OH1, ow1=OW1, c1=C1,
        k2=K2, s2=S2, oh2=OH2, ow2=OW2, c2=C2,
        k3=K3, oh3=OH3, ow3=OW3, c3=C3,
        hidden=hidden, n_pad=n_pad)

    flops = 2 * B * (OH1 * OW1 * K1 * K1 * C * C1
                     + OH2 * OW2 * K2 * K2 * C1 * C2
                     + OH3 * OW3 * K3 * K3 * C2 * C3
                     + OH3 * OW3 * C3 * hidden
                     + hidden * n_pad)
    w_bytes = sum(int(np.prod(params[k].shape)) * params[k].dtype.itemsize
                  for k in ("w1m", "w2m", "w3m", "w_fc", "w_head"))
    bytes_accessed = int(obs_r.size) + w_bytes + B * n_pad * 4

    const = lambda i: (0, 0)
    out = pl.pallas_call(
        kernel,
        out_shape=jax.ShapeDtypeStruct((B, 1, n_pad), jnp.float32),
        grid=grid,
        in_specs=[
            pl.BlockSpec((TB, H // S1, S1, W // S1, S1 * C),
                         lambda i: (i, 0, 0, 0, 0)),
            pl.BlockSpec(params["w1m"].shape, const),
            pl.BlockSpec(params["b1"].shape, const),
            pl.BlockSpec(params["w2m"].shape, const),
            pl.BlockSpec(params["b2"].shape, const),
            pl.BlockSpec(params["w3m"].shape, const),
            pl.BlockSpec(params["b3"].shape, const),
            pl.BlockSpec(params["w_fc"].shape, const),
            pl.BlockSpec(params["b_fc"].shape, const),
            pl.BlockSpec(params["w_head"].shape, const),
            pl.BlockSpec(params["b_head"].shape, const),
        ],
        out_specs=pl.BlockSpec((TB, 1, n_pad), lambda i: (i, 0, 0)),
        scratch_shapes=[
            pltpu.VMEM((TB, OH1 // S2, S2, OW1 // S2, S2, C1), jnp.bfloat16),
            pltpu.VMEM((TB, OH2, OW2, C2), jnp.bfloat16),
        ],
        compiler_params=pltpu.CompilerParams(
            dimension_semantics=("parallel",),
            vmem_limit_bytes=32 * 1024 * 1024),
        cost_estimate=pl.CostEstimate(
            flops=flops, transcendentals=0, bytes_accessed=bytes_accessed),
    )(obs_r, params["w1m"], params["b1"], params["w2m"], params["b2"],
      params["w3m"], params["b3"], params["w_fc"], params["b_fc"],
      params["w_head"], params["b_head"])

    out = out.reshape(B, n_pad)
    actions = out[:, :n_actions]
    value = out[:, n_actions:n_actions + 1]
    return actions, value


# ----------------------------------------------------------------------------
# Pure-JAX f32 reference (semantics check against the PyTorch forward)
# ----------------------------------------------------------------------------
def forward_ref(p, observations):
    x = observations.astype(jnp.float32) / 255.0            # NCHW

    def conv(x, w, b, s):
        out = jax.lax.conv_general_dilated(
            x, w, (s, s), "VALID", dimension_numbers=("NCHW", "OIHW", "NCHW"))
        return jax.nn.relu(out + b[None, :, None, None])

    x = conv(x, p["w1"], p["b1"], 4)
    x = conv(x, p["w2"], p["b2"], 2)
    x = conv(x, p["w3"], p["b3"], 1)
    x = x.reshape(x.shape[0], -1)
    h = jax.nn.relu(x @ p["w_fc"].T + p["b_fc"])
    a = h @ p["w_actor"].T + p["b_actor"]
    v = h @ p["w_value"].T + p["b_value"]
    return a, v


if __name__ == "__main__":
    # Small, self-consistent shapes:
    #   obs [B=2, framestack=4, 36, 36]
    #   conv1(8,s4)->8x8x32, conv2(4,s2)->3x3x64, conv3(3,s1)->1x1x64 => flat=64
    B, FRAMESTACK, H, W = 2, 4, 36, 36
    FLAT_SIZE, HIDDEN, N_ACTIONS = 64, 128, 6

    key = jax.random.PRNGKey(0)
    k_obs, k_par = jax.random.split(key)
    observations = jax.random.randint(
        k_obs, (B, FRAMESTACK, H, W), 0, 256, dtype=jnp.int32).astype(jnp.uint8)

    torch_params = init_params(k_par, FRAMESTACK, FLAT_SIZE, HIDDEN, N_ACTIONS)
    params = prepare_params(torch_params, obs_hw=(H, W), downsample=1)

    fwd = jax.jit(nature_cnn_forward,
                  static_argnames=("n_actions", "channels_last", "downsample"))
    actions, value = fwd(params, observations, n_actions=N_ACTIONS)
    jax.block_until_ready((actions, value))

    a_ref, v_ref = forward_ref(torch_params, observations)
    assert actions.shape == (B, N_ACTIONS) and value.shape == (B, 1)
    # bf16 conv/fc weights (f32 accumulation) -> looser tolerance vs f32 ref.
    assert jnp.allclose(actions, a_ref, atol=5e-2, rtol=5e-2), \
        float(jnp.max(jnp.abs(actions - a_ref)))
    assert jnp.allclose(value, v_ref, atol=5e-2, rtol=5e-2), \
        float(jnp.max(jnp.abs(value - v_ref)))

    print("KERNEL_OK")
</pallas_src>

<mosaic_0001>
module attributes {stable_mosaic.version = 11 : i64} {
  func.func @_nature_cnn_kernel(%arg0: i32, %arg1: memref<1x9x4x9x16xi8, #tpu.memory_space<vmem>>, %arg2: memref<256x32xbf16, #tpu.memory_space<vmem>>, %arg3: memref<1x32xf32, #tpu.memory_space<vmem>>, %arg4: memref<512x64xbf16, #tpu.memory_space<vmem>>, %arg5: memref<1x64xf32, #tpu.memory_space<vmem>>, %arg6: memref<576x64xbf16, #tpu.memory_space<vmem>>, %arg7: memref<1x64xf32, #tpu.memory_space<vmem>>, %arg8: memref<64x128xbf16, #tpu.memory_space<vmem>>, %arg9: memref<1x128xf32, #tpu.memory_space<vmem>>, %arg10: memref<128x128xf32, #tpu.memory_space<vmem>>, %arg11: memref<1x128xf32, #tpu.memory_space<vmem>>, %arg12: memref<1x1x128xf32, #tpu.memory_space<vmem>>, %arg13: memref<1x4x2x4x2x32xbf16, #tpu.memory_space<vmem>>, %arg14: memref<1x3x3x64xbf16, #tpu.memory_space<vmem>>) attributes {dimension_semantics = [#tpu.dimension_semantics<parallel>], iteration_bounds = array<i64: 2>, scalar_prefetch = 0 : i64, scratch_operands = 2 : i64, tpu.core_type = #tpu.core_type<tc>, window_params = [{transform_indices = @transform_0, window_bounds = array<i64: 1, 9, 4, 9, 16>}, {pipeline_mode = #tpu.pipeline_mode<synchronous>, transform_indices = @transform_1, window_bounds = array<i64: 256, 32>}, {pipeline_mode = #tpu.pipeline_mode<synchronous>, transform_indices = @transform_2, window_bounds = array<i64: 1, 32>}, {pipeline_mode = #tpu.pipeline_mode<synchronous>, transform_indices = @transform_3, window_bounds = array<i64: 512, 64>}, {pipeline_mode = #tpu.pipeline_mode<synchronous>, transform_indices = @transform_4, window_bounds = array<i64: 1, 64>}, {pipeline_mode = #tpu.pipeline_mode<synchronous>, transform_indices = @transform_5, window_bounds = array<i64: 576, 64>}, {pipeline_mode = #tpu.pipeline_mode<synchronous>, transform_indices = @transform_6, window_bounds = array<i64: 1, 64>}, {pipeline_mode = #tpu.pipeline_mode<synchronous>, transform_indices = @transform_7, window_bounds = array<i64: 64, 128>}, {pipeline_mode = #tpu.pipeline_mode<synchronous>, transform_indices = @transform_8, window_bounds = array<i64: 1, 128>}, {pipeline_mode = #tpu.pipeline_mode<synchronous>, transform_indices = @transform_9, window_bounds = array<i64: 128, 128>}, {pipeline_mode = #tpu.pipeline_mode<synchronous>, transform_indices = @transform_10, window_bounds = array<i64: 1, 128>}, {transform_indices = @transform_11, window_bounds = array<i64: 1, 1, 128>}]} {
    %cst = arith.constant 0.000000e+00 : f32
    %0 = vector.broadcast %cst : f32 to vector<64x32xf32>
    %c0 = arith.constant 0 : index
    %c0_0 = arith.constant 0 : index
    %1 = vector.load %arg3[%c0, %c0_0] : memref<1x32xf32, #tpu.memory_space<vmem>>, vector<1x32xf32>
    %2 = vector.broadcast %1 : vector<1x32xf32> to vector<64x32xf32>
    %3 = arith.addf %0, %2 : vector<64x32xf32>
    %c0_1 = arith.constant 0 : index
    %c0_2 = arith.constant 0 : index
    %c0_3 = arith.constant 0 : index
    %c0_4 = arith.constant 0 : index
    %c0_5 = arith.constant 0 : index
    %4 = vector.load %arg1[%c0_1, %c0_2, %c0_3, %c0_4, %c0_5] : memref<1x9x4x9x16xi8, #tpu.memory_space<vmem>>, vector<1x8x1x8x16xi8>
    %5 = arith.extui %4 : vector<1x8x1x8x16xi8> to vector<1x8x1x8x16xi32>
    %6 = arith.sitofp %5 : vector<1x8x1x8x16xi32> to vector<1x8x1x8x16xf32>
    %7 = arith.truncf %6 : vector<1x8x1x8x16xf32> to vector<1x8x1x8x16xbf16>
    %8 = vector.shape_cast %7 : vector<1x8x1x8x16xbf16> to vector<64x16xbf16>
    %c0_6 = arith.constant 0 : index
    %c0_7 = arith.constant 0 : index
    %9 = vector.load %arg2[%c0_6, %c0_7] : memref<256x32xbf16, #tpu.memory_space<vmem>>, vector<16x32xbf16>
    %cst_8 = arith.constant dense<0.000000e+00> : vector<64x32xf32>
    %10 = tpu.matmul %8, %9, %cst_8 {dimension_numbers = #tpu.dot_dimension_numbers<[1], [0], [0], [1], [0, 0, 1, 1], [], []>} : vector<64x16xbf16>, vector<16x32xbf16>, vector<64x32xf32> -> vector<64x32xf32>
    %11 = arith.addf %3, %10 : vector<64x32xf32>
    %c0_9 = arith.constant 0 : index
    %c0_10 = arith.constant 0 : index
    %c0_11 = arith.constant 0 : index
    %c1 = arith.constant 1 : index
    %c0_12 = arith.constant 0 : index
    %12 = vector.load %arg1[%c0_9, %c0_10, %c0_11, %c1, %c0_12] : memref<1x9x4x9x16xi8, #tpu.memory_space<vmem>>, vector<1x8x1x8x16xi8>
    %13 = arith.extui %12 : vector<1x8x1x8x16xi8> to vector<1x8x1x8x16xi32>
    %14 = arith.sitofp %13 : vector<1x8x1x8x16xi32> to vector<1x8x1x8x16xf32>
    %15 = arith.truncf %14 : vector<1x8x1x8x16xf32> to vector<1x8x1x8x16xbf16>
    %16 = vector.shape_cast %15 : vector<1x8x1x8x16xbf16> to vector<64x16xbf16>
    %c16 = arith.constant 16 : index
    %c0_13 = arith.constant 0 : index
    %17 = vector.load %arg2[%c16, %c0_13] : memref<256x32xbf16, #tpu.memory_space<vmem>>, vector<16x32xbf16>
    %cst_14 = arith.constant dense<0.000000e+00> : vector<64x32xf32>
    %18 = tpu.matmul %16, %17, %cst_14 {dimension_numbers = #tpu.dot_dimension_numbers<[1], [0], [0], [1], [0, 0, 1, 1], [], []>} : vector<64x16xbf16>, vector<16x32xbf16>, vector<64x32xf32> -> vector<64x32xf32>
    %19 = arith.addf %11, %18 : vector<64x32xf32>
    %c0_15 = arith.constant 0 : index
    %c0_16 = arith.constant 0 : index
    %c1_17 = arith.constant 1 : index
    %c0_18 = arith.constant 0 : index
    %c0_19 = arith.constant 0 : index
    %20 = vector.load %arg1[%c0_15, %c0_16, %c1_17, %c0_18, %c0_19] : memref<1x9x4x9x16xi8, #tpu.memory_space<vmem>>, vector<1x8x1x8x16xi8>
    %21 = arith.extui %20 : vector<1x8x1x8x16xi8> to vector<1x8x1x8x16xi32>
    %22 = arith.sitofp %21 : vector<1x8x1x8x16xi32> to vector<1x8x1x8x16xf32>
    %23 = arith.truncf %22 : vector<1x8x1x8x16xf32> to vector<1x8x1x8x16xbf16>
    %24 = vector.shape_cast %23 : vector<1x8x1x8x16xbf16> to vector<64x16xbf16>
    %c32 = arith.constant 32 : index
    %c0_20 = arith.constant 0 : index
    %25 = vector.load %arg2[%c32, %c0_20] : memref<256x32xbf16, #tpu.memory_space<vmem>>, vector<16x32xbf16>
    %cst_21 = arith.constant dense<0.000000e+00> : vector<64x32xf32>
    %26 = tpu.matmul %24, %25, %cst_21 {dimension_numbers = #tpu.dot_dimension_numbers<[1], [0], [0], [1], [0, 0, 1, 1], [], []>} : vector<64x16xbf16>, vector<16x32xbf16>, vector<64x32xf32> -> vector<64x32xf32>
    %27 = arith.addf %19, %26 : vector<64x32xf32>
    %c0_22 = arith.constant 0 : index
    %c0_23 = arith.constant 0 : index
    %c1_24 = arith.constant 1 : index
    %c1_25 = arith.constant 1 : index
    %c0_26 = arith.constant 0 : index
    %28 = vector.load %arg1[%c0_22, %c0_23, %c1_24, %c1_25, %c0_26] : memref<1x9x4x9x16xi8, #tpu.memory_space<vmem>>, vector<1x8x1x8x16xi8>
    %29 = arith.extui %28 : vector<1x8x1x8x16xi8> to vector<1x8x1x8x16xi32>
    %30 = arith.sitofp %29 : vector<1x8x1x8x16xi32> to vector<1x8x1x8x16xf32>
    %31 = arith.truncf %30 : vector<1x8x1x8x16xf32> to vector<1x8x1x8x16xbf16>
    %32 = vector.shape_cast %31 : vector<1x8x1x8x16xbf16> to vector<64x16xbf16>
    %c48 = arith.constant 48 : index
    %c0_27 = arith.constant 0 : index
    %33 = vector.load %arg2[%c48, %c0_27] : memref<256x32xbf16, #tpu.memory_space<vmem>>, vector<16x32xbf16>
    %cst_28 = arith.constant dense<0.000000e+00> : vector<64x32xf32>
    %34 = tpu.matmul %32, %33, %cst_28 {dimension_numbers = #tpu.dot_dimension_numbers<[1], [0], [0], [1], [0, 0, 1, 1], [], []>} : vector<64x16xbf16>, vector<16x32xbf16>, vector<64x32xf32> -> vector<64x32xf32>
    %35 = arith.addf %27, %34 : vector<64x32xf32>
    %c0_29 = arith.constant 0 : index
    %c0_30 = arith.constant 0 : index
    %c2 = arith.constant 2 : index
    %c0_31 = arith.constant 0 : index
    %c0_32 = arith.constant 0 : index
    %36 = vector.load %arg1[%c0_29, %c0_30, %c2, %c0_31, %c0_32] : memref<1x9x4x9x16xi8, #tpu.memory_space<vmem>>, vector<1x8x1x8x16xi8>
    %37 = arith.extui %36 : vector<1x8x1x8x16xi8> to vector<1x8x1x8x16xi32>
    %38 = arith.sitofp %37 : vector<1x8x1x8x16xi32> to vector<1x8x1x8x16xf32>
    %39 = arith.truncf %38 : vector<1x8x1x8x16xf32> to vector<1x8x1x8x16xbf16>
    %40 = vector.shape_cast %39 : vector<1x8x1x8x16xbf16> to vector<64x16xbf16>
    %c64 = arith.constant 64 : index
    %c0_33 = arith.constant 0 : index
    %41 = vector.load %arg2[%c64, %c0_33] : memref<256x32xbf16, #tpu.memory_space<vmem>>, vector<16x32xbf16>
    %cst_34 = arith.constant dense<0.000000e+00> : vector<64x32xf32>
    %42 = tpu.matmul %40, %41, %cst_34 {dimension_numbers = #tpu.dot_dimension_numbers<[1], [0], [0], [1], [0, 0, 1, 1], [], []>} : vector<64x16xbf16>, vector<16x32xbf16>, vector<64x32xf32> -> vector<64x32xf32>
    %43 = arith.addf %35, %42 : vector<64x32xf32>
    %c0_35 = arith.constant 0 : index
    %c0_36 = arith.constant 0 : index
    %c2_37 = arith.constant 2 : index
    %c1_38 = arith.constant 1 : index
    %c0_39 = arith.constant 0 : index
    %44 = vector.load %arg1[%c0_35, %c0_36, %c2_37, %c1_38, %c0_39] : memref<1x9x4x9x16xi8, #tpu.memory_space<vmem>>, vector<1x8x1x8x16xi8>
    %45 = arith.extui %44 : vector<1x8x1x8x16xi8> to vector<1x8x1x8x16xi32>
    %46 = arith.sitofp %45 : vector<1x8x1x8x16xi32> to vector<1x8x1x8x16xf32>
    %47 = arith.truncf %46 : vector<1x8x1x8x16xf32> to vector<1x8x1x8x16xbf16>
    %48 = vector.shape_cast %47 : vector<1x8x1x8x16xbf16> to vector<64x16xbf16>
    %c80 = arith.constant 80 : index
    %c0_40 = arith.constant 0 : index
    %49 = vector.load %arg2[%c80, %c0_40] : memref<256x32xbf16, #tpu.memory_space<vmem>>, vector<16x32xbf16>
    %cst_41 = arith.constant dense<0.000000e+00> : vector<64x32xf32>
    %50 = tpu.matmul %48, %49, %cst_41 {dimension_numbers = #tpu.dot_dimension_numbers<[1], [0], [0], [1], [0, 0, 1, 1], [], []>} : vector<64x16xbf16>, vector<16x32xbf16>, vector<64x32xf32> -> vector<64x32xf32>
    %51 = arith.addf %43, %50 : vector<64x32xf32>
    %c0_42 = arith.constant 0 : index
    %c0_43 = arith.constant 0 : index
    %c3 = arith.constant 3 : index
    %c0_44 = arith.constant 0 : index
    %c0_45 = arith.constant 0 : index
    %52 = vector.load %arg1[%c0_42, %c0_43, %c3, %c0_44, %c0_45] : memref<1x9x4x9x16xi8, #tpu.memory_space<vmem>>, vector<1x8x1x8x16xi8>
    %53 = arith.extui %52 : vector<1x8x1x8x16xi8> to vector<1x8x1x8x16xi32>
    %54 = arith.sitofp %53 : vector<1x8x1x8x16xi32> to vector<1x8x1x8x16xf32>
    %55 = arith.truncf %54 : vector<1x8x1x8x16xf32> to vector<1x8x1x8x16xbf16>
    %56 = vector.shape_cast %55 : vector<1x8x1x8x16xbf16> to vector<64x16xbf16>
    %c96 = arith.constant 96 : index
    %c0_46 = arith.constant 0 : index
    %57 = vector.load %arg2[%c96, %c0_46] : memref<256x32xbf16, #tpu.memory_space<vmem>>, vector<16x32xbf16>
    %cst_47 = arith.constant dense<0.000000e+00> : vector<64x32xf32>
    %58 = tpu.matmul %56, %57, %cst_47 {dimension_numbers = #tpu.dot_dimension_numbers<[1], [0], [0], [1], [0, 0, 1, 1], [], []>} : vector<64x16xbf16>, vector<16x32xbf16>, vector<64x32xf32> -> vector<64x32xf32>
    %59 = arith.addf %51, %58 : vector<64x32xf32>
    %c0_48 = arith.constant 0 : index
    %c0_49 = arith.constant 0 : index
    %c3_50 = arith.constant 3 : index
    %c1_51 = arith.constant 1 : index
    %c0_52 = arith.constant 0 : index
    %60 = vector.load %arg1[%c0_48, %c0_49, %c3_50, %c1_51, %c0_52] : memref<1x9x4x9x16xi8, #tpu.memory_space<vmem>>, vector<1x8x1x8x16xi8>
    %61 = arith.extui %60 : vector<1x8x1x8x16xi8> to vector<1x8x1x8x16xi32>
    %62 = arith.sitofp %61 : vector<1x8x1x8x16xi32> to vector<1x8x1x8x16xf32>
    %63 = arith.truncf %62 : vector<1x8x1x8x16xf32> to vector<1x8x1x8x16xbf16>
    %64 = vector.shape_cast %63 : vector<1x8x1x8x16xbf16> to vector<64x16xbf16>
    %c112 = arith.constant 112 : index
    %c0_53 = arith.constant 0 : index
    %65 = vector.load %arg2[%c112, %c0_53] : memref<256x32xbf16, #tpu.memory_space<vmem>>, vector<16x32xbf16>
    %cst_54 = arith.constant dense<0.000000e+00> : vector<64x32xf32>
    %66 = tpu.matmul %64, %65, %cst_54 {dimension_numbers = #tpu.dot_dimension_numbers<[1], [0], [0], [1], [0, 0, 1, 1], [], []>} : vector<64x16xbf16>, vector<16x32xbf16>, vector<64x32xf32> -> vector<64x32xf32>
    %67 = arith.addf %59, %66 : vector<64x32xf32>
    %c0_55 = arith.constant 0 : index
    %c1_56 = arith.constant 1 : index
    %c0_57 = arith.constant 0 : index
    %c0_58 = arith.constant 0 : index
    %c0_59 = arith.constant 0 : index
    %68 = vector.load %arg1[%c0_55, %c1_56, %c0_57, %c0_58, %c0_59] : memref<1x9x4x9x16xi8, #tpu.memory_space<vmem>>, vector<1x8x1x8x16xi8>
    %69 = arith.extui %68 : vector<1x8x1x8x16xi8> to vector<1x8x1x8x16xi32>
    %70 = arith.sitofp %69 : vector<1x8x1x8x16xi32> to vector<1x8x1x8x16xf32>
    %71 = arith.truncf %70 : vector<1x8x1x8x16xf32> to vector<1x8x1x8x16xbf16>
    %72 = vector.shape_cast %71 : vector<1x8x1x8x16xbf16> to vector<64x16xbf16>
    %c128 = arith.constant 128 : index
    %c0_60 = arith.constant 0 : index
    %73 = vector.load %arg2[%c128, %c0_60] : memref<256x32xbf16, #tpu.memory_space<vmem>>, vector<16x32xbf16>
    %cst_61 = arith.constant dense<0.000000e+00> : vector<64x32xf32>
    %74 = tpu.matmul %72, %73, %cst_61 {dimension_numbers = #tpu.dot_dimension_numbers<[1], [0], [0], [1], [0, 0, 1, 1], [], []>} : vector<64x16xbf16>, vector<16x32xbf16>, vector<64x32xf32> -> vector<64x32xf32>
    %75 = arith.addf %67, %74 : vector<64x32xf32>
    %c0_62 = arith.constant 0 : index
    %c1_63 = arith.constant 1 : index
    %c0_64 = arith.constant 0 : index
    %c1_65 = arith.constant 1 : index
    %c0_66 = arith.constant 0 : index
    %76 = vector.load %arg1[%c0_62, %c1_63, %c0_64, %c1_65, %c0_66] : memref<1x9x4x9x16xi8, #tpu.memory_space<vmem>>, vector<1x8x1x8x16xi8>
    %77 = arith.extui %76 : vector<1x8x1x8x16xi8> to vector<1x8x1x8x16xi32>
    %78 = arith.sitofp %77 : vector<1x8x1x8x16xi32> to vector<1x8x1x8x16xf32>
    %79 = arith.truncf %78 : vector<1x8x1x8x16xf32> to vector<1x8x1x8x16xbf16>
    %80 = vector.shape_cast %79 : vector<1x8x1x8x16xbf16> to vector<64x16xbf16>
    %c144 = arith.constant 144 : index
    %c0_67 = arith.constant 0 : index
    %81 = vector.load %arg2[%c144, %c0_67] : memref<256x32xbf16, #tpu.memory_space<vmem>>, vector<16x32xbf16>
    %cst_68 = arith.constant dense<0.000000e+00> : vector<64x32xf32>
    %82 = tpu.matmul %80, %81, %cst_68 {dimension_numbers = #tpu.dot_dimension_numbers<[1], [0], [0], [1], [0, 0, 1, 1], [], []>} : vector<64x16xbf16>, vector<16x32xbf16>, vector<64x32xf32> -> vector<64x32xf32>
    %83 = arith.addf %75, %82 : vector<64x32xf32>
    %c0_69 = arith.constant 0 : index
    %c1_70 = arith.constant 1 : index
    %c1_71 = arith.constant 1 : index
    %c0_72 = arith.constant 0 : index
    %c0_73 = arith.constant 0 : index
    %84 = vector.load %arg1[%c0_69, %c1_70, %c1_71, %c0_72, %c0_73] : memref<1x9x4x9x16xi8, #tpu.memory_space<vmem>>, vector<1x8x1x8x16xi8>
    %85 = arith.extui %84 : vector<1x8x1x8x16xi8> to vector<1x8x1x8x16xi32>
    %86 = arith.sitofp %85 : vector<1x8x1x8x16xi32> to vector<1x8x1x8x16xf32>
    %87 = arith.truncf %86 : vector<1x8x1x8x16xf32> to vector<1x8x1x8x16xbf16>
    %88 = vector.shape_cast %87 : vector<1x8x1x8x16xbf16> to vector<64x16xbf16>
    %c160 = arith.constant 160 : index
    %c0_74 = arith.constant 0 : index
    %89 = vector.load %arg2[%c160, %c0_74] : memref<256x32xbf16, #tpu.memory_space<vmem>>, vector<16x32xbf16>
    %cst_75 = arith.constant dense<0.000000e+00> : vector<64x32xf32>
    %90 = tpu.matmul %88, %89, %cst_75 {dimension_numbers = #tpu.dot_dimension_numbers<[1], [0], [0], [1], [0, 0, 1, 1], [], []>} : vector<64x16xbf16>, vector<16x32xbf16>, vector<64x32xf32> -> vector<64x32xf32>
    %91 = arith.addf %83, %90 : vector<64x32xf32>
    %c0_76 = arith.constant 0 : index
    %c1_77 = arith.constant 1 : index
    %c1_78 = arith.constant 1 : index
    %c1_79 = arith.constant 1 : index
    %c0_80 = arith.constant 0 : index
    %92 = vector.load %arg1[%c0_76, %c1_77, %c1_78, %c1_79, %c0_80] : memref<1x9x4x9x16xi8, #tpu.memory_space<vmem>>, vector<1x8x1x8x16xi8>
    %93 = arith.extui %92 : vector<1x8x1x8x16xi8> to vector<1x8x1x8x16xi32>
    %94 = arith.sitofp %93 : vector<1x8x1x8x16xi32> to vector<1x8x1x8x16xf32>
    %95 = arith.truncf %94 : vector<1x8x1x8x16xf32> to vector<1x8x1x8x16xbf16>
    %96 = vector.shape_cast %95 : vector<1x8x1x8x16xbf16> to vector<64x16xbf16>
    %c176 = arith.constant 176 : index
    %c0_81 = arith.constant 0 : index
    %97 = vector.load %arg2[%c176, %c0_81] : memref<256x32xbf16, #tpu.memory_space<vmem>>, vector<16x32xbf16>
    %cst_82 = arith.constant dense<0.000000e+00> : vector<64x32xf32>
    %98 = tpu.matmul %96, %97, %cst_82 {dimension_numbers = #tpu.dot_dimension_numbers<[1], [0], [0], [1], [0, 0, 1, 1], [], []>} : vector<64x16xbf16>, vector<16x32xbf16>, vector<64x32xf32> -> vector<64x32xf32>
    %99 = arith.addf %91, %98 : vector<64x32xf32>
    %c0_83 = arith.constant 0 : index
    %c1_84 = arith.constant 1 : index
    %c2_85 = arith.constant 2 : index
    %c0_86 = arith.constant 0 : index
    %c0_87 = arith.constant 0 : index
    %100 = vector.load %arg1[%c0_83, %c1_84, %c2_85, %c0_86, %c0_87] : memref<1x9x4x9x16xi8, #tpu.memory_space<vmem>>, vector<1x8x1x8x16xi8>
    %101 = arith.extui %100 : vector<1x8x1x8x16xi8> to vector<1x8x1x8x16xi32>
    %102 = arith.sitofp %101 : vector<1x8x1x8x16xi32> to vector<1x8x1x8x16xf32>
    %103 = arith.truncf %102 : vector<1x8x1x8x16xf32> to vector<1x8x1x8x16xbf16>
    %104 = vector.shape_cast %103 : vector<1x8x1x8x16xbf16> to vector<64x16xbf16>
    %c192 = arith.constant 192 : index
    %c0_88 = arith.constant 0 : index
    %105 = vector.load %arg2[%c192, %c0_88] : memref<256x32xbf16, #tpu.memory_space<vmem>>, vector<16x32xbf16>
    %cst_89 = arith.constant dense<0.000000e+00> : vector<64x32xf32>
    %106 = tpu.matmul %104, %105, %cst_89 {dimension_numbers = #tpu.dot_dimension_numbers<[1], [0], [0], [1], [0, 0, 1, 1], [], []>} : vector<64x16xbf16>, vector<16x32xbf16>, vector<64x32xf32> -> vector<64x32xf32>
    %107 = arith.addf %99, %106 : vector<64x32xf32>
    %c0_90 = arith.constant 0 : index
    %c1_91 = arith.constant 1 : index
    %c2_92 = arith.constant 2 : index
    %c1_93 = arith.constant 1 : index
    %c0_94 = arith.constant 0 : index
    %108 = vector.load %arg1[%c0_90, %c1_91, %c2_92, %c1_93, %c0_94] : memref<1x9x4x9x16xi8, #tpu.memory_space<vmem>>, vector<1x8x1x8x16xi8>
    %109 = arith.extui %108 : vector<1x8x1x8x16xi8> to vector<1x8x1x8x16xi32>
    %110 = arith.sitofp %109 : vector<1x8x1x8x16xi32> to vector<1x8x1x8x16xf32>
    %111 = arith.truncf %110 : vector<1x8x1x8x16xf32> to vector<1x8x1x8x16xbf16>
    %112 = vector.shape_cast %111 : vector<1x8x1x8x16xbf16> to vector<64x16xbf16>
    %c208 = arith.constant 208 : index
    %c0_95 = arith.constant 0 : index
    %113 = vector.load %arg2[%c208, %c0_95] : memref<256x32xbf16, #tpu.memory_space<vmem>>, vector<16x32xbf16>
    %cst_96 = arith.constant dense<0.000000e+00> : vector<64x32xf32>
    %114 = tpu.matmul %112, %113, %cst_96 {dimension_numbers = #tpu.dot_dimension_numbers<[1], [0], [0], [1], [0, 0, 1, 1], [], []>} : vector<64x16xbf16>, vector<16x32xbf16>, vector<64x32xf32> -> vector<64x32xf32>
    %115 = arith.addf %107, %114 : vector<64x32xf32>
    %c0_97 = arith.constant 0 : index
    %c1_98 = arith.constant 1 : index
    %c3_99 = arith.constant 3 : index
    %c0_100 = arith.constant 0 : index
    %c0_101 = arith.constant 0 : index
    %116 = vector.load %arg1[%c0_97, %c1_98, %c3_99, %c0_100, %c0_101] : memref<1x9x4x9x16xi8, #tpu.memory_space<vmem>>, vector<1x8x1x8x16xi8>
    %117 = arith.extui %116 : vector<1x8x1x8x16xi8> to vector<1x8x1x8x16xi32>
    %118 = arith.sitofp %117 : vector<1x8x1x8x16xi32> to vector<1x8x1x8x16xf32>
    %119 = arith.truncf %118 : vector<1x8x1x8x16xf32> to vector<1x8x1x8x16xbf16>
    %120 = vector.shape_cast %119 : vector<1x8x1x8x16xbf16> to vector<64x16xbf16>
    %c224 = arith.constant 224 : index
    %c0_102 = arith.constant 0 : index
    %121 = vector.load %arg2[%c224, %c0_102] : memref<256x32xbf16, #tpu.memory_space<vmem>>, vector<16x32xbf16>
    %cst_103 = arith.constant dense<0.000000e+00> : vector<64x32xf32>
    %122 = tpu.matmul %120, %121, %cst_103 {dimension_numbers = #tpu.dot_dimension_numbers<[1], [0], [0], [1], [0, 0, 1, 1], [], []>} : vector<64x16xbf16>, vector<16x32xbf16>, vector<64x32xf32> -> vector<64x32xf32>
    %123 = arith.addf %115, %122 : vector<64x32xf32>
    %c0_104 = arith.constant 0 : index
    %c1_105 = arith.constant 1 : index
    %c3_106 = arith.constant 3 : index
    %c1_107 = arith.constant 1 : index
    %c0_108 = arith.constant 0 : index
    %124 = vector.load %arg1[%c0_104, %c1_105, %c3_106, %c1_107, %c0_108] : memref<1x9x4x9x16xi8, #tpu.memory_space<vmem>>, vector<1x8x1x8x16xi8>
    %125 = arith.extui %124 : vector<1x8x1x8x16xi8> to vector<1x8x1x8x16xi32>
    %126 = arith.sitofp %125 : vector<1x8x1x8x16xi32> to vector<1x8x1x8x16xf32>
    %127 = arith.truncf %126 : vector<1x8x1x8x16xf32> to vector<1x8x1x8x16xbf16>
    %128 = vector.shape_cast %127 : vector<1x8x1x8x16xbf16> to vector<64x16xbf16>
    %c240 = arith.constant 240 : index
    %c0_109 = arith.constant 0 : index
    %129 = vector.load %arg2[%c240, %c0_109] : memref<256x32xbf16, #tpu.memory_space<vmem>>, vector<16x32xbf16>
    %cst_110 = arith.constant dense<0.000000e+00> : vector<64x32xf32>
    %130 = tpu.matmul %128, %129, %cst_110 {dimension_numbers = #tpu.dot_dimension_numbers<[1], [0], [0], [1], [0, 0, 1, 1], [], []>} : vector<64x16xbf16>, vector<16x32xbf16>, vector<64x32xf32> -> vector<64x32xf32>
    %131 = arith.addf %123, %130 : vector<64x32xf32>
    %cst_111 = arith.constant 0.000000e+00 : f32
    %132 = vector.broadcast %cst_111 : f32 to vector<64x32xf32>
    %133 = arith.maximumf %131, %132 : vector<64x32xf32>
    %134 = arith.truncf %133 : vector<64x32xf32> to vector<64x32xbf16>
    %135 = vector.shape_cast %134 : vector<64x32xbf16> to vector<1x4x2x4x2x32xbf16>
    %c0_112 = arith.constant 0 : index
    %c0_113 = arith.constant 0 : index
    %c0_114 = arith.constant 0 : index
    %c0_115 = arith.constant 0 : index
    %c0_116 = arith.constant 0 : index
    %c0_117 = arith.constant 0 : index
    %136 = vector.load %arg13[%c0_112, %c0_113, %c0_114, %c0_115, %c0_116, %c0_117] : memref<1x4x2x4x2x32xbf16, #tpu.memory_space<vmem>>, vector<1x4x2x4x2x32xbf16>
    tpu.vector_store %arg13[%c0_112, %c0_113, %c0_114, %c0_115, %c0_116, %c0_117], %135 {strides = array<i32>} : memref<1x4x2x4x2x32xbf16, #tpu.memory_space<vmem>>, vector<1x4x2x4x2x32xbf16>,
    %cst_118 = arith.constant 0.000000e+00 : f32
    %137 = vector.broadcast %cst_118 : f32 to vector<9x64xf32>
    %c0_119 = arith.constant 0 : index
    %c0_120 = arith.constant 0 : index
    %138 = vector.load %arg5[%c0_119, %c0_120] : memref<1x64xf32, #tpu.memory_space<vmem>>, vector<1x64xf32>
    %139 = vector.broadcast %138 : vector<1x64xf32> to vector<9x64xf32>
    %140 = arith.addf %137, %139 : vector<9x64xf32>
    %c0_121 = arith.constant 0 : index
    %c0_122 = arith.constant 0 : index
    %c0_123 = arith.constant 0 : index
    %c0_124 = arith.constant 0 : index
    %c0_125 = arith.constant 0 : index
    %c0_126 = arith.constant 0 : index
    %141 = vector.load %arg13[%c0_121, %c0_122, %c0_123, %c0_124, %c0_125, %c0_126] : memref<1x4x2x4x2x32xbf16, #tpu.memory_space<vmem>>, vector<1x3x1x3x1x32xbf16>
    %142 = vector.shape_cast %141 : vector<1x3x1x3x1x32xbf16> to vector<9x32xbf16>
    %c0_127 = arith.constant 0 : index
    %c0_128 = arith.constant 0 : index
    %143 = vector.load %arg4[%c0_127, %c0_128] : memref<512x64xbf16, #tpu.memory_space<vmem>>, vector<32x64xbf16>
    %cst_129 = arith.constant dense<0.000000e+00> : vector<9x64xf32>
    %144 = tpu.matmul %142, %143, %cst_129 {dimension_numbers = #tpu.dot_dimension_numbers<[1], [0], [0], [1], [0, 0, 1, 1], [], []>} : vector<9x32xbf16>, vector<32x64xbf16>, vector<9x64xf32> -> vector<9x64xf32>
    %145 = arith.addf %140, %144 : vector<9x64xf32>
    %c0_130 = arith.constant 0 : index
    %c0_131 = arith.constant 0 : index
    %c0_132 = arith.constant 0 : index
    %c0_133 = arith.constant 0 : index
    %c1_134 = arith.constant 1 : index
    %c0_135 = arith.constant 0 : index
    %146 = vector.load %arg13[%c0_130, %c0_131, %c0_132, %c0_133, %c1_134, %c0_135] : memref<1x4x2x4x2x32xbf16, #tpu.memory_space<vmem>>, vector<1x3x1x3x1x32xbf16>
    %147 = vector.shape_cast %146 : vector<1x3x1x3x1x32xbf16> to vector<9x32xbf16>
    %c32_136 = arith.constant 32 : index
    %c0_137 = arith.constant 0 : index
    %148 = vector.load %arg4[%c32_136, %c0_137] : memref<512x64xbf16, #tpu.memory_space<vmem>>, vector<32x64xbf16>
    %cst_138 = arith.constant dense<0.000000e+00> : vector<9x64xf32>
    %149 = tpu.matmul %147, %148, %cst_138 {dimension_numbers = #tpu.dot_dimension_numbers<[1], [0], [0], [1], [0, 0, 1, 1], [], []>} : vector<9x32xbf16>, vector<32x64xbf16>, vector<9x64xf32> -> vector<9x64xf32>
    %150 = arith.addf %145, %149 : vector<9x64xf32>
    %c0_139 = arith.constant 0 : index
    %c0_140 = arith.constant 0 : index
    %c0_141 = arith.constant 0 : index
    %c1_142 = arith.constant 1 : index
    %c0_143 = arith.constant 0 : index
    %c0_144 = arith.constant 0 : index
    %151 = vector.load %arg13[%c0_139, %c0_140, %c0_141, %c1_142, %c0_143, %c0_144] : memref<1x4x2x4x2x32xbf16, #tpu.memory_space<vmem>>, vector<1x3x1x3x1x32xbf16>
    %152 = vector.shape_cast %151 : vector<1x3x1x3x1x32xbf16> to vector<9x32xbf16>
    %c64_145 = arith.constant 64 : index
    %c0_146 = arith.constant 0 : index
    %153 = vector.load %arg4[%c64_145, %c0_146] : memref<512x64xbf16, #tpu.memory_space<vmem>>, vector<32x64xbf16>
    %cst_147 = arith.constant dense<0.000000e+00> : vector<9x64xf32>
    %154 = tpu.matmul %152, %153, %cst_147 {dimension_numbers = #tpu.dot_dimension_numbers<[1], [0], [0], [1], [0, 0, 1, 1], [], []>} : vector<9x32xbf16>, vector<32x64xbf16>, vector<9x64xf32> -> vector<9x64xf32>
    %155 = arith.addf %150, %154 : vector<9x64xf32>
    %c0_148 = arith.constant 0 : index
    %c0_149 = arith.constant 0 : index
    %c0_150 = arith.constant 0 : index
    %c1_151 = arith.constant 1 : index
    %c1_152 = arith.constant 1 : index
    %c0_153 = arith.constant 0 : index
    %156 = vector.load %arg13[%c0_148, %c0_149, %c0_150, %c1_151, %c1_152, %c0_153] : memref<1x4x2x4x2x32xbf16, #tpu.memory_space<vmem>>, vector<1x3x1x3x1x32xbf16>
    %157 = vector.shape_cast %156 : vector<1x3x1x3x1x32xbf16> to vector<9x32xbf16>
    %c96_154 = arith.constant 96 : index
    %c0_155 = arith.constant 0 : index
    %158 = vector.load %arg4[%c96_154, %c0_155] : memref<512x64xbf16, #tpu.memory_space<vmem>>, vector<32x64xbf16>
    %cst_156 = arith.constant dense<0.000000e+00> : vector<9x64xf32>
    %159 = tpu.matmul %157, %158, %cst_156 {dimension_numbers = #tpu.dot_dimension_numbers<[1], [0], [0], [1], [0, 0, 1, 1], [], []>} : vector<9x32xbf16>, vector<32x64xbf16>, vector<9x64xf32> -> vector<9x64xf32>
    %160 = arith.addf %155, %159 : vector<9x64xf32>
    %c0_157 = arith.constant 0 : index
    %c0_158 = arith.constant 0 : index
    %c1_159 = arith.constant 1 : index
    %c0_160 = arith.constant 0 : index
    %c0_161 = arith.constant 0 : index
    %c0_162 = arith.constant 0 : index
    %161 = vector.load %arg13[%c0_157, %c0_158, %c1_159, %c0_160, %c0_161, %c0_162] : memref<1x4x2x4x2x32xbf16, #tpu.memory_space<vmem>>, vector<1x3x1x3x1x32xbf16>
    %162 = vector.shape_cast %161 : vector<1x3x1x3x1x32xbf16> to vector<9x32xbf16>
    %c128_163 = arith.constant 128 : index
    %c0_164 = arith.constant 0 : index
    %163 = vector.load %arg4[%c128_163, %c0_164] : memref<512x64xbf16, #tpu.memory_space<vmem>>, vector<32x64xbf16>
    %cst_165 = arith.constant dense<0.000000e+00> : vector<9x64xf32>
    %164 = tpu.matmul %162, %163, %cst_165 {dimension_numbers = #tpu.dot_dimension_numbers<[1], [0], [0], [1], [0, 0, 1, 1], [], []>} : vector<9x32xbf16>, vector<32x64xbf16>, vector<9x64xf32> -> vector<9x64xf32>
    %165 = arith.addf %160, %164 : vector<9x64xf32>
    %c0_166 = arith.constant 0 : index
    %c0_167 = arith.constant 0 : index
    %c1_168 = arith.constant 1 : index
    %c0_169 = arith.constant 0 : index
    %c1_170 = arith.constant 1 : index
    %c0_171 = arith.constant 0 : index
    %166 = vector.load %arg13[%c0_166, %c0_167, %c1_168, %c0_169, %c1_170, %c0_171] : memref<1x4x2x4x2x32xbf16, #tpu.memory_space<vmem>>, vector<1x3x1x3x1x32xbf16>
    %167 = vector.shape_cast %166 : vector<1x3x1x3x1x32xbf16> to vector<9x32xbf16>
    %c160_172 = arith.constant 160 : index
    %c0_173 = arith.constant 0 : index
    %168 = vector.load %arg4[%c160_172, %c0_173] : memref<512x64xbf16, #tpu.memory_space<vmem>>, vector<32x64xbf16>
    %cst_174 = arith.constant dense<0.000000e+00> : vector<9x64xf32>
    %169 = tpu.matmul %167, %168, %cst_174 {dimension_numbers = #tpu.dot_dimension_numbers<[1], [0], [0], [1], [0, 0, 1, 1], [], []>} : vector<9x32xbf16>, vector<32x64xbf16>, vector<9x64xf32> -> vector<9x64xf32>
    %170 = arith.addf %165, %169 : vector<9x64xf32>
    %c0_175 = arith.constant 0 : index
    %c0_176 = arith.constant 0 : index
    %c1_177 = arith.constant 1 : index
    %c1_178 = arith.constant 1 : index
    %c0_179 = arith.constant 0 : index
    %c0_180 = arith.constant 0 : index
    %171 = vector.load %arg13[%c0_175, %c0_176, %c1_177, %c1_178, %c0_179, %c0_180] : memref<1x4x2x4x2x32xbf16, #tpu.memory_space<vmem>>, vector<1x3x1x3x1x32xbf16>
    %172 = vector.shape_cast %171 : vector<1x3x1x3x1x32xbf16> to vector<9x32xbf16>
    %c192_181 = arith.constant 192 : index
    %c0_182 = arith.constant 0 : index
    %173 = vector.load %arg4[%c192_181, %c0_182] : memref<512x64xbf16, #tpu.memory_space<vmem>>, vector<32x64xbf16>
    %cst_183 = arith.constant dense<0.000000e+00> : vector<9x64xf32>
    %174 = tpu.matmul %172, %173, %cst_183 {dimension_numbers = #tpu.dot_dimension_numbers<[1], [0], [0], [1], [0, 0, 1, 1], [], []>} : vector<9x32xbf16>, vector<32x64xbf16>, vector<9x64xf32> -> vector<9x64xf32>
    %175 = arith.addf %170, %174 : vector<9x64xf32>
    %c0_184 = arith.constant 0 : index
    %c0_185 = arith.constant 0 : index
    %c1_186 = arith.constant 1 : index
    %c1_187 = arith.constant 1 : index
    %c1_188 = arith.constant 1 : index
    %c0_189 = arith.constant 0 : index
    %176 = vector.load %arg13[%c0_184, %c0_185, %c1_186, %c1_187, %c1_188, %c0_189] : memref<1x4x2x4x2x32xbf16, #tpu.memory_space<vmem>>, vector<1x3x1x3x1x32xbf16>
    %177 = vector.shape_cast %176 : vector<1x3x1x3x1x32xbf16> to vector<9x32xbf16>
    %c224_190 = arith.constant 224 : index
    %c0_191 = arith.constant 0 : index
    %178 = vector.load %arg4[%c224_190, %c0_191] : memref<512x64xbf16, #tpu.memory_space<vmem>>, vector<32x64xbf16>
    %cst_192 = arith.constant dense<0.000000e+00> : vector<9x64xf32>
    %179 = tpu.matmul %177, %178, %cst_192 {dimension_numbers = #tpu.dot_dimension_numbers<[1], [0], [0], [1], [0, 0, 1, 1], [], []>} : vector<9x32xbf16>, vector<32x64xbf16>, vector<9x64xf32> -> vector<9x64xf32>
    %180 = arith.addf %175, %179 : vector<9x64xf32>
    %c0_193 = arith.constant 0 : index
    %c1_194 = arith.constant 1 : index
    %c0_195 = arith.constant 0 : index
    %c0_196 = arith.constant 0 : index
    %c0_197 = arith.constant 0 : index
    %c0_198 = arith.constant 0 : index
    %181 = vector.load %arg13[%c0_193, %c1_194, %c0_195, %c0_196, %c0_197, %c0_198] : memref<1x4x2x4x2x32xbf16, #tpu.memory_space<vmem>>, vector<1x3x1x3x1x32xbf16>
    %182 = vector.shape_cast %181 : vector<1x3x1x3x1x32xbf16> to vector<9x32xbf16>
    %c256 = arith.constant 256 : index
    %c0_199 = arith.constant 0 : index
    %183 = vector.load %arg4[%c256, %c0_199] : memref<512x64xbf16, #tpu.memory_space<vmem>>, vector<32x64xbf16>
    %cst_200 = arith.constant dense<0.000000e+00> : vector<9x64xf32>
    %184 = tpu.matmul %182, %183, %cst_200 {dimension_numbers = #tpu.dot_dimension_numbers<[1], [0], [0], [1], [0, 0, 1, 1], [], []>} : vector<9x32xbf16>, vector<32x64xbf16>, vector<9x64xf32> -> vector<9x64xf32>
    %185 = arith.addf %180, %184 : vector<9x64xf32>
    %c0_201 = arith.constant 0 : index
    %c1_202 = arith.constant 1 : index
    %c0_203 = arith.constant 0 : index
    %c0_204 = arith.constant 0 : index
    %c1_205 = arith.constant 1 : index
    %c0_206 = arith.constant 0 : index
    %186 = vector.load %arg13[%c0_201, %c1_202, %c0_203, %c0_204, %c1_205, %c0_206] : memref<1x4x2x4x2x32xbf16, #tpu.memory_space<vmem>>, vector<1x3x1x3x1x32xbf16>
    %187 = vector.shape_cast %186 : vector<1x3x1x3x1x32xbf16> to vector<9x32xbf16>
    %c288 = arith.constant 288 : index
    %c0_207 = arith.constant 0 : index
    %188 = vector.load %arg4[%c288, %c0_207] : memref<512x64xbf16, #tpu.memory_space<vmem>>, vector<32x64xbf16>
    %cst_208 = arith.constant dense<0.000000e+00> : vector<9x64xf32>
    %189 = tpu.matmul %187, %188, %cst_208 {dimension_numbers = #tpu.dot_dimension_numbers<[1], [0], [0], [1], [0, 0, 1, 1], [], []>} : vector<9x32xbf16>, vector<32x64xbf16>, vector<9x64xf32> -> vector<9x64xf32>
    %190 = arith.addf %185, %189 : vector<9x64xf32>
    %c0_209 = arith.constant 0 : index
    %c1_210 = arith.constant 1 : index
    %c0_211 = arith.constant 0 : index
    %c1_212 = arith.constant 1 : index
    %c0_213 = arith.constant 0 : index
    %c0_214 = arith.constant 0 : index
    %191 = vector.load %arg13[%c0_209, %c1_210, %c0_211, %c1_212, %c0_213, %c0_214] : memref<1x4x2x4x2x32xbf16, #tpu.memory_space<vmem>>, vector<1x3x1x3x1x32xbf16>
    %192 = vector.shape_cast %191 : vector<1x3x1x3x1x32xbf16> to vector<9x32xbf16>
    %c320 = arith.constant 320 : index
    %c0_215 = arith.constant 0 : index
    %193 = vector.load %arg4[%c320, %c0_215] : memref<512x64xbf16, #tpu.memory_space<vmem>>, vector<32x64xbf16>
    %cst_216 = arith.constant dense<0.000000e+00> : vector<9x64xf32>
    %194 = tpu.matmul %192, %193, %cst_216 {dimension_numbers = #tpu.dot_dimension_numbers<[1], [0], [0], [1], [0, 0, 1, 1], [], []>} : vector<9x32xbf16>, vector<32x64xbf16>, vector<9x64xf32> -> vector<9x64xf32>
    %195 = arith.addf %190, %194 : vector<9x64xf32>
    %c0_217 = arith.constant 0 : index
    %c1_218 = arith.constant 1 : index
    %c0_219 = arith.constant 0 : index
    %c1_220 = arith.constant 1 : index
    %c1_221 = arith.constant 1 : index
    %c0_222 = arith.constant 0 : index
    %196 = vector.load %arg13[%c0_217, %c1_218, %c0_219, %c1_220, %c1_221, %c0_222] : memref<1x4x2x4x2x32xbf16, #tpu.memory_space<vmem>>, vector<1x3x1x3x1x32xbf16>
    %197 = vector.shape_cast %196 : vector<1x3x1x3x1x32xbf16> to vector<9x32xbf16>
    %c352 = arith.constant 352 : index
    %c0_223 = arith.constant 0 : index
    %198 = vector.load %arg4[%c352, %c0_223] : memref<512x64xbf16, #tpu.memory_space<vmem>>, vector<32x64xbf16>
    %cst_224 = arith.constant dense<0.000000e+00> : vector<9x64xf32>
    %199 = tpu.matmul %197, %198, %cst_224 {dimension_numbers = #tpu.dot_dimension_numbers<[1], [0], [0], [1], [0, 0, 1, 1], [], []>} : vector<9x32xbf16>, vector<32x64xbf16>, vector<9x64xf32> -> vector<9x64xf32>
    %200 = arith.addf %195, %199 : vector<9x64xf32>
    %c0_225 = arith.constant 0 : index
    %c1_226 = arith.constant 1 : index
    %c1_227 = arith.constant 1 : index
    %c0_228 = arith.constant 0 : index
    %c0_229 = arith.constant 0 : index
    %c0_230 = arith.constant 0 : index
    %201 = vector.load %arg13[%c0_225, %c1_226, %c1_227, %c0_228, %c0_229, %c0_230] : memref<1x4x2x4x2x32xbf16, #tpu.memory_space<vmem>>, vector<1x3x1x3x1x32xbf16>
    %202 = vector.shape_cast %201 : vector<1x3x1x3x1x32xbf16> to vector<9x32xbf16>
    %c384 = arith.constant 384 : index
    %c0_231 = arith.constant 0 : index
    %203 = vector.load %arg4[%c384, %c0_231] : memref<512x64xbf16, #tpu.memory_space<vmem>>, vector<32x64xbf16>
    %cst_232 = arith.constant dense<0.000000e+00> : vector<9x64xf32>
    %204 = tpu.matmul %202, %203, %cst_232 {dimension_numbers = #tpu.dot_dimension_numbers<[1], [0], [0], [1], [0, 0, 1, 1], [], []>} : vector<9x32xbf16>, vector<32x64xbf16>, vector<9x64xf32> -> vector<9x64xf32>
    %205 = arith.addf %200, %204 : vector<9x64xf32>
    %c0_233 = arith.constant 0 : index
    %c1_234 = arith.constant 1 : index
    %c1_235 = arith.constant 1 : index
    %c0_236 = arith.constant 0 : index
    %c1_237 = arith.constant 1 : index
    %c0_238 = arith.constant 0 : index
    %206 = vector.load %arg13[%c0_233, %c1_234, %c1_235, %c0_236, %c1_237, %c0_238] : memref<1x4x2x4x2x32xbf16, #tpu.memory_space<vmem>>, vector<1x3x1x3x1x32xbf16>
    %207 = vector.shape_cast %206 : vector<1x3x1x3x1x32xbf16> to vector<9x32xbf16>
    %c416 = arith.constant 416 : index
    %c0_239 = arith.constant 0 : index
    %208 = vector.load %arg4[%c416, %c0_239] : memref<512x64xbf16, #tpu.memory_space<vmem>>, vector<32x64xbf16>
    %cst_240 = arith.constant dense<0.000000e+00> : vector<9x64xf32>
    %209 = tpu.matmul %207, %208, %cst_240 {dimension_numbers = #tpu.dot_dimension_numbers<[1], [0], [0], [1], [0, 0, 1, 1], [], []>} : vector<9x32xbf16>, vector<32x64xbf16>, vector<9x64xf32> -> vector<9x64xf32>
    %210 = arith.addf %205, %209 : vector<9x64xf32>
    %c0_241 = arith.constant 0 : index
    %c1_242 = arith.constant 1 : index
    %c1_243 = arith.constant 1 : index
    %c1_244 = arith.constant 1 : index
    %c0_245 = arith.constant 0 : index
    %c0_246 = arith.constant 0 : index
    %211 = vector.load %arg13[%c0_241, %c1_242, %c1_243, %c1_244, %c0_245, %c0_246] : memref<1x4x2x4x2x32xbf16, #tpu.memory_space<vmem>>, vector<1x3x1x3x1x32xbf16>
    %212 = vector.shape_cast %211 : vector<1x3x1x3x1x32xbf16> to vector<9x32xbf16>
    %c448 = arith.constant 448 : index
    %c0_247 = arith.constant 0 : index
    %213 = vector.load %arg4[%c448, %c0_247] : memref<512x64xbf16, #tpu.memory_space<vmem>>, vector<32x64xbf16>
    %cst_248 = arith.constant dense<0.000000e+00> : vector<9x64xf32>
    %214 = tpu.matmul %212, %213, %cst_248 {dimension_numbers = #tpu.dot_dimension_numbers<[1], [0], [0], [1], [0, 0, 1, 1], [], []>} : vector<9x32xbf16>, vector<32x64xbf16>, vector<9x64xf32> -> vector<9x64xf32>
    %215 = arith.addf %210, %214 : vector<9x64xf32>
    %c0_249 = arith.constant 0 : index
    %c1_250 = arith.constant 1 : index
    %c1_251 = arith.constant 1 : index
    %c1_252 = arith.constant 1 : index
    %c1_253 = arith.constant 1 : index
    %c0_254 = arith.constant 0 : index
    %216 = vector.load %arg13[%c0_249, %c1_250, %c1_251, %c1_252, %c1_253, %c0_254] : memref<1x4x2x4x2x32xbf16, #tpu.memory_space<vmem>>, vector<1x3x1x3x1x32xbf16>
    %217 = vector.shape_cast %216 : vector<1x3x1x3x1x32xbf16> to vector<9x32xbf16>
    %c480 = arith.constant 480 : index
    %c0_255 = arith.constant 0 : index
    %218 = vector.load %arg4[%c480, %c0_255] : memref<512x64xbf16, #tpu.memory_space<vmem>>, vector<32x64xbf16>
    %cst_256 = arith.constant dense<0.000000e+00> : vector<9x64xf32>
    %219 = tpu.matmul %217, %218, %cst_256 {dimension_numbers = #tpu.dot_dimension_numbers<[1], [0], [0], [1], [0, 0, 1, 1], [], []>} : vector<9x32xbf16>, vector<32x64xbf16>, vector<9x64xf32> -> vector<9x64xf32>
    %220 = arith.addf %215, %219 : vector<9x64xf32>
    %cst_257 = arith.constant 0.000000e+00 : f32
    %221 = vector.broadcast %cst_257 : f32 to vector<9x64xf32>
    %222 = arith.maximumf %220, %221 : vector<9x64xf32>
    %223 = arith.truncf %222 : vector<9x64xf32> to vector<9x64xbf16>
    %224 = vector.shape_cast %223 : vector<9x64xbf16> to vector<1x3x3x64xbf16>
    %c0_258 = arith.constant 0 : index
    %c0_259 = arith.constant 0 : index
    %c0_260 = arith.constant 0 : index
    %c0_261 = arith.constant 0 : index
    %225 = vector.load %arg14[%c0_258, %c0_259, %c0_260, %c0_261] : memref<1x3x3x64xbf16, #tpu.memory_space<vmem>>, vector<1x3x3x64xbf16>
    tpu.vector_store %arg14[%c0_258, %c0_259, %c0_260, %c0_261], %224 {strides = array<i32>} : memref<1x3x3x64xbf16, #tpu.memory_space<vmem>>, vector<1x3x3x64xbf16>,
    %cst_262 = arith.constant 0.000000e+00 : f32
    %226 = vector.broadcast %cst_262 : f32 to vector<1x64xf32>
    %c0_263 = arith.constant 0 : index
    %c0_264 = arith.constant 0 : index
    %227 = vector.load %arg7[%c0_263, %c0_264] : memref<1x64xf32, #tpu.memory_space<vmem>>, vector<1x64xf32>
    %228 = arith.addf %226, %227 : vector<1x64xf32>
    %c0_265 = arith.constant 0 : index
    %c0_266 = arith.constant 0 : index
    %c0_267 = arith.constant 0 : index
    %c0_268 = arith.constant 0 : index
    %229 = vector.load %arg14[%c0_265, %c0_266, %c0_267, %c0_268] : memref<1x3x3x64xbf16, #tpu.memory_space<vmem>>, vector<1x1x1x64xbf16>
    %230 = vector.shape_cast %229 : vector<1x1x1x64xbf16> to vector<1x64xbf16>
    %c0_269 = arith.constant 0 : index
    %c0_270 = arith.constant 0 : index
    %231 = vector.load %arg6[%c0_269, %c0_270] : memref<576x64xbf16, #tpu.memory_space<vmem>>, vector<64x64xbf16>
    %cst_271 = arith.constant dense<0.000000e+00> : vector<1x64xf32>
    %232 = tpu.matmul %230, %231, %cst_271 {dimension_numbers = #tpu.dot_dimension_numbers<[1], [0], [0], [1], [0, 0, 1, 1], [], []>} : vector<1x64xbf16>, vector<64x64xbf16>, vector<1x64xf32> -> vector<1x64xf32>
    %233 = arith.addf %228, %232 : vector<1x64xf32>
    %c0_272 = arith.constant 0 : index
    %c0_273 = arith.constant 0 : index
    %c1_274 = arith.constant 1 : index
    %c0_275 = arith.constant 0 : index
    %234 = vector.load %arg14[%c0_272, %c0_273, %c1_274, %c0_275] : memref<1x3x3x64xbf16, #tpu.memory_space<vmem>>, vector<1x1x1x64xbf16>
    %235 = vector.shape_cast %234 : vector<1x1x1x64xbf16> to vector<1x64xbf16>
    %c64_276 = arith.constant 64 : index
    %c0_277 = arith.constant 0 : index
    %236 = vector.load %arg6[%c64_276, %c0_277] : memref<576x64xbf16, #tpu.memory_space<vmem>>, vector<64x64xbf16>
    %cst_278 = arith.constant dense<0.000000e+00> : vector<1x64xf32>
    %237 = tpu.matmul %235, %236, %cst_278 {dimension_numbers = #tpu.dot_dimension_numbers<[1], [0], [0], [1], [0, 0, 1, 1], [], []>} : vector<1x64xbf16>, vector<64x64xbf16>, vector<1x64xf32> -> vector<1x64xf32>
    %238 = arith.addf %233, %237 : vector<1x64xf32>
    %c0_279 = arith.constant 0 : index
    %c0_280 = arith.constant 0 : index
    %c2_281 = arith.constant 2 : index
    %c0_282 = arith.constant 0 : index
    %239 = vector.load %arg14[%c0_279, %c0_280, %c2_281, %c0_282] : memref<1x3x3x64xbf16, #tpu.memory_space<vmem>>, vector<1x1x1x64xbf16>
    %240 = vector.shape_cast %239 : vector<1x1x1x64xbf16> to vector<1x64xbf16>
    %c128_283 = arith.constant 128 : index
    %c0_284 = arith.constant 0 : index
    %241 = vector.load %arg6[%c128_283, %c0_284] : memref<576x64xbf16, #tpu.memory_space<vmem>>, vector<64x64xbf16>
    %cst_285 = arith.constant dense<0.000000e+00> : vector<1x64xf32>
    %242 = tpu.matmul %240, %241, %cst_285 {dimension_numbers = #tpu.dot_dimension_numbers<[1], [0], [0], [1], [0, 0, 1, 1], [], []>} : vector<1x64xbf16>, vector<64x64xbf16>, vector<1x64xf32> -> vector<1x64xf32>
    %243 = arith.addf %238, %242 : vector<1x64xf32>
    %c0_286 = arith.constant 0 : index
    %c1_287 = arith.constant 1 : index
    %c0_288 = arith.constant 0 : index
    %c0_289 = arith.constant 0 : index
    %244 = vector.load %arg14[%c0_286, %c1_287, %c0_288, %c0_289] : memref<1x3x3x64xbf16, #tpu.memory_space<vmem>>, vector<1x1x1x64xbf16>
    %245 = vector.shape_cast %244 : vector<1x1x1x64xbf16> to vector<1x64xbf16>
    %c192_290 = arith.constant 192 : index
    %c0_291 = arith.constant 0 : index
    %246 = vector.load %arg6[%c192_290, %c0_291] : memref<576x64xbf16, #tpu.memory_space<vmem>>, vector<64x64xbf16>
    %cst_292 = arith.constant dense<0.000000e+00> : vector<1x64xf32>
    %247 = tpu.matmul %245, %246, %cst_292 {dimension_numbers = #tpu.dot_dimension_numbers<[1], [0], [0], [1], [0, 0, 1, 1], [], []>} : vector<1x64xbf16>, vector<64x64xbf16>, vector<1x64xf32> -> vector<1x64xf32>
    %248 = arith.addf %243, %247 : vector<1x64xf32>
    %c0_293 = arith.constant 0 : index
    %c1_294 = arith.constant 1 : index
    %c1_295 = arith.constant 1 : index
    %c0_296 = arith.constant 0 : index
    %249 = vector.load %arg14[%c0_293, %c1_294, %c1_295, %c0_296] : memref<1x3x3x64xbf16, #tpu.memory_space<vmem>>, vector<1x1x1x64xbf16>
    %250 = vector.shape_cast %249 : vector<1x1x1x64xbf16> to vector<1x64xbf16>
    %c256_297 = arith.constant 256 : index
    %c0_298 = arith.constant 0 : index
    %251 = vector.load %arg6[%c256_297, %c0_298] : memref<576x64xbf16, #tpu.memory_space<vmem>>, vector<64x64xbf16>
    %cst_299 = arith.constant dense<0.000000e+00> : vector<1x64xf32>
    %252 = tpu.matmul %250, %251, %cst_299 {dimension_numbers = #tpu.dot_dimension_numbers<[1], [0], [0], [1], [0, 0, 1, 1], [], []>} : vector<1x64xbf16>, vector<64x64xbf16>, vector<1x64xf32> -> vector<1x64xf32>
    %253 = arith.addf %248, %252 : vector<1x64xf32>
    %c0_300 = arith.constant 0 : index
    %c1_301 = arith.constant 1 : index
    %c2_302 = arith.constant 2 : index
    %c0_303 = arith.constant 0 : index
    %254 = vector.load %arg14[%c0_300, %c1_301, %c2_302, %c0_303] : memref<1x3x3x64xbf16, #tpu.memory_space<vmem>>, vector<1x1x1x64xbf16>
    %255 = vector.shape_cast %254 : vector<1x1x1x64xbf16> to vector<1x64xbf16>
    %c320_304 = arith.constant 320 : index
    %c0_305 = arith.constant 0 : index
    %256 = vector.load %arg6[%c320_304, %c0_305] : memref<576x64xbf16, #tpu.memory_space<vmem>>, vector<64x64xbf16>
    %cst_306 = arith.constant dense<0.000000e+00> : vector<1x64xf32>
    %257 = tpu.matmul %255, %256, %cst_306 {dimension_numbers = #tpu.dot_dimension_numbers<[1], [0], [0], [1], [0, 0, 1, 1], [], []>} : vector<1x64xbf16>, vector<64x64xbf16>, vector<1x64xf32> -> vector<1x64xf32>
    %258 = arith.addf %253, %257 : vector<1x64xf32>
    %c0_307 = arith.constant 0 : index
    %c2_308 = arith.constant 2 : index
    %c0_309 = arith.constant 0 : index
    %c0_310 = arith.constant 0 : index
    %259 = vector.load %arg14[%c0_307, %c2_308, %c0_309, %c0_310] : memref<1x3x3x64xbf16, #tpu.memory_space<vmem>>, vector<1x1x1x64xbf16>
    %260 = vector.shape_cast %259 : vector<1x1x1x64xbf16> to vector<1x64xbf16>
    %c384_311 = arith.constant 384 : index
    %c0_312 = arith.constant 0 : index
    %261 = vector.load %arg6[%c384_311, %c0_312] : memref<576x64xbf16, #tpu.memory_space<vmem>>, vector<64x64xbf16>
    %cst_313 = arith.constant dense<0.000000e+00> : vector<1x64xf32>
    %262 = tpu.matmul %260, %261, %cst_313 {dimension_numbers = #tpu.dot_dimension_numbers<[1], [0], [0], [1], [0, 0, 1, 1], [], []>} : vector<1x64xbf16>, vector<64x64xbf16>, vector<1x64xf32> -> vector<1x64xf32>
    %263 = arith.addf %258, %262 : vector<1x64xf32>
    %c0_314 = arith.constant 0 : index
    %c2_315 = arith.constant 2 : index
    %c1_316 = arith.constant 1 : index
    %c0_317 = arith.constant 0 : index
    %264 = vector.load %arg14[%c0_314, %c2_315, %c1_316, %c0_317] : memref<1x3x3x64xbf16, #tpu.memory_space<vmem>>, vector<1x1x1x64xbf16>
    %265 = vector.shape_cast %264 : vector<1x1x1x64xbf16> to vector<1x64xbf16>
    %c448_318 = arith.constant 448 : index
    %c0_319 = arith.constant 0 : index
    %266 = vector.load %arg6[%c448_318, %c0_319] : memref<576x64xbf16, #tpu.memory_space<vmem>>, vector<64x64xbf16>
    %cst_320 = arith.constant dense<0.000000e+00> : vector<1x64xf32>
    %267 = tpu.matmul %265, %266, %cst_320 {dimension_numbers = #tpu.dot_dimension_numbers<[1], [0], [0], [1], [0, 0, 1, 1], [], []>} : vector<1x64xbf16>, vector<64x64xbf16>, vector<1x64xf32> -> vector<1x64xf32>
    %268 = arith.addf %263, %267 : vector<1x64xf32>
    %c0_321 = arith.constant 0 : index
    %c2_322 = arith.constant 2 : index
    %c2_323 = arith.constant 2 : index
    %c0_324 = arith.constant 0 : index
    %269 = vector.load %arg14[%c0_321, %c2_322, %c2_323, %c0_324] : memref<1x3x3x64xbf16, #tpu.memory_space<vmem>>, vector<1x1x1x64xbf16>
    %270 = vector.shape_cast %269 : vector<1x1x1x64xbf16> to vector<1x64xbf16>
    %c512 = arith.constant 512 : index
    %c0_325 = arith.constant 0 : index
    %271 = vector.load %arg6[%c512, %c0_325] : memref<576x64xbf16, #tpu.memory_space<vmem>>, vector<64x64xbf16>
    %cst_326 = arith.constant dense<0.000000e+00> : vector<1x64xf32>
    %272 = tpu.matmul %270, %271, %cst_326 {dimension_numbers = #tpu.dot_dimension_numbers<[1], [0], [0], [1], [0, 0, 1, 1], [], []>} : vector<1x64xbf16>, vector<64x64xbf16>, vector<1x64xf32> -> vector<1x64xf32>
    %273 = arith.addf %268, %272 : vector<1x64xf32>
    %cst_327 = arith.constant 0.000000e+00 : f32
    %274 = vector.broadcast %cst_327 : f32 to vector<1x64xf32>
    %275 = arith.maximumf %273, %274 : vector<1x64xf32>
    %276 = arith.truncf %275 : vector<1x64xf32> to vector<1x64xbf16>
    %277 = vector.shape_cast %276 : vector<1x64xbf16> to vector<1x1x1x64xbf16>
    %cst_328 = arith.constant 0.000000e+00 : f32
    %278 = vector.broadcast %cst_328 : f32 to vector<1x128xf32>
    %c0_329 = arith.constant 0 : index
    %c0_330 = arith.constant 0 : index
    %279 = vector.load %arg9[%c0_329, %c0_330] : memref<1x128xf32, #tpu.memory_space<vmem>>, vector<1x128xf32>
    %280 = arith.addf %278, %279 : vector<1x128xf32>
    %281 = vector.shape_cast %277 : vector<1x1x1x64xbf16> to vector<1x64xbf16>
    %c0_331 = arith.constant 0 : index
    %c0_332 = arith.constant 0 : index
    %282 = vector.load %arg8[%c0_331, %c0_332] : memref<64x128xbf16, #tpu.memory_space<vmem>>, vector<64x128xbf16>
    %cst_333 = arith.constant dense<0.000000e+00> : vector<1x128xf32>
    %283 = tpu.matmul %281, %282, %cst_333 {dimension_numbers = #tpu.dot_dimension_numbers<[1], [0], [0], [1], [0, 0, 1, 1], [], []>} : vector<1x64xbf16>, vector<64x128xbf16>, vector<1x128xf32> -> vector<1x128xf32>
    %284 = arith.addf %280, %283 : vector<1x128xf32>
    %cst_334 = arith.constant 0.000000e+00 : f32
    %285 = vector.broadcast %cst_334 : f32 to vector<1x128xf32>
    %286 = arith.maximumf %284, %285 : vector<1x128xf32>
    %c0_335 = arith.constant 0 : index
    %c0_336 = arith.constant 0 : index
    %287 = vector.load %arg10[%c0_335, %c0_336] : memref<128x128xf32, #tpu.memory_space<vmem>>, vector<128x128xf32>
    %cst_337 = arith.constant dense<0.000000e+00> : vector<1x128xf32>
    %288 = tpu.matmul %286, %287, %cst_337 {dimension_numbers = #tpu.dot_dimension_numbers<[1], [0], [0], [1], [0, 0, 1, 1], [], []>} : vector<1x128xf32>, vector<128x128xf32>, vector<1x128xf32> -> vector<1x128xf32>
    %c0_338 = arith.constant 0 : index
    %c0_339 = arith.constant 0 : index
    %289 = vector.load %arg11[%c0_338, %c0_339] : memref<1x128xf32, #tpu.memory_space<vmem>>, vector<1x128xf32>
    %290 = arith.addf %288, %289 : vector<1x128xf32>
    %291 = vector.shape_cast %290 : vector<1x128xf32> to vector<1x1x128xf32>
    %c0_340 = arith.constant 0 : index
    %c0_341 = arith.constant 0 : index
    %c0_342 = arith.constant 0 : index
    %292 = vector.load %arg12[%c0_340, %c0_341, %c0_342] : memref<1x1x128xf32, #tpu.memory_space<vmem>>, vector<1x1x128xf32>
    tpu.vector_store %arg12[%c0_340, %c0_341, %c0_342], %291 {strides = array<i32>} : memref<1x1x128xf32, #tpu.memory_space<vmem>>, vector<1x1x128xf32>,
    return
  }
  func.func @transform_0(%arg0: i32) -> (i32, i32, i32, i32, i32) {
    %c0_i32 = arith.constant 0 : i32
    %c0_i32_0 = arith.constant 0 : i32
    %c0_i32_1 = arith.constant 0 : i32
    %c0_i32_2 = arith.constant 0 : i32
    %c0_i32_3 = arith.constant 0 : i32
    return %arg0, %c0_i32, %c0_i32_0, %c0_i32_1, %c0_i32_2 : i32, i32, i32, i32, i32
  }
  func.func @transform_1(%arg0: i32) -> (i32, i32) {
    %c0_i32 = arith.constant 0 : i32
    %c0_i32_0 = arith.constant 0 : i32
    %c0_i32_1 = arith.constant 0 : i32
    return %c0_i32, %c0_i32_0 : i32, i32
  }
  func.func @transform_2(%arg0: i32) -> (i32, i32) {
    %c0_i32 = arith.constant 0 : i32
    %c0_i32_0 = arith.constant 0 : i32
    %c0_i32_1 = arith.constant 0 : i32
    return %c0_i32, %c0_i32_0 : i32, i32
  }
  func.func @transform_3(%arg0: i32) -> (i32, i32) {
    %c0_i32 = arith.constant 0 : i32
    %c0_i32_0 = arith.constant 0 : i32
    %c0_i32_1 = arith.constant 0 : i32
    return %c0_i32, %c0_i32_0 : i32, i32
  }
  func.func @transform_4(%arg0: i32) -> (i32, i32) {
    %c0_i32 = arith.constant 0 : i32
    %c0_i32_0 = arith.constant 0 : i32
    %c0_i32_1 = arith.constant 0 : i32
    return %c0_i32, %c0_i32_0 : i32, i32
  }
  func.func @transform_5(%arg0: i32) -> (i32, i32) {
    %c0_i32 = arith.constant 0 : i32
    %c0_i32_0 = arith.constant 0 : i32
    %c0_i32_1 = arith.constant 0 : i32
    return %c0_i32, %c0_i32_0 : i32, i32
  }
  func.func @transform_6(%arg0: i32) -> (i32, i32) {
    %c0_i32 = arith.constant 0 : i32
    %c0_i32_0 = arith.constant 0 : i32
    %c0_i32_1 = arith.constant 0 : i32
    return %c0_i32, %c0_i32_0 : i32, i32
  }
  func.func @transform_7(%arg0: i32) -> (i32, i32) {
    %c0_i32 = arith.constant 0 : i32
    %c0_i32_0 = arith.constant 0 : i32
    %c0_i32_1 = arith.constant 0 : i32
    return %c0_i32, %c0_i32_0 : i32, i32
  }
  func.func @transform_8(%arg0: i32) -> (i32, i32) {
    %c0_i32 = arith.constant 0 : i32
    %c0_i32_0 = arith.constant 0 : i32
    %c0_i32_1 = arith.constant 0 : i32
    return %c0_i32, %c0_i32_0 : i32, i32
  }
  func.func @transform_9(%arg0: i32) -> (i32, i32) {
    %c0_i32 = arith.constant 0 : i32
    %c0_i32_0 = arith.constant 0 : i32
    %c0_i32_1 = arith.constant 0 : i32
    return %c0_i32, %c0_i32_0 : i32, i32
  }
  func.func @transform_10(%arg0: i32) -> (i32, i32) {
    %c0_i32 = arith.constant 0 : i32
    %c0_i32_0 = arith.constant 0 : i32
    %c0_i32_1 = arith.constant 0 : i32
    return %c0_i32, %c0_i32_0 : i32, i32
  }
  func.func @transform_11(%arg0: i32) -> (i32, i32, i32) {
    %c0_i32 = arith.constant 0 : i32
    %c0_i32_0 = arith.constant 0 : i32
    %c0_i32_1 = arith.constant 0 : i32
    return %arg0, %c0_i32, %c0_i32_0 : i32, i32, i32
  }
}

</mosaic_0001>

<bundles_post_ra>
// kernel: nature_cnn_forward.1
= control target key start
LH: loop header
LB: loop body
LE: loop exit
PB: predicated region body
PF: predicated region fallthrough
CT: control target
= control target key end

     0   :  { %s10120_s17 = smov 0   ;;  %s11531_s0 = inlined_call_operand.vmem [shape: u8[2,9,4,9,16], index: 0, kind: input, shape index: {}]   ;;  %s11532_s1 = inlined_call_operand.vmem [shape: bf16[256,32], index: 1, kind: input, shape index: {}]   ;;  %s11533_s2 = inlined_call_operand.vmem [shape: f32[1,32], index: 2, kind: input, shape index: {}]   ;;  %s11534_s3 = inlined_call_operand.vmem [shape: bf16[512,64], index: 3, kind: input, shape index: {}]   ;;  %s11535_s4 = inlined_call_operand.vmem [shape: f32[1,64], index: 4, kind: input, shape index: {}]   ;;  %s11536_s5 = inlined_call_operand.vmem [shape: bf16[576,64], index: 5, kind: input, shape index: {}]   ;;  %s11537_s6 = inlined_call_operand.vmem [shape: f32[1,64], index: 6, kind: input, shape index: {}]   ;;  %s11538_s7 = inlined_call_operand.vmem [shape: bf16[64,128], index: 7, kind: input, shape index: {}]   ;;  %s11539_s8 = inlined_call_operand.vmem [shape: f32[1,128], index: 8, kind: input, shape index: {}]   ;;  %s11540_s9 = inlined_call_operand.vmem [shape: f32[128,128], index: 9, kind: input, shape index: {}]   ;;  %s11541_s10 = inlined_call_operand.vmem [shape: f32[1,128], index: 10, kind: input, shape index: {}]   ;;  %s11542_s11 = inlined_call_operand.vmem [shape: f32[2,1,128], index: 11, kind: output, shape index: {}]  }
   0x1 LB: > { %s8483_s18 = sadd.s32 4294967295, %s10052_s17   ;;  %p8487_p0 = scmp.ge.s32.totalorder %s10052_s17, 1  ;;  %s10052_s17 = sphi %s10120_s17, %s21_s17  }
   0x2   : > { %p337_p1 = scmp.lt.s32.totalorder %s10052_s17, 3 }
   0x4   : > { %p338_p2 = pnand %p8487_p0, %p337_p1 }
   0x5   : > { %v9958_v0 = vld [vmem:[%s11532_s1] sm:$0xff] (!%p338_p2)   ;;  %p375_p3 = scmp.lt.s32.totalorder (!%p338_p2), %s8483_s18, 1  ;;  %v9959_v1 = vld [vmem:[%s11532_s1 + $0x8] sm:$0xff] (!%p338_p2)   ;;  %vm436_vm0 = vcmask (!%p338_p2), 130048   ;;  %vm554_vm1 = vsmask.f32 (!%p338_p2), 3328 }
   0x6   : > { %341 = sbr.rel (%p338_p2) target bundleno = 1721 (0x6b9), region = 64  ;;  %9251 = vmatprep.subr.bf16.mxu0 (!%p338_p2), %v9958_v0  ;;  %9718 = vmatprep.subr.bf16.mxu1 (!%p338_p2), %v9958_v0  ;;  %vm555_vm2 = vsmask.f32 (!%p338_p2), 7440  ;;  %v10156_v27 = vld [vmem:[%s11532_s1 + $0x10] sm:$0xff] (!%p338_p2)   ;;  %vm10055_vm4 = vmmov (!%p338_p2), 0   ;;  %v9975_v47 = vld [vmem:[%s11534_s3 + $0x8] sm:$0xff] (!%p338_p2)  }
   0x7   : > { %9252 = vmatpush3.bf16.msra.mxu0 (!%p338_p2), %v9958_v0  ;;  %9719 = vmatpush3.bf16.msra.mxu1 (!%p338_p2), %v9958_v0  ;;  %vm10166_vm3 = vmor (!%p338_p2), %vm554_vm1, %vm555_vm2  ;;  %vm3671_vm5 = vcmask (!%p338_p2), 253952   ;;  %vm3870_vm6 = vcmask (!%p338_p2), 1041409   ;;  %vm3873_vm7 = vcmask (!%p338_p2), 1042434   ;;  %vm3876_vm8 = vcmask (!%p338_p2), 1043459  }
   0x8   : > { %9261 = vmatprep.subr.bf16.mxu0 (!%p338_p2), %v9959_v1  ;;  %vm3879_vm9 = vcmask (!%p338_p2), 1044484   ;;  %vm3882_vm10 = vcmask (!%p338_p2), 1045509   ;;  %vm3885_vm11 = vcmask (!%p338_p2), 1046534   ;;  %vm3888_vm12 = vcmask (!%p338_p2), 1047559  }
   0x9   : > { %vm3903_vm13 = vcmask (!%p338_p2), 261120   ;;  %vm7500_vm14 = vcmask (!%p338_p2), 517120   ;;  %vm7501_vm15 = vsmask.f32 (!%p338_p2), 1280  ;;  %vm7547_vm1 = vcmask (!%p338_p2), 523264  }
   0xd   : > { %s11546_s18 = smov (!%p375_p3, %s8483_s18), 1 }
   0xe   : > { %s9943_s23 = smul.u32 144, %s11546_s18  ;;  %s382_s22 = scalar_lea.vmem %s11542_s11, %s11546_s18 }
  0x10   : > { %s10140_s26 = scalar_lea.vmem %s11531_s0, %s9943_s23 }
  0x11   : > { %v392_v2 = vld [vmem:[%s10140_s26] sm:$0x3]  ;;  %v393_v3 = vld [vmem:[%s10140_s26 + $0x10] sm:$0x3]  ;;  %v523_v10 = vld [vmem:[%s10140_s26 + $0x2] sm:$0x1] }
  0x12   : > { %v394_v4 = vld [vmem:[%s10140_s26 + $0x20] sm:$0x3]  ;;  %v400_v5 = vunpack.c.l.u8.bf16 %v392_v2  ;;  %v401_v6 = vunpack.c.l.u8.bf16 %v393_v3  ;;  %v395_v7 = vld [vmem:[%s10140_s26 + $0x30] sm:$0x3]  ;;  %v525_v13 = vld [vmem:[%s10140_s26 + $0x12] sm:$0x1]  ;;  %v539_v15 = vunpack.c.l.u8.bf16 %v523_v10 }
  0x13   : > { %v402_v8 = vunpack.c.l.u8.bf16 %v394_v4  ;;  %v522_v9 = vld [vmem:[%s10140_s26] sm:$0x3]  ;;  %v403_v11 = vunpack.c.l.u8.bf16 %v395_v7  ;;  %v524_v12 = vld [vmem:[%s10140_s26 + $0x10] sm:$0x3]  ;;  %v541_v19 = vunpack.c.l.u8.bf16 %v525_v13  ;;  %v527_v20 = vld [vmem:[%s10140_s26 + $0x22] sm:$0x1] }
  0x14   : > { %v538_v14 = vunpack.c.l.u8.bf16 %v522_v9  ;;  %v526_v16 = vld [vmem:[%s10140_s26 + $0x20] sm:$0x3]  ;;  %v8490_v17 = vcombine.low %v400_v5, %v401_v6  ;;  %v540_v18 = vunpack.c.l.u8.bf16 %v524_v12  ;;  %v528_v21 = vld [vmem:[%s10140_s26 + $0x30] sm:$0x3]  ;;  %v567_v26 = vshll.u32 %v539_v15, 16 }
  0x15   : > { %v542_v22 = vunpack.c.l.u8.bf16 %v526_v16  ;;  %v8491_v23 = vcombine.low %v402_v8, %v403_v11  ;;  %v529_v28 = vld [vmem:[%s10140_s26 + $0x32] sm:$0x1]  ;;  %v581_v31 = vshll.u32 %v541_v19, 16  ;;  %v543_v32 = vunpack.c.l.u8.bf16 %v527_v20  ;;  %v530_v41 = vld [vmem:[%s10140_s26 + $0x40] sm:$0x3] }
  0x16   : > { %v558_v24 = vshrl.u32 %v538_v14, 16  ;;  %v561_v25 = vshll.u32 %v538_v14, 16  ;;  %9253 = vmatprep.mubr.msk.bf16.mxu0 %vm436_vm0, %v8490_v17  ;;  %v572_v29 = vshrl.u32 %v540_v18, 16  ;;  %v575_v30 = vshll.u32 %v540_v18, 16  ;;  %v531_v46 = vld [vmem:[%s10140_s26 + $0x42] sm:$0x1] }
  0x17   : > { %9254 = vmatmul.mubr.msk.bf16.vlgmr.msra.gmra.mrb[0].mxu0 %vm436_vm0, %v8491_v23  ;;  %v569_v35 = vrot.slane %v567_v26, 5  ;;  %v544_v36 = vunpack.c.l.u8.bf16 %v528_v21  ;;  %v583_v39 = vrot.slane %v581_v31, 5  ;;  %v545_v40 = vunpack.c.l.u8.bf16 %v529_v28  ;;  %v532_v52 = vld [vmem:[%s10140_s26 + $0x50] sm:$0x3]  ;;  %v533_v57 = vld [vmem:[%s10140_s26 + $0x52] sm:$0x1] }
  0x18   : > { %v560_v33 = vrot.slane %v558_v24, 4  ;;  %v563_v34 = vrot.slane %v561_v25, 5  ;;  %9262 = vmatpush3.bf16.msra.mxu0 %v9959_v1  ;;  %v574_v37 = vrot.slane %v572_v29, 4  ;;  %v577_v38 = vrot.slane %v575_v30, 5  ;;  %v534_v6 = vld [vmem:[%s10140_s26 + $0x60] sm:$0x3] }
  0x19   : > { %9271 = vmatprep.subr.bf16.mxu0 %v10156_v27  ;;  %v586_v43 = vshrl.u32 %v542_v22, 16  ;;  %v589_v44 = vshll.u32 %v542_v22, 16  ;;  %v595_v45 = vshll.u32 %v543_v32, 16  ;;  %v600_v49 = vshrl.u32 %v544_v36, 16  ;;  %v535_v11 = vld [vmem:[%s10140_s26 + $0x62] sm:$0x1] }
  0x1a   : > { %v564_v42 = vor.u32 %v563_v34, %v560_v33  ;;  %v578_v48 = vor.u32 %v577_v38, %v574_v37  ;;  %v603_v50 = vshll.u32 %v544_v36, 16  ;;  %v609_v51 = vshll.u32 %v545_v40, 16  ;;  %v536_v16 = vld [vmem:[%s10140_s26 + $0x70] sm:$0x3]  ;;  %v537_v21 = vld [vmem:[%s10140_s26 + $0x72] sm:$0x1] }
  0x1b   : > { %v588_v54 = vrot.slane %v586_v43, 4  ;;  %v591_v55 = vrot.slane %v589_v44, 5  ;;  %v597_v56 = vrot.slane %v595_v45, 5  ;;  %v602_v59 = vrot.slane %v600_v49, 4  ;;  %v10188_v31 = vld [vmem:[%s11532_s1 + $0x18] sm:$0xff]  }
  0x1c   : > { %v565_v53 = vrot.slane %v564_v42, 4  ;;  %v579_v58 = vrot.slane %v578_v48, 4  ;;  %v605_v60 = vrot.slane %v603_v50, 5  ;;  %v611_v61 = vrot.slane %v609_v51, 5  ;;  %v8509_v44 = vld [vmem:[%s10140_s26 + $0x14] sm:$0x3] }
  0x1d   : > { %v592_v63 = vor.u32 %v591_v55, %v588_v54  ;;  %v546_v0 = vunpack.c.l.u8.bf16 %v530_v41  ;;  %v547_v1 = vunpack.c.l.u8.bf16 %v531_v46  ;;  %v548_v4 = vunpack.c.l.u8.bf16 %v532_v52  ;;  %v8510_v50 = vld [vmem:[%s10140_s26 + $0x24] sm:$0x3]  ;;  %v8511_v54 = vld [vmem:[%s10140_s26 + $0x34] sm:$0x3] }
  0x1e   : > { %v570_v62 = vsel %vm10166_vm3, %v565_v53, %v569_v35  ;;  %v584_v2 = vsel %vm10166_vm3, %v579_v58, %v583_v39  ;;  %v606_v3 = vor.u32 %v605_v60, %v602_v59  ;;  %v549_v5 = vunpack.c.l.u8.bf16 %v533_v57  ;;  %v8508_v39 = vld [vmem:[%s10140_s26 + $0x4] sm:$0x3]  ;;  %v8513_v60 = vld [vmem:[%s10140_s26 + $0x54] sm:$0x3] }
  0x1f   : > { %v8499_v7 = vcombine.low %v570_v62, %v584_v2  ;;  %v593_v8 = vrot.slane %v592_v63, 4  ;;  %v614_v9 = vshrl.u32 %v546_v0, 16  ;;  %v617_v10 = vshll.u32 %v546_v0, 16  ;;  %v8512_v55 = vld [vmem:[%s10140_s26 + $0x44] sm:$0x3] }
  0x20   : > { %v607_v12 = vrot.slane %v606_v3, 4  ;;  %v623_v13 = vshll.u32 %v547_v1, 16  ;;  %v628_v14 = vshrl.u32 %v548_v4, 16  ;;  %v631_v15 = vshll.u32 %v548_v4, 16  ;;  %v8526_v0 = vld [vmem:[%s10140_s26 + $0x6] sm:$0x1] }
  0x21   : > { %9263 = vmatprep.mubr.msk.bf16.mxu0 %vm436_vm0, %v8499_v7  ;;  %v598_v17 = vsel %vm10166_vm3, %v593_v8, %v597_v56  ;;  %v616_v18 = vrot.slane %v614_v9, 4  ;;  %v619_v19 = vrot.slane %v617_v10, 5  ;;  %v637_v20 = vshll.u32 %v549_v5, 16  ;;  %v8527_v1 = vld [vmem:[%s10140_s26 + $0x14] sm:$0x3] }
  0x22   : > { %v612_v22 = vsel %vm10166_vm3, %v607_v12, %v611_v61  ;;  %v625_v23 = vrot.slane %v623_v13, 5  ;;  %v630_v24 = vrot.slane %v628_v14, 4  ;;  %v633_v25 = vrot.slane %v631_v15, 5  ;;  %v8525_v61 = vld [vmem:[%s10140_s26 + $0x4] sm:$0x3] }
  0x23   : > { %v8500_v26 = vcombine.low %v598_v17, %v612_v22  ;;  %v620_v28 = vor.u32 %v619_v19, %v616_v18  ;;  %v639_v29 = vrot.slane %v637_v20, 5  ;;  %v550_v30 = vunpack.c.l.u8.bf16 %v534_v6  ;;  %v8514_v5 = vld [vmem:[%s10140_s26 + $0x64] sm:$0x3]  ;;  %v8528_v6 = vld [vmem:[%s10140_s26 + $0x16] sm:$0x1] }
  0x24   : > { %v634_v32 = vor.u32 %v633_v25, %v630_v24  ;;  %v551_v33 = vunpack.c.l.u8.bf16 %v535_v11  ;;  %v552_v34 = vunpack.c.l.u8.bf16 %v536_v16  ;;  %v553_v35 = vunpack.c.l.u8.bf16 %v537_v21  ;;  %v8529_v15 = vld [vmem:[%s10140_s26 + $0x24] sm:$0x3]  ;;  %v8515_v17 = vld [vmem:[%s10140_s26 + $0x74] sm:$0x3]  ;;  %v8530_v25 = vld [vmem:[%s10140_s26 + $0x26] sm:$0x1] }
  0x25   : > { %9264 = vmatmul.mubr.msk.bf16.vlgmr.msra.gmra.mrb[0].mxu0 %vm436_vm0, %v8500_v26  ;;  %v621_v36 = vrot.slane %v620_v28, 4  ;;  %v642_v37 = vshrl.u32 %v550_v30, 16  ;;  %v645_v38 = vshll.u32 %v550_v30, 16  ;;  %v783_v53 = vunpack.c.l.u8.bf16 %v8508_v39  ;;  %v8531_v26 = vld [vmem:[%s10140_s26 + $0x34] sm:$0x3] }
  0x26   : > { %9272 = vmatpush3.bf16.msra.mxu0 %v10156_v27  ;;  %v635_v40 = vrot.slane %v634_v32, 4  ;;  %v651_v41 = vshll.u32 %v551_v33, 16  ;;  %v656_v42 = vshrl.u32 %v552_v34, 16  ;;  %v659_v43 = vshll.u32 %v552_v34, 16  ;;  %v8532_v32 = vld [vmem:[%s10140_s26 + $0x36] sm:$0x1] }
  0x27   : > { %v626_v45 = vsel %vm10166_vm3, %v621_v36, %v625_v23  ;;  %v644_v46 = vrot.slane %v642_v37, 4  ;;  %v647_v48 = vrot.slane %v645_v38, 5  ;;  %v665_v49 = vshll.u32 %v553_v35, 16  ;;  %9281 = vmatprep.subr.bf16.mxu0 %v10188_v31 }
  0x28   : > { %v640_v27 = vsel %vm10166_vm3, %v635_v40, %v639_v29  ;;  %v658_v51 = vrot.slane %v656_v42, 4  ;;  %v661_v52 = vrot.slane %v659_v43, 5  ;;  %v653_v58 = vrot.slane %v651_v41, 5 }
  0x29   : > { %v8501_v56 = vcombine.low %v626_v45, %v640_v27  ;;  %v648_v57 = vor.u32 %v647_v48, %v644_v46  ;;  %v784_v59 = vunpack.c.l.u8.bf16 %v8509_v44  ;;  %v667_v63 = vrot.slane %v665_v49, 5  ;;  %v8533_v46 = vld [vmem:[%s10140_s26 + $0x44] sm:$0x3]  ;;  %v8534_v48 = vld [vmem:[%s10140_s26 + $0x46] sm:$0x1] }
  0x2a   : > { %v662_v62 = vor.u32 %v661_v52, %v658_v51  ;;  %v785_v3 = vunpack.c.l.u8.bf16 %v8510_v50  ;;  %v786_v4 = vunpack.c.l.u8.bf16 %v8511_v54  ;;  %v787_v9 = vunpack.c.l.u8.bf16 %v8512_v55  ;;  %v8535_v52 = vld [vmem:[%s10140_s26 + $0x54] sm:$0x3] }
  0x2b   : > { %9267 = vmatprep.mubr.msk.bf16.mxu0 %vm436_vm0, %v8501_v56  ;;  %v649_v2 = vrot.slane %v648_v57, 4  ;;  %v8516_v8 = vcombine.low %v783_v53, %v784_v59  ;;  %v920_v10 = vunpack.c.l.u8.bf16 %v8525_v61  ;;  %v788_v12 = vunpack.c.l.u8.bf16 %v8513_v60  ;;  %v8536_v57 = vld [vmem:[%s10140_s26 + $0x56] sm:$0x1] }
  0x2c   : > { %v663_v7 = vrot.slane %v662_v62, 4  ;;  %v921_v13 = vunpack.c.l.u8.bf16 %v8526_v0  ;;  %v922_v14 = vunpack.c.l.u8.bf16 %v8527_v1  ;;  %v789_v18 = vunpack.c.l.u8.bf16 %v8514_v5 }
  0x2d   : > { %v654_v11 = vsel %vm10166_vm3, %v649_v2, %v653_v58  ;;  %v923_v19 = vunpack.c.l.u8.bf16 %v8528_v6  ;;  %v937_v20 = vshrl.u32 %v920_v10, 16  ;;  %v8517_v22 = vcombine.low %v785_v3, %v786_v4 }
  0x2e   : > { %v668_v16 = vsel %vm10166_vm3, %v663_v7, %v667_v63  ;;  %v940_v23 = vshll.u32 %v920_v10, 16  ;;  %v951_v24 = vshrl.u32 %v922_v14, 16  ;;  %v946_v29 = vshll.u32 %v921_v13, 16  ;;  %v10227_v63 = vld [vmem:[%s11532_s1 + $0x20] sm:$0xff]  }
  0x2f   : > { %v8502_v21 = vcombine.low %v654_v11, %v668_v16  ;;  %v939_v28 = vrot.slane %v937_v20, 4  ;;  %v954_v30 = vshll.u32 %v922_v14, 16  ;;  %v924_v33 = vunpack.c.l.u8.bf16 %v8529_v15  ;;  %v8537_v11 = vld [vmem:[%s10140_s26 + $0x64] sm:$0x3] }
  0x30   : > { %v790_v34 = vunpack.c.l.u8.bf16 %v8515_v17  ;;  %v942_v35 = vrot.slane %v940_v23, 5  ;;  %v953_v36 = vrot.slane %v951_v24, 4  ;;  %v960_v37 = vshll.u32 %v923_v19, 16  ;;  %v8539_v17 = vld [vmem:[%s10140_s26 + $0x74] sm:$0x3] }
  0x31   : > { %9268 = vmatmul.mubr.msk.bf16.gmra.mrb[4].mxu0 %vm436_vm0, %v8502_v21  ;;  %v8518_v38 = vcombine.low %v787_v9, %v788_v12  ;;  %v956_v39 = vrot.slane %v954_v30, 5  ;;  %v925_v40 = vunpack.c.l.u8.bf16 %v8530_v25  ;;  %v926_v41 = vunpack.c.l.u8.bf16 %v8531_v26  ;;  %v8538_v12 = vld [vmem:[%s10140_s26 + $0x66] sm:$0x1] }
  0x32   : > { %9273 = vmatprep.mubr.msk.bf16.mxu0 %vm436_vm0, %v8516_v8  ;;  %v943_v42 = vor.u32 %v942_v35, %v939_v28  ;;  %v927_v43 = vunpack.c.l.u8.bf16 %v8532_v32  ;;  %v965_v44 = vshrl.u32 %v924_v33, 16  ;;  %v968_v45 = vshll.u32 %v924_v33, 16 }
  0x33   : > { %v948_v49 = vrot.slane %v946_v29, 5  ;;  %v957_v50 = vor.u32 %v956_v39, %v953_v36  ;;  %v979_v27 = vshrl.u32 %v926_v41, 16  ;;  %v982_v51 = vshll.u32 %v926_v41, 16 }
  0x34   : > { %v944_v53 = vrot.slane %v943_v42, 4  ;;  %v962_v54 = vrot.slane %v960_v37, 5  ;;  %v967_v55 = vrot.slane %v965_v44, 4  ;;  %v970_v56 = vrot.slane %v968_v45, 5 }
  0x35   : > { %v958_v58 = vrot.slane %v957_v50, 4  ;;  %v974_v59 = vshll.u32 %v925_v40, 16  ;;  %v981_v60 = vrot.slane %v979_v27, 4  ;;  %v984_v61 = vrot.slane %v982_v51, 5 }
  0x36   : > { %v8519_v62 = vcombine.low %v789_v18, %v790_v34  ;;  %v988_v0 = vshll.u32 %v927_v43, 16  ;;  %v928_v1 = vunpack.c.l.u8.bf16 %v8533_v46  ;;  %v929_v2 = vunpack.c.l.u8.bf16 %v8534_v48 }
  0x37   : > { %v949_v3 = vsel %vm10166_vm3, %v944_v53, %v948_v49  ;;  %v971_v4 = vor.u32 %v970_v56, %v967_v55  ;;  %v930_v5 = vunpack.c.l.u8.bf16 %v8535_v52  ;;  %v931_v6 = vunpack.c.l.u8.bf16 %v8536_v57  ;;  %v8569_v55 = vld [vmem:[%s10140_s26 + $0x18] sm:$0x3] }
  0x38   : > { %v963_v7 = vsel %vm10166_vm3, %v958_v58, %v962_v54  ;;  %v985_v8 = vor.u32 %v984_v61, %v981_v60  ;;  %v993_v9 = vshrl.u32 %v928_v1, 16  ;;  %v996_v10 = vshll.u32 %v928_v1, 16  ;;  %v8567_v54 = vld [vmem:[%s10140_s26 + $0x8] sm:$0x3] }
  0x39   : > { %9274 = vmatmul.mubr.msk.bf16.vlgmr.msra.gmra.mrb[0].mxu0 %vm436_vm0, %v8517_v22  ;;  %v976_v13 = vrot.slane %v974_v59, 5  ;;  %v1002_v14 = vshll.u32 %v929_v2, 16  ;;  %v1007_v15 = vshrl.u32 %v930_v5, 16  ;;  %v1010_v16 = vshll.u32 %v930_v5, 16  ;;  %v8540_v22 = vld [vmem:[%s10140_s26 + $0x76] sm:$0x1] }
  0x3a   : > { %9282 = vmatpush3.bf16.msra.mxu0 %v10188_v31  ;;  %9277 = vmatprep.mubr.msk.bf16.mxu0 %vm436_vm0, %v8518_v38  ;;  %v990_v18 = vrot.slane %v988_v0, 5  ;;  %v995_v19 = vrot.slane %v993_v9, 4  ;;  %v998_v20 = vrot.slane %v996_v10, 5  ;;  %v1016_v21 = vshll.u32 %v931_v6, 16  ;;  %v8550_v0 = vld [vmem:[%s10140_s26 + $0x8] sm:$0x3] }
  0x3b   : > { %9291 = vmatprep.subr.bf16.mxu0 %v10227_v63  ;;  %v8541_v23 = vcombine.low %v949_v3, %v963_v7  ;;  %v972_v24 = vrot.slane %v971_v4, 4  ;;  %v1009_v25 = vrot.slane %v1007_v15, 4  ;;  %v1012_v26 = vrot.slane %v1010_v16, 5  ;;  %v10257_v1 = vld [vmem:[%s11532_s1 + $0x28] sm:$0xff]   ;;  %v8551_v3 = vld [vmem:[%s10140_s26 + $0x18] sm:$0x3] }
  0x3c   : > { %v986_v28 = vrot.slane %v985_v8, 4  ;;  %v999_v31 = vor.u32 %v998_v20, %v995_v19  ;;  %v1004_v29 = vrot.slane %v1002_v14, 5  ;;  %v932_v30 = vunpack.c.l.u8.bf16 %v8537_v11  ;;  %v8552_v4 = vld [vmem:[%s10140_s26 + $0x28] sm:$0x3]  ;;  %v8553_v5 = vld [vmem:[%s10140_s26 + $0x38] sm:$0x3] }
  0x3d   : > { %v1013_v32 = vor.u32 %v1012_v26, %v1009_v25  ;;  %v933_v33 = vunpack.c.l.u8.bf16 %v8538_v12  ;;  %v934_v34 = vunpack.c.l.u8.bf16 %v8539_v17  ;;  %v935_v35 = vunpack.c.l.u8.bf16 %v8540_v22  ;;  %v8568_v8 = vld [vmem:[%s10140_s26 + $0xa] sm:$0x1]  ;;  %v8570_v9 = vld [vmem:[%s10140_s26 + $0x1a] sm:$0x1]  ;;  %v8571_v10 = vld [vmem:[%s10140_s26 + $0x28] sm:$0x3] }
  0x3e   : > { %v1000_v36 = vrot.slane %v999_v31, 4  ;;  %v1018_v37 = vrot.slane %v1016_v21, 5  ;;  %v1021_v38 = vshrl.u32 %v932_v30, 16  ;;  %v1024_v39 = vshll.u32 %v932_v30, 16  ;;  %v8573_v15 = vld [vmem:[%s10140_s26 + $0x38] sm:$0x3] }
  0x3f   : > { %v1014_v40 = vrot.slane %v1013_v32, 4  ;;  %v1030_v41 = vshll.u32 %v933_v33, 16  ;;  %v1035_v42 = vshrl.u32 %v934_v34, 16  ;;  %v1038_v43 = vshll.u32 %v934_v34, 16  ;;  %v8554_v21 = vld [vmem:[%s10140_s26 + $0x48] sm:$0x3] }
  0x40   : > { %v1023_v44 = vrot.slane %v1021_v38, 4  ;;  %v1026_v45 = vrot.slane %v1024_v39, 5  ;;  %v1044_v46 = vshll.u32 %v935_v35, 16  ;;  %v977_v48 = vsel %vm10166_vm3, %v972_v24, %v976_v13  ;;  %v8555_v22 = vld [vmem:[%s10140_s26 + $0x58] sm:$0x3] }
  0x41   : > { %9278 = vmatmul.mubr.msk.bf16.gmra.mrb[4].mxu0 %vm436_vm0, %v8519_v62  ;;  %v991_v49 = vsel %vm10166_vm3, %v986_v28, %v990_v18  ;;  %v1037_v50 = vrot.slane %v1035_v42, 4  ;;  %v1040_v27 = vrot.slane %v1038_v43, 5  ;;  %v1005_v51 = vsel %vm10166_vm3, %v1000_v36, %v1004_v29  ;;  %v10277_v25 = vld [vmem:[%s10140_s26 + $0x68] sm:$0x3]  ;;  %v10280_v26 = vld [vmem:[%s10140_s26 + $0x78] sm:$0x3] }
  0x42   : > { %9283 = vmatprep.mubr.msk.bf16.mxu0 %vm436_vm0, %v8541_v23  ;;  %v1019_v52 = vsel %vm10166_vm3, %v1014_v40, %v1018_v37  ;;  %v1027_v53 = vor.u32 %v1026_v45, %v1023_v44  ;;  %v1032_v56 = vrot.slane %v1030_v41, 5  ;;  %v8542_v58 = vcombine.low %v977_v48, %v991_v49  ;;  %v8572_v37 = vld [vmem:[%s10140_s26 + $0x2a] sm:$0x1]  ;;  %v8575_v38 = vld [vmem:[%s10140_s26 + $0x48] sm:$0x3] }
  0x43   : > { %v1041_v57 = vor.u32 %v1040_v27, %v1037_v50  ;;  %v1046_v60 = vrot.slane %v1044_v46, 5  ;;  %v8543_v61 = vcombine.low %v1005_v51, %v1019_v52  ;;  %v1299_v2 = vunpack.c.l.u8.bf16 %v8567_v54  ;;  %v8574_v41 = vld [vmem:[%s10140_s26 + $0x3a] sm:$0x1]  ;;  %v8577_v44 = vld [vmem:[%s10140_s26 + $0x58] sm:$0x3] }
  0x44   : > { %v1028_v59 = vrot.slane %v1027_v53, 4  ;;  %v1301_v6 = vunpack.c.l.u8.bf16 %v8569_v55  ;;  %v1162_v16 = vunpack.c.l.u8.bf16 %v8550_v0  ;;  %v1163_v17 = vunpack.c.l.u8.bf16 %v8551_v3  ;;  %v8579_v0 = vld [vmem:[%s10140_s26 + $0x68] sm:$0x3] }
  0x45   : > { %v1042_v62 = vrot.slane %v1041_v57, 4  ;;  %v1316_v12 = vshrl.u32 %v1299_v2, 16  ;;  %v1319_v13 = vshll.u32 %v1299_v2, 16  ;;  %v1164_v19 = vunpack.c.l.u8.bf16 %v8552_v4  ;;  %v8578_v57 = vld [vmem:[%s10140_s26 + $0x5a] sm:$0x1] }
  0x46   : > { %v1033_v7 = vsel %vm10166_vm3, %v1028_v59, %v1032_v56  ;;  %v1330_v14 = vshrl.u32 %v1301_v6, 16  ;;  %v1333_v18 = vshll.u32 %v1301_v6, 16  ;;  %v1165_v20 = vunpack.c.l.u8.bf16 %v8553_v5  ;;  %v8576_v56 = vld [vmem:[%s10140_s26 + $0x4a] sm:$0x1]  ;;  %v8581_v6 = vld [vmem:[%s10140_s26 + $0x78] sm:$0x3] }
  0x47   : > { %v1047_v11 = vsel %vm10166_vm3, %v1042_v62, %v1046_v60  ;;  %v1303_v23 = vunpack.c.l.u8.bf16 %v8571_v10  ;;  %v1302_v28 = vunpack.c.l.u8.bf16 %v8570_v9  ;;  %v1305_v31 = vunpack.c.l.u8.bf16 %v8573_v15  ;;  %v10297_v15 = vld [vmem:[%s11532_s1 + $0x30] sm:$0xff]  }
  0x48   : > { %v8544_v24 = vcombine.low %v1033_v7, %v1047_v11  ;;  %v1318_v29 = vrot.slane %v1316_v12, 4  ;;  %v1321_v30 = vrot.slane %v1319_v13, 5  ;;  %v1332_v32 = vrot.slane %v1330_v14, 4 }
  0x49   : > { %9284 = vmatmul.mubr.msk.bf16.vlgmr.msra.gmra.mrb[0].mxu0 %vm436_vm0, %v8542_v58  ;;  %v1335_v33 = vrot.slane %v1333_v18, 5  ;;  %v8558_v34 = vcombine.low %v1162_v16, %v1163_v17  ;;  %v1166_v35 = vunpack.c.l.u8.bf16 %v8554_v21  ;;  %v1167_v36 = vunpack.c.l.u8.bf16 %v8555_v22 }
  0x4a   : > { %9292 = vmatpush3.bf16.msra.mxu0 %v10227_v63  ;;  %9287 = vmatprep.mubr.msk.bf16.mxu0 %vm436_vm0, %v8543_v61  ;;  %v1300_v63 = vunpack.c.l.u8.bf16 %v8568_v8  ;;  %v8559_v39 = vcombine.low %v1164_v19, %v1165_v20  ;;  %v1168_v40 = vunpack.c.l.u8.bf16 %v10277_v25  ;;  %v1344_v42 = vshrl.u32 %v1303_v23, 16 }
  0x4b   : > { %9301 = vmatprep.subr.bf16.mxu0 %v10257_v1  ;;  %v1347_v43 = vshll.u32 %v1303_v23, 16  ;;  %v1169_v45 = vunpack.c.l.u8.bf16 %v10280_v26  ;;  %v1358_v48 = vshrl.u32 %v1305_v31, 16  ;;  %v1361_v49 = vshll.u32 %v1305_v31, 16  ;;  %v8580_v26 = vld [vmem:[%s10140_s26 + $0x6a] sm:$0x1] }
  0x4c   : > { %v1325_v46 = vshll.u32 %v1300_v63, 16  ;;  %v1322_v50 = vor.u32 %v1321_v30, %v1318_v29  ;;  %v1336_v27 = vor.u32 %v1335_v33, %v1332_v32  ;;  %v1339_v51 = vshll.u32 %v1302_v28, 16  ;;  %v8582_v30 = vld [vmem:[%s10140_s26 + $0x7a] sm:$0x1] }
  0x4d   : > { %v1307_v52 = vunpack.c.l.u8.bf16 %v8575_v38  ;;  %v8560_v53 = vcombine.low %v1166_v35, %v1167_v36  ;;  %v1304_v54 = vunpack.c.l.u8.bf16 %v8572_v37  ;;  %v1306_v55 = vunpack.c.l.u8.bf16 %v8574_v41 }
  0x4e   : > { %v1309_v58 = vunpack.c.l.u8.bf16 %v8577_v44  ;;  %v1346_v59 = vrot.slane %v1344_v42, 4  ;;  %v1349_v60 = vrot.slane %v1347_v43, 5  ;;  %v1360_v2 = vrot.slane %v1358_v48, 4 }
  0x4f   : > { %v1372_v61 = vshrl.u32 %v1307_v52, 16  ;;  %v1375_v62 = vshll.u32 %v1307_v52, 16  ;;  %v1363_v3 = vrot.slane %v1361_v49, 5  ;;  %v1323_v7 = vrot.slane %v1322_v50, 4  ;;  %v8611_v52 = vld [vmem:[%s10140_s26 + $0x1c] sm:$0x3] }
  0x50   : > { %v1386_v4 = vshrl.u32 %v1309_v58, 16  ;;  %v1389_v5 = vshll.u32 %v1309_v58, 16  ;;  %v1327_v8 = vrot.slane %v1325_v46, 5  ;;  %v1337_v9 = vrot.slane %v1336_v27, 4 }
  0x51   : > { %9288 = vmatmul.mubr.msk.bf16.gmra.mrb[4].mxu0 %vm436_vm0, %v8544_v24  ;;  %v1341_v10 = vrot.slane %v1339_v51, 5  ;;  %v1353_v11 = vshll.u32 %v1304_v54, 16  ;;  %v1308_v12 = vunpack.c.l.u8.bf16 %v8576_v56  ;;  %v1310_v13 = vunpack.c.l.u8.bf16 %v8578_v57 }
  0x52   : > { %9293 = vmatprep.mubr.msk.bf16.mxu0 %vm436_vm0, %v8558_v34  ;;  %v1374_v14 = vrot.slane %v1372_v61, 4  ;;  %v1377_v16 = vrot.slane %v1375_v62, 5  ;;  %v1388_v17 = vrot.slane %v1386_v4, 4  ;;  %v1391_v18 = vrot.slane %v1389_v5, 5 }
  0x53   : > { %v1311_v19 = vunpack.c.l.u8.bf16 %v8579_v0  ;;  %v1350_v20 = vor.u32 %v1349_v60, %v1346_v59  ;;  %v1364_v21 = vor.u32 %v1363_v3, %v1360_v2  ;;  %v1367_v22 = vshll.u32 %v1306_v55, 16  ;;  %v8592_v0 = vld [vmem:[%s10140_s26 + $0xc] sm:$0x3]  ;;  %v8593_v2 = vld [vmem:[%s10140_s26 + $0x1c] sm:$0x3] }
  0x54   : > { %v1313_v23 = vunpack.c.l.u8.bf16 %v8581_v6  ;;  %v1328_v24 = vsel %vm10166_vm3, %v1323_v7, %v1327_v8  ;;  %v1342_v25 = vsel %vm10166_vm3, %v1337_v9, %v1341_v10  ;;  %v1381_v31 = vshll.u32 %v1308_v12, 16  ;;  %v8610_v7 = vld [vmem:[%s10140_s26 + $0xe] sm:$0x1]  ;;  %v8612_v12 = vld [vmem:[%s10140_s26 + $0x1e] sm:$0x1] }
  0x55   : > { %v1400_v63 = vshrl.u32 %v1311_v19, 16  ;;  %v1403_v28 = vshll.u32 %v1311_v19, 16  ;;  %v1395_v29 = vshll.u32 %v1310_v13, 16  ;;  %v8561_v34 = vcombine.low %v1168_v40, %v1169_v45  ;;  %v8609_v40 = vld [vmem:[%s10140_s26 + $0xc] sm:$0x3] }
  0x56   : > { %v1414_v32 = vshrl.u32 %v1313_v23, 16  ;;  %v1417_v33 = vshll.u32 %v1313_v23, 16  ;;  %v1355_v35 = vrot.slane %v1353_v11, 5  ;;  %v1378_v36 = vor.u32 %v1377_v16, %v1374_v14  ;;  %v10327_v11 = vld [vmem:[%s11532_s1 + $0x38] sm:$0xff]   ;;  %v8613_v19 = vld [vmem:[%s10140_s26 + $0x2c] sm:$0x3] }
  0x57   : > { %v1392_v37 = vor.u32 %v1391_v18, %v1388_v17  ;;  %v8583_v38 = vcombine.low %v1328_v24, %v1342_v25  ;;  %v1365_v41 = vrot.slane %v1364_v21, 4  ;;  %v1369_v42 = vrot.slane %v1367_v22, 5  ;;  %v8594_v17 = vld [vmem:[%s10140_s26 + $0x2c] sm:$0x3]  ;;  %v8595_v22 = vld [vmem:[%s10140_s26 + $0x3c] sm:$0x3] }
  0x58   : > { %v1314_v43 = vunpack.c.l.u8.bf16 %v8582_v30  ;;  %v1402_v44 = vrot.slane %v1400_v63, 4  ;;  %v1405_v46 = vrot.slane %v1403_v28, 5  ;;  %v1383_v48 = vrot.slane %v1381_v31, 5  ;;  %v10335_v23 = vld [vmem:[%s10140_s26 + $0x4c] sm:$0x3] }
  0x59   : > { %9294 = vmatmul.mubr.msk.bf16.vlgmr.msra.gmra.mrb[0].mxu0 %vm436_vm0, %v8559_v39  ;;  %v1351_v39 = vrot.slane %v1350_v20, 4  ;;  %v1397_v49 = vrot.slane %v1395_v29, 5  ;;  %v1416_v50 = vrot.slane %v1414_v32, 4  ;;  %v1419_v27 = vrot.slane %v1417_v33, 5  ;;  %v8615_v24 = vld [vmem:[%s10140_s26 + $0x3c] sm:$0x3] }
  0x5a   : > { %9302 = vmatpush3.bf16.msra.mxu0 %v10257_v1  ;;  %9297 = vmatprep.mubr.msk.bf16.mxu0 %vm436_vm0, %v8560_v53  ;;  %v1312_v1 = vunpack.c.l.u8.bf16 %v8580_v26  ;;  %v1379_v45 = vrot.slane %v1378_v36, 4  ;;  %v1393_v51 = vrot.slane %v1392_v37, 4  ;;  %v1406_v53 = vor.u32 %v1405_v46, %v1402_v44  ;;  %v8597_v63 = vld [vmem:[%s10140_s26 + $0x5c] sm:$0x3]  ;;  %v8617_v29 = vld [vmem:[%s10140_s26 + $0x4c] sm:$0x3] }
  0x5b   : > { %9311 = vmatprep.subr.bf16.mxu0 %v10297_v15  ;;  %v1423_v55 = vshll.u32 %v1314_v43, 16  ;;  %v1356_v56 = vsel %vm10166_vm3, %v1351_v39, %v1355_v35  ;;  %v1370_v57 = vsel %vm10166_vm3, %v1365_v41, %v1369_v42  ;;  %v1420_v58 = vor.u32 %v1419_v27, %v1416_v50  ;;  %v10350_v42 = vld [vmem:[%s10140_s26 + $0x6c] sm:$0x3] }
  0x5c   : > { %v1409_v54 = vshll.u32 %v1312_v1, 16  ;;  %v1678_v59 = vunpack.c.l.u8.bf16 %v8609_v40  ;;  %v1384_v60 = vsel %vm10166_vm3, %v1379_v45, %v1383_v48  ;;  %v1398_v61 = vsel %vm10166_vm3, %v1393_v51, %v1397_v49  ;;  %v8614_v48 = vld [vmem:[%s10140_s26 + $0x2e] sm:$0x1]  ;;  %v8616_v40 = vld [vmem:[%s10140_s26 + $0x3e] sm:$0x1] }
  0x5d   : > { %v1680_v62 = vunpack.c.l.u8.bf16 %v8611_v52  ;;  %v8584_v3 = vcombine.low %v1356_v56, %v1370_v57  ;;  %v1407_v4 = vrot.slane %v1406_v53, 4  ;;  %v1425_v6 = vrot.slane %v1423_v55, 5  ;;  %v8618_v52 = vld [vmem:[%s10140_s26 + $0x4e] sm:$0x1]  ;;  %v8599_v53 = vld [vmem:[%s10140_s26 + $0x7c] sm:$0x3] }
  0x5e   : > { %v1411_v5 = vrot.slane %v1409_v54, 5  ;;  %v8585_v8 = vcombine.low %v1384_v60, %v1398_v61  ;;  %v1421_v9 = vrot.slane %v1420_v58, 4  ;;  %v1695_v10 = vshrl.u32 %v1678_v59, 16  ;;  %v8620_v58 = vld [vmem:[%s10140_s26 + $0x5e] sm:$0x1] }
  0x5f   : > { %v1698_v13 = vshll.u32 %v1678_v59, 16  ;;  %v1709_v14 = vshrl.u32 %v1680_v62, 16  ;;  %v1712_v16 = vshll.u32 %v1680_v62, 16  ;;  %v1679_v18 = vunpack.c.l.u8.bf16 %v8610_v7 }
  0x60   : > { %v1541_v20 = vunpack.c.l.u8.bf16 %v8592_v0  ;;  %v1542_v21 = vunpack.c.l.u8.bf16 %v8593_v2  ;;  %v1412_v25 = vsel %vm10166_vm3, %v1407_v4, %v1411_v5  ;;  %v1426_v26 = vsel %vm10166_vm3, %v1421_v9, %v1425_v6  ;;  %v8621_v5 = vld [vmem:[%s10140_s26 + $0x6c] sm:$0x3] }
  0x61   : > { %9298 = vmatmul.mubr.msk.bf16.gmra.mrb[4].mxu0 %vm436_vm0, %v8561_v34  ;;  %v1681_v28 = vunpack.c.l.u8.bf16 %v8612_v12  ;;  %v1697_v31 = vrot.slane %v1695_v10, 4  ;;  %v1700_v30 = vrot.slane %v1698_v13, 5  ;;  %v1711_v32 = vrot.slane %v1709_v14, 4  ;;  %v8619_v34 = vld [vmem:[%s10140_s26 + $0x5c] sm:$0x3] }
  0x62   : > { %9303 = vmatprep.mubr.msk.bf16.mxu0 %vm436_vm0, %v8583_v38  ;;  %v1714_v33 = vrot.slane %v1712_v16, 5  ;;  %v1543_v35 = vunpack.c.l.u8.bf16 %v8594_v17  ;;  %v1704_v36 = vshll.u32 %v1679_v18, 16  ;;  %v1684_v37 = vunpack.c.l.u8.bf16 %v8615_v24  ;;  %v8623_v10 = vld [vmem:[%s10140_s26 + $0x7c] sm:$0x3] }
  0x63   : > { %v8586_v38 = vcombine.low %v1412_v25, %v1426_v26  ;;  %v1544_v39 = vunpack.c.l.u8.bf16 %v8595_v22  ;;  %v1545_v41 = vunpack.c.l.u8.bf16 %v10335_v23  ;;  %v1686_v1 = vunpack.c.l.u8.bf16 %v8617_v29  ;;  %v10367_v26 = vld [vmem:[%s11532_s1 + $0x40] sm:$0xff]  }
  0x64   : > { %v8600_v43 = vcombine.low %v1541_v20, %v1542_v21  ;;  %v1546_v44 = vunpack.c.l.u8.bf16 %v8597_v63  ;;  %v1718_v46 = vshll.u32 %v1681_v28, 16  ;;  %v1688_v49 = vunpack.c.l.u8.bf16 %v8619_v34 }
  0x65   : > { %v1701_v50 = vor.u32 %v1700_v30, %v1697_v31  ;;  %v1715_v27 = vor.u32 %v1714_v33, %v1711_v32  ;;  %v1547_v54 = vunpack.c.l.u8.bf16 %v10350_v42  ;;  %v1706_v55 = vrot.slane %v1704_v36, 5 }
  0x66   : > { %v1737_v56 = vshrl.u32 %v1684_v37, 16  ;;  %v1740_v57 = vshll.u32 %v1684_v37, 16  ;;  %v8601_v59 = vcombine.low %v1543_v35, %v1544_v39  ;;  %v1683_v60 = vunpack.c.l.u8.bf16 %v8614_v48  ;;  %v8622_v37 = vld [vmem:[%s10140_s26 + $0x6e] sm:$0x1] }
  0x67   : > { %v1751_v61 = vshrl.u32 %v1686_v1, 16  ;;  %v1754_v62 = vshll.u32 %v1686_v1, 16  ;;  %v1720_v0 = vrot.slane %v1718_v46, 5  ;;  %v1685_v2 = vunpack.c.l.u8.bf16 %v8616_v40 }
  0x68   : > { %v1768_v4 = vshll.u32 %v1688_v49, 16  ;;  %v1702_v6 = vrot.slane %v1701_v50, 4  ;;  %v1716_v7 = vrot.slane %v1715_v27, 4  ;;  %v1739_v12 = vrot.slane %v1737_v56, 4 }
  0x69   : > { %9304 = vmatmul.mubr.msk.bf16.vlgmr.msra.gmra.mrb[0].mxu0 %vm436_vm0, %v8584_v3  ;;  %v1765_v3 = vshrl.u32 %v1688_v49, 16  ;;  %v1742_v13 = vrot.slane %v1740_v57, 5  ;;  %v1687_v14 = vunpack.c.l.u8.bf16 %v8618_v52  ;;  %v1689_v16 = vunpack.c.l.u8.bf16 %v8620_v58  ;;  %v8653_v57 = vld [vmem:[%s10140_s26 + $0x20] sm:$0x3] }
  0x6a   : > { %9312 = vmatpush3.bf16.msra.mxu0 %v10297_v15  ;;  %9307 = vmatprep.mubr.msk.bf16.mxu0 %vm436_vm0, %v8585_v8  ;;  %v1682_v15 = vunpack.c.l.u8.bf16 %v8613_v19  ;;  %v1548_v17 = vunpack.c.l.u8.bf16 %v8599_v53  ;;  %v1753_v18 = vrot.slane %v1751_v61, 4  ;;  %v1756_v19 = vrot.slane %v1754_v62, 5 }
  0x6b   : > { %9321 = vmatprep.subr.bf16.mxu0 %v10327_v11  ;;  %v1690_v20 = vunpack.c.l.u8.bf16 %v8621_v5  ;;  %v8602_v21 = vcombine.low %v1545_v41, %v1546_v44  ;;  %v1767_v22 = vrot.slane %v1765_v3, 4  ;;  %v1770_v23 = vrot.slane %v1768_v4, 5  ;;  %v8624_v44 = vld [vmem:[%s10140_s26 + $0x7e] sm:$0x1]  ;;  %v8634_v5 = vld [vmem:[%s10140_s26 + $0x10] sm:$0x3] }
  0x6c   : > { %v1723_v45 = vshrl.u32 %v1682_v15, 16  ;;  %v1726_v51 = vshll.u32 %v1682_v15, 16  ;;  %v1692_v24 = vunpack.c.l.u8.bf16 %v8623_v10  ;;  %v1707_v25 = vsel %vm10166_vm3, %v1702_v6, %v1706_v55  ;;  %v8651_v55 = vld [vmem:[%s10140_s26 + $0x10] sm:$0x3]  ;;  %v8635_v10 = vld [vmem:[%s10140_s26 + $0x20] sm:$0x3] }
  0x6d   : > { %v1732_v28 = vshll.u32 %v1683_v60, 16  ;;  %v1746_v31 = vshll.u32 %v1685_v2, 16  ;;  %v1721_v29 = vsel %vm10166_vm3, %v1716_v7, %v1720_v0  ;;  %v1743_v30 = vor.u32 %v1742_v13, %v1739_v12  ;;  %v8652_v12 = vld [vmem:[%s10140_s26 + $0x12] sm:$0x1] }
  0x6e   : > { %v1725_v8 = vrot.slane %v1723_v45, 4  ;;  %v1728_v9 = vrot.slane %v1726_v51, 5  ;;  %v1760_v32 = vshll.u32 %v1687_v14, 16  ;;  %v1774_v33 = vshll.u32 %v1689_v16, 16  ;;  %v8654_v16 = vld [vmem:[%s10140_s26 + $0x22] sm:$0x1] }
  0x6f   : > { %v1757_v15 = vor.u32 %v1756_v19, %v1753_v18  ;;  %v1779_v34 = vshrl.u32 %v1690_v20, 16  ;;  %v1782_v35 = vshll.u32 %v1690_v20, 16  ;;  %v1771_v36 = vor.u32 %v1770_v23, %v1767_v22  ;;  %v10396_v19 = vld [vmem:[%s11532_s1 + $0x48] sm:$0xff]   ;;  %v8655_v22 = vld [vmem:[%s10140_s26 + $0x30] sm:$0x3] }
  0x70   : > { %v1729_v63 = vor.u32 %v1728_v9, %v1725_v8  ;;  %v1796_v39 = vshll.u32 %v1692_v24, 16  ;;  %v8603_v41 = vcombine.low %v1547_v54, %v1548_v17  ;;  %v8625_v42 = vcombine.low %v1707_v25, %v1721_v29 }
  0x71   : > { %9308 = vmatmul.mubr.msk.bf16.gmra.mrb[4].mxu0 %vm436_vm0, %v8586_v38  ;;  %v1793_v38 = vshrl.u32 %v1692_v24, 16  ;;  %v1734_v1 = vrot.slane %v1732_v28, 5  ;;  %v1744_v48 = vrot.slane %v1743_v30, 4  ;;  %v1762_v49 = vrot.slane %v1760_v32, 5  ;;  %v8657_v24 = vld [vmem:[%s10140_s26 + $0x40] sm:$0x3] }
  0x72   : > { %9313 = vmatprep.mubr.msk.bf16.mxu0 %vm436_vm0, %v8600_v43  ;;  %v1748_v43 = vrot.slane %v1746_v31, 5  ;;  %v1730_v46 = vrot.slane %v1729_v63, 4  ;;  %v1776_v50 = vrot.slane %v1774_v33, 5  ;;  %v1691_v27 = vunpack.c.l.u8.bf16 %v8622_v37  ;;  %v10404_v28 = vld [vmem:[%s10140_s26 + $0x30] sm:$0x3] }
  0x73   : > { %v1781_v40 = vrot.slane %v1779_v34, 4  ;;  %v1784_v45 = vrot.slane %v1782_v35, 5  ;;  %v1772_v51 = vrot.slane %v1771_v36, 4  ;;  %v1693_v52 = vunpack.c.l.u8.bf16 %v8624_v44  ;;  %v8659_v30 = vld [vmem:[%s10140_s26 + $0x50] sm:$0x3] }
  0x74   : > { %v1795_v53 = vrot.slane %v1793_v38, 4  ;;  %v1798_v54 = vrot.slane %v1796_v39, 5  ;;  %v1735_v56 = vsel %vm10166_vm3, %v1730_v46, %v1734_v1  ;;  %v1749_v58 = vsel %vm10166_vm3, %v1744_v48, %v1748_v43  ;;  %v8637_v33 = vld [vmem:[%s10140_s26 + $0x40] sm:$0x3]  ;;  %v8638_v43 = vld [vmem:[%s10140_s26 + $0x50] sm:$0x3] }
  0x75   : > { %v1785_v60 = vor.u32 %v1784_v45, %v1781_v40  ;;  %v1788_v61 = vshll.u32 %v1691_v27, 16  ;;  %v1777_v62 = vsel %vm10166_vm3, %v1772_v51, %v1776_v50  ;;  %v1802_v2 = vshll.u32 %v1693_v52, 16  ;;  %v8661_v39 = vld [vmem:[%s10140_s26 + $0x60] sm:$0x3]  ;;  %v8658_v27 = vld [vmem:[%s10140_s26 + $0x42] sm:$0x1] }
  0x76   : > { %v1799_v0 = vor.u32 %v1798_v54, %v1795_v53  ;;  %v2057_v3 = vunpack.c.l.u8.bf16 %v8651_v55  ;;  %v2059_v4 = vunpack.c.l.u8.bf16 %v8653_v57  ;;  %v8626_v6 = vcombine.low %v1735_v56, %v1749_v58  ;;  %v8639_v44 = vld [vmem:[%s10140_s26 + $0x60] sm:$0x3]  ;;  %v8640_v57 = vld [vmem:[%s10140_s26 + $0x70] sm:$0x3]  ;;  %v8660_v58 = vld [vmem:[%s10140_s26 + $0x52] sm:$0x1] }
  0x77   : > { %v1786_v8 = vrot.slane %v1785_v60, 4  ;;  %v1790_v9 = vrot.slane %v1788_v61, 5  ;;  %v1804_v14 = vrot.slane %v1802_v2, 5  ;;  %v1920_v23 = vunpack.c.l.u8.bf16 %v8634_v5  ;;  %v8641_v61 = vld [vmem:[%s10140_s26 + $0x80] sm:$0x3] }
  0x78   : > { %v1800_v13 = vrot.slane %v1799_v0, 4  ;;  %v2074_v17 = vshrl.u32 %v2057_v3, 16  ;;  %v2077_v18 = vshll.u32 %v2057_v3, 16  ;;  %v2088_v20 = vshrl.u32 %v2059_v4, 16  ;;  %v8663_v5 = vld [vmem:[%s10140_s26 + $0x70] sm:$0x3] }
  0x79   : > { %9314 = vmatmul.mubr.msk.bf16.vlgmr.msra.gmra.mrb[0].mxu0 %vm436_vm0, %v8601_v59  ;;  %v1791_v25 = vsel %vm10166_vm3, %v1786_v8, %v1790_v9  ;;  %v1921_v63 = vunpack.c.l.u8.bf16 %v8635_v10  ;;  %v2058_v31 = vunpack.c.l.u8.bf16 %v8652_v12  ;;  %v2060_v29 = vunpack.c.l.u8.bf16 %v8654_v16  ;;  %v8665_v10 = vld [vmem:[%s10140_s26 + $0x80] sm:$0x3] }
  0x7a   : > { %9322 = vmatpush3.bf16.msra.mxu0 %v10327_v11  ;;  %9317 = vmatprep.mubr.msk.bf16.mxu0 %vm436_vm0, %v8602_v21  ;;  %v1758_v11 = vrot.slane %v1757_v15, 4  ;;  %v2091_v21 = vshll.u32 %v2059_v4, 16  ;;  %v1805_v32 = vsel %vm10166_vm3, %v1800_v13, %v1804_v14  ;;  %v2076_v15 = vrot.slane %v2074_v17, 4  ;;  %v8662_v4 = vld [vmem:[%s10140_s26 + $0x62] sm:$0x1] }
  0x7b   : > { %9331 = vmatprep.subr.bf16.mxu0 %v10367_v26  ;;  %v2079_v34 = vrot.slane %v2077_v18, 5  ;;  %v2061_v35 = vunpack.c.l.u8.bf16 %v8655_v22  ;;  %v2090_v36 = vrot.slane %v2088_v20, 4  ;;  %v2063_v38 = vunpack.c.l.u8.bf16 %v8657_v24 }
  0x7c   : > { %v1763_v59 = vsel %vm10166_vm3, %v1758_v11, %v1762_v49  ;;  %v2093_v37 = vrot.slane %v2091_v21, 5  ;;  %v1923_v1 = vunpack.c.l.u8.bf16 %v8637_v33  ;;  %v2083_v46 = vshll.u32 %v2058_v31, 16  ;;  %v8656_v11 = vld [vmem:[%s10140_s26 + $0x32] sm:$0x1] }
  0x7d   : > { %v8627_v7 = vcombine.low %v1763_v59, %v1777_v62  ;;  %v2097_v48 = vshll.u32 %v2060_v29, 16  ;;  %v8642_v49 = vcombine.low %v1920_v23, %v1921_v63  ;;  %v2080_v50 = vor.u32 %v2079_v34, %v2076_v15  ;;  %v10430_v23 = vld [vmem:[%s11532_s1 + $0x50] sm:$0xff]  }
  0x7e   : > { %v2102_v40 = vshrl.u32 %v2061_v35, 16  ;;  %v2067_v45 = vunpack.c.l.u8.bf16 %v8661_v39  ;;  %v2094_v51 = vor.u32 %v2093_v37, %v2090_v36  ;;  %v2105_v52 = vshll.u32 %v2061_v35, 16  ;;  %v8664_v63 = vld [vmem:[%s10140_s26 + $0x72] sm:$0x1]  ;;  %v8666_v36 = vld [vmem:[%s10140_s26 + $0x82] sm:$0x1] }
  0x7f   : > { %v2116_v53 = vshrl.u32 %v2063_v38, 16  ;;  %v2119_v54 = vshll.u32 %v2063_v38, 16  ;;  %v1924_v55 = vunpack.c.l.u8.bf16 %v8638_v43  ;;  %v1925_v56 = vunpack.c.l.u8.bf16 %v8639_v44 }
  0x80   : > { %v2085_v62 = vrot.slane %v2083_v46, 5  ;;  %v2099_v0 = vrot.slane %v2097_v48, 5  ;;  %v2062_v2 = vunpack.c.l.u8.bf16 %v8656_v11  ;;  %v2064_v3 = vunpack.c.l.u8.bf16 %v8658_v27 }
  0x81   : > { %9318 = vmatmul.mubr.msk.bf16.gmra.mrb[4].mxu0 %vm436_vm0, %v8603_v41  ;;  %v2065_v41 = vunpack.c.l.u8.bf16 %v8659_v30  ;;  %v2144_v8 = vshrl.u32 %v2067_v45, 16  ;;  %v2147_v9 = vshll.u32 %v2067_v45, 16  ;;  %v2095_v12 = vrot.slane %v2094_v51, 4 }
  0x82   : > { %9323 = vmatprep.mubr.msk.bf16.mxu0 %vm436_vm0, %v8625_v42  ;;  %v8628_v42 = vcombine.low %v1791_v25, %v1805_v32  ;;  %v2107_v13 = vrot.slane %v2105_v52, 5  ;;  %v2118_v14 = vrot.slane %v2116_v53, 4  ;;  %v2121_v16 = vrot.slane %v2119_v54, 5  ;;  %v8693_v54 = vld [vmem:[%s10140_s26 + $0x14] sm:$0x3] }
  0x83   : > { %v2130_v59 = vshrl.u32 %v2065_v41, 16  ;;  %v2133_v60 = vshll.u32 %v2065_v41, 16  ;;  %v1926_v17 = vunpack.c.l.u8.bf16 %v8640_v57  ;;  %v2069_v21 = vunpack.c.l.u8.bf16 %v8663_v5  ;;  %v8695_v5 = vld [vmem:[%s10140_s26 + $0x24] sm:$0x3] }
  0x84   : > { %v2066_v24 = vunpack.c.l.u8.bf16 %v8660_v58  ;;  %v2068_v25 = vunpack.c.l.u8.bf16 %v8662_v4  ;;  %v8644_v31 = vcombine.low %v1924_v55, %v1925_v56  ;;  %v1927_v29 = vunpack.c.l.u8.bf16 %v8641_v61 }
  0x85   : > { %v2132_v18 = vrot.slane %v2130_v59, 4  ;;  %v2135_v20 = vrot.slane %v2133_v60, 5  ;;  %v2146_v30 = vrot.slane %v2144_v8, 4  ;;  %v2149_v32 = vrot.slane %v2147_v9, 5  ;;  %v8676_v8 = vld [vmem:[%s10140_s26 + $0x14] sm:$0x3] }
  0x86   : > { %v2111_v34 = vshll.u32 %v2062_v2, 16  ;;  %v2125_v35 = vshll.u32 %v2064_v3, 16  ;;  %v2100_v37 = vsel %vm10166_vm3, %v2095_v12, %v2099_v0  ;;  %v2122_v38 = vor.u32 %v2121_v16, %v2118_v14  ;;  %v8677_v9 = vld [vmem:[%s10140_s26 + $0x24] sm:$0x3]  ;;  %v8694_v12 = vld [vmem:[%s10140_s26 + $0x16] sm:$0x1] }
  0x87   : > { %v2158_v39 = vshrl.u32 %v2069_v21, 16  ;;  %v2139_v41 = vshll.u32 %v2066_v24, 16  ;;  %v2136_v44 = vor.u32 %v2135_v20, %v2132_v18  ;;  %v2150_v46 = vor.u32 %v2149_v32, %v2146_v30  ;;  %v8679_v18 = vld [vmem:[%s10140_s26 + $0x44] sm:$0x3]  ;;  %v8697_v32 = vld [vmem:[%s10140_s26 + $0x34] sm:$0x3] }
  0x88   : > { %v2070_v48 = vunpack.c.l.u8.bf16 %v8664_v63  ;;  %v2113_v27 = vrot.slane %v2111_v34, 5  ;;  %v2123_v51 = vrot.slane %v2122_v38, 4  ;;  %v2436_v2 = vunpack.c.l.u8.bf16 %v8693_v54  ;;  %v8680_v63 = vld [vmem:[%s10140_s26 + $0x54] sm:$0x3] }
  0x89   : > { %9324 = vmatmul.mubr.msk.bf16.vlgmr.msra.gmra.mrb[0].mxu0 %vm436_vm0, %v8626_v6  ;;  %v2081_v6 = vrot.slane %v2080_v50, 4  ;;  %v8645_v50 = vcombine.low %v1926_v17, %v1927_v29  ;;  %v2160_v52 = vrot.slane %v2158_v39, 4  ;;  %v2141_v55 = vrot.slane %v2139_v41, 5  ;;  %v10473_v39 = vld [vmem:[%s10140_s26 + $0x74] sm:$0x3] }
  0x8a   : > { %9332 = vmatpush3.bf16.msra.mxu0 %v10367_v26  ;;  %9327 = vmatprep.mubr.msk.bf16.mxu0 %vm436_vm0, %v8627_v7  ;;  %v1922_v26 = vunpack.c.l.u8.bf16 %v10404_v28  ;;  %v2104_v7 = vrot.slane %v2102_v40, 4  ;;  %v2071_v28 = vunpack.c.l.u8.bf16 %v8665_v10  ;;  %v2127_v40 = vrot.slane %v2125_v35, 5  ;;  %v8678_v10 = vld [vmem:[%s10140_s26 + $0x34] sm:$0x3]  ;;  %v8681_v35 = vld [vmem:[%s10140_s26 + $0x64] sm:$0x3] }
  0x8b   : > { %9341 = vmatprep.subr.bf16.mxu0 %v10396_v19  ;;  %v2086_v33 = vsel %vm10166_vm3, %v2081_v6, %v2085_v62  ;;  %v2137_v58 = vrot.slane %v2136_v44, 4  ;;  %v2151_v59 = vrot.slane %v2150_v46, 4  ;;  %v2167_v60 = vshll.u32 %v2070_v48, 16 }
  0x8c   : > { %v8643_v22 = vcombine.low %v1922_v26, %v1923_v1  ;;  %v2108_v15 = vor.u32 %v2107_v13, %v2104_v7  ;;  %v2161_v26 = vshll.u32 %v2069_v21, 16  ;;  %v2172_v1 = vshrl.u32 %v2071_v28, 16  ;;  %v8696_v13 = vld [vmem:[%s10140_s26 + $0x26] sm:$0x1] }
  0x8d   : > { %v2175_v43 = vshll.u32 %v2071_v28, 16  ;;  %v8667_v11 = vcombine.low %v2086_v33, %v2100_v37  ;;  %v2128_v4 = vsel %vm10166_vm3, %v2123_v51, %v2127_v40  ;;  %v2142_v6 = vsel %vm10166_vm3, %v2137_v58, %v2141_v55  ;;  %v8698_v40 = vld [vmem:[%s10140_s26 + $0x36] sm:$0x1] }
  0x8e   : > { %v2109_v45 = vrot.slane %v2108_v15, 4  ;;  %v2163_v53 = vrot.slane %v2161_v26, 5  ;;  %v2174_v56 = vrot.slane %v2172_v1, 4  ;;  %v2169_v16 = vrot.slane %v2167_v60, 5  ;;  %v8707_v60 = vld [vmem:[%s10140_s26 + $0x84] sm:$0x3] }
  0x8f   : > { %v2177_v57 = vrot.slane %v2175_v43, 5  ;;  %v2453_v24 = vshrl.u32 %v2436_v2, 16  ;;  %v2437_v28 = vunpack.c.l.u8.bf16 %v8694_v12  ;;  %v2439_v29 = vunpack.c.l.u8.bf16 %v8696_v13  ;;  %v10481_v43 = vld [vmem:[%s10140_s26 + $0x84] sm:$0x3] }
  0x90   : > { %v2164_v62 = vor.u32 %v2163_v53, %v2160_v52  ;;  %v2114_v3 = vsel %vm10166_vm3, %v2109_v45, %v2113_v27  ;;  %v2456_v30 = vshll.u32 %v2436_v2, 16  ;;  %v2299_v33 = vunpack.c.l.u8.bf16 %v8676_v8  ;;  %v8705_v45 = vld [vmem:[%s10140_s26 + $0x74] sm:$0x3] }
  0x91   : > { %9328 = vmatmul.mubr.msk.bf16.gmra.mrb[4].mxu0 %vm436_vm0, %v8628_v42  ;;  %v2153_v42 = vshll.u32 %v2068_v25, 16  ;;  %v2178_v0 = vor.u32 %v2177_v57, %v2174_v56  ;;  %v8668_v20 = vcombine.low %v2114_v3, %v2128_v4  ;;  %v2300_v15 = vunpack.c.l.u8.bf16 %v8677_v9  ;;  %v8700_v56 = vld [vmem:[%s10140_s26 + $0x46] sm:$0x1]  ;;  %v8702_v3 = vld [vmem:[%s10140_s26 + $0x56] sm:$0x1] }
  0x92   : > { %9333 = vmatprep.mubr.msk.bf16.mxu0 %vm436_vm0, %v8642_v49  ;;  %v2072_v49 = vunpack.c.l.u8.bf16 %v8666_v36  ;;  %v2165_v14 = vrot.slane %v2164_v62, 4  ;;  %v2301_v34 = vunpack.c.l.u8.bf16 %v8678_v10  ;;  %v8699_v36 = vld [vmem:[%s10140_s26 + $0x44] sm:$0x3]  ;;  %v2302_v38 = vunpack.c.l.u8.bf16 %v8679_v18  ;;  %v8704_v4 = vld [vmem:[%s10140_s26 + $0x66] sm:$0x1] }
  0x93   : > { %v2179_v21 = vrot.slane %v2178_v0, 4  ;;  %v2455_v44 = vrot.slane %v2453_v24, 4  ;;  %v10483_v46 = vshll.u32 %v2437_v28, 16  ;;  %v2440_v48 = vunpack.c.l.u8.bf16 %v8697_v32  ;;  %v10504_v32 = vld [vmem:[%s11532_s1 + $0x60] sm:$0xff]  }
  0x94   : > { %v2181_v61 = vshll.u32 %v2072_v49, 16  ;;  %v2170_v37 = vsel %vm10166_vm3, %v2165_v14, %v2169_v16  ;;  %v8703_v49 = vld [vmem:[%s10140_s26 + $0x64] sm:$0x3]  ;;  %v2458_v27 = vrot.slane %v2456_v30, 5  ;;  %v8684_v51 = vcombine.low %v2299_v33, %v2300_v15 }
  0x95   : > { %v2442_v55 = vunpack.c.l.u8.bf16 %v8699_v36  ;;  %v2481_v57 = vshrl.u32 %v2440_v48, 16  ;;  %v2306_v0 = vunpack.c.l.u8.bf16 %v10481_v43  ;;  %v2448_v8 = vunpack.c.l.u8.bf16 %v8705_v45 }
  0x96   : > { %v2183_v17 = vrot.slane %v2181_v61, 5  ;;  %v8685_v61 = vcombine.low %v2301_v34, %v2302_v38  ;;  %v2459_v2 = vor.u32 %v2458_v27, %v2455_v44  ;;  %v2484_v10 = vshll.u32 %v2440_v48, 16 }
  0x97   : > { %v2495_v12 = vshrl.u32 %v2442_v55, 16  ;;  %v2498_v13 = vshll.u32 %v2442_v55, 16  ;;  %v2450_v24 = vunpack.c.l.u8.bf16 %v8707_v60  ;;  %v2537_v28 = vshrl.u32 %v2448_v8, 16 }
  0x98   : > { %v2184_v1 = vsel %vm10166_vm3, %v2179_v21, %v2183_v17  ;;  %v2443_v21 = vunpack.c.l.u8.bf16 %v8700_v56  ;;  %v2486_v33 = vrot.slane %v2484_v10, 5  ;;  %v8735_v56 = vld [vmem:[%s10140_s26 + $0x18] sm:$0x3] }
  0x99   : > { %9334 = vmatmul.mubr.msk.bf16.vlgmr.msra.gmra.mrb[0].mxu0 %vm436_vm0, %v8643_v22  ;;  %v2438_v22 = vunpack.c.l.u8.bf16 %v8695_v5  ;;  %v8670_v52 = vcombine.low %v2170_v37, %v2184_v1  ;;  %v2464_v5 = vrot.slane %v10483_v46, 5  ;;  %v2497_v15 = vrot.slane %v2495_v12, 4 }
  0x9a   : > { %9342 = vmatpush3.bf16.msra.mxu0 %v10396_v19  ;;  %9337 = vmatprep.mubr.msk.bf16.mxu0 %vm436_vm0, %v8644_v31  ;;  %v2155_v19 = vrot.slane %v2153_v42, 5  ;;  %v10464_v31 = vld [vmem:[%s11532_s1 + $0x58] sm:$0xff]   ;;  %v8701_v42 = vld [vmem:[%s10140_s26 + $0x54] sm:$0x3]  ;;  %v2500_v34 = vrot.slane %v2498_v13, 5  ;;  %v2504_v1 = vshll.u32 %v2443_v21, 16  ;;  %v2815_v10 = vunpack.c.l.u8.bf16 %v8735_v56 }
  0x9b   : > { %9351 = vmatprep.subr.bf16.mxu0 %v10430_v23  ;;  %v2467_v26 = vshrl.u32 %v2438_v22, 16  ;;  %v2470_v41 = vshll.u32 %v2438_v22, 16  ;;  %v2444_v58 = vunpack.c.l.u8.bf16 %v8701_v42  ;;  %v2483_v22 = vrot.slane %v2481_v57, 4  ;;  %v8738_v21 = vld [vmem:[%s10140_s26 + $0x2a] sm:$0x1] }
  0x9c   : > { %v2156_v7 = vsel %vm10166_vm3, %v2151_v59, %v2155_v19  ;;  %v2305_v19 = vunpack.c.l.u8.bf16 %v10473_v39  ;;  %v2446_v59 = vunpack.c.l.u8.bf16 %v8703_v49  ;;  %v2551_v43 = vshrl.u32 %v2450_v24, 16 }
  0x9d   : > { %v8669_v25 = vcombine.low %v2142_v6, %v2156_v7  ;;  %v2469_v53 = vrot.slane %v2467_v26, 4  ;;  %v2472_v54 = vrot.slane %v2470_v41, 5  ;;  %v2441_v7 = vunpack.c.l.u8.bf16 %v8698_v40  ;;  %v8708_v41 = vld [vmem:[%s10140_s26 + $0x86] sm:$0x1] }
  0x9e   : > { %v2509_v14 = vshrl.u32 %v2444_v58, 16  ;;  %v2512_v16 = vshll.u32 %v2444_v58, 16  ;;  %v2523_v17 = vshrl.u32 %v2446_v59, 16  ;;  %v2526_v18 = vshll.u32 %v2446_v59, 16 }
  0x9f   : > { %v2473_v9 = vor.u32 %v2472_v54, %v2469_v53  ;;  %v2490_v42 = vshll.u32 %v2441_v7, 16  ;;  %v2554_v44 = vshll.u32 %v2450_v24, 16  ;;  %v2539_v49 = vrot.slane %v2537_v28, 4 }
  0xa0   : > { %v2511_v36 = vrot.slane %v2509_v14, 4  ;;  %v2514_v37 = vrot.slane %v2512_v16, 5  ;;  %v2525_v38 = vrot.slane %v2523_v17, 4  ;;  %v2528_v26 = vrot.slane %v2526_v18, 5  ;;  %v8736_v17 = vld [vmem:[%s10140_s26 + $0x1a] sm:$0x1] }
  0xa1   : > { %9338 = vmatmul.mubr.msk.bf16.gmra.mrb[4].mxu0 %vm436_vm0, %v8645_v50  ;;  %v2303_v50 = vunpack.c.l.u8.bf16 %v8680_v63  ;;  %v2447_v63 = vunpack.c.l.u8.bf16 %v8704_v4  ;;  %v2474_v30 = vrot.slane %v2473_v9, 4  ;;  %v2501_v40 = vor.u32 %v2500_v34, %v2497_v15  ;;  %v8719_v15 = vld [vmem:[%s10140_s26 + $0x28] sm:$0x3] }
  0xa2   : > { %9343 = vmatprep.mubr.msk.bf16.mxu0 %vm436_vm0, %v8667_v11  ;;  %v2304_v11 = vunpack.c.l.u8.bf16 %v8681_v35  ;;  %v8706_v35 = vld [vmem:[%s10140_s26 + $0x76] sm:$0x1]  ;;  %v2515_v45 = vor.u32 %v2514_v37, %v2511_v36  ;;  %v2451_v53 = vunpack.c.l.u8.bf16 %v8708_v41  ;;  %v2553_v54 = vrot.slane %v2551_v43, 4  ;;  %v10539_v34 = vld [vmem:[%s11532_s1 + $0x68] sm:$0xff]  }
  0xa3   : > { %v2532_v48 = vshll.u32 %v2447_v63, 16  ;;  %v2556_v55 = vrot.slane %v2554_v44, 5  ;;  %v8687_v57 = vcombine.low %v2305_v19, %v2306_v0  ;;  %v2492_v59 = vrot.slane %v2490_v42, 5 }
  0xa4   : > { %v8686_v62 = vcombine.low %v2303_v50, %v2304_v11  ;;  %v2506_v60 = vrot.slane %v2504_v1, 5  ;;  %v2516_v4 = vrot.slane %v2515_v45, 4  ;;  %v2560_v9 = vshll.u32 %v2451_v53, 16 }
  0xa5   : > { %v2835_v24 = vshll.u32 %v2815_v10, 16  ;;  %v2816_v42 = vunpack.c.l.u8.bf16 %v8736_v17  ;;  %v2818_v44 = vunpack.c.l.u8.bf16 %v8738_v21  ;;  %v8746_v21 = vld [vmem:[%s10140_s26 + $0x6a] sm:$0x1] }
  0xa7   : > { %v2837_v43 = vrot.slane %v2835_v24, 5  ;;  %v10561_v56 = vshll.u32 %v2818_v44, 16  ;;  %v10605_v44 = vld [vmem:[%s11532_s1 + $0x70] sm:$0xff]  }
  0xa9   : > { %9344 = vmatmul.mubr.msk.bf16.vlgmr.msra.gmra.mrb[0].mxu0 %vm436_vm0, %v8668_v20  ;;  %v2460_v20 = vrot.slane %v2459_v2, 4  ;;  %v2857_v17 = vrot.slane %v10561_v56, 5 }
  0xaa   : > { %9352 = vmatpush3.bf16.msra.mxu0 %v10430_v23  ;;  %9347 = vmatprep.mubr.msk.bf16.mxu0 %vm436_vm0, %v8669_v25  ;;  %v10487_v23 = vshll.u32 %v2439_v29, 16  ;;  %v2445_v25 = vunpack.c.l.u8.bf16 %v8702_v3  ;;  %v2540_v29 = vshll.u32 %v2448_v8, 16  ;;  %v2557_v8 = vor.u32 %v2556_v55, %v2553_v54  ;;  %v8723_v54 = vld [vmem:[%s10140_s26 + $0x68] sm:$0x3] }
  0xab   : > { %9361 = vmatprep.subr.bf16.mxu0 %v10464_v31  ;;  %v2465_v11 = vsel %vm10166_vm3, %v2460_v20, %v2464_v5  ;;  %v2562_v20 = vrot.slane %v2560_v9, 5  ;;  %v10557_v55 = vshll.u32 %v2816_v42, 16 }
  0xac   : > { %v2478_v6 = vrot.slane %v10487_v23, 5  ;;  %v2518_v46 = vshll.u32 %v2445_v25, 16  ;;  %v2542_v50 = vrot.slane %v2540_v29, 5  ;;  %v2487_v23 = vor.u32 %v2486_v33, %v2483_v22  ;;  %v8739_v25 = vld [vmem:[%s10140_s26 + $0x38] sm:$0x3] }
  0xad   : > { %v2558_v18 = vrot.slane %v2557_v8, 4  ;;  %v2832_v22 = vshrl.u32 %v2815_v10, 16  ;;  %v8741_v29 = vld [vmem:[%s10140_s26 + $0x48] sm:$0x3]  ;;  %v8718_v33 = vld [vmem:[%s10140_s26 + $0x18] sm:$0x3] }
  0xae   : > { %v2479_v27 = vsel %vm10166_vm3, %v2474_v30, %v2478_v6  ;;  %v2488_v2 = vrot.slane %v2487_v23, 4  ;;  %v2520_v3 = vrot.slane %v2518_v46, 5  ;;  %v2543_v6 = vor.u32 %v2542_v50, %v2539_v49  ;;  %v10552_v23 = vld [vmem:[%s10140_s26 + $0x58] sm:$0x3]  ;;  %v397_v8 = vld [vmem:[%s10140_s26 + $0x50] sm:$0x3] }
  0xaf   : > { %v8709_v58 = vcombine.low %v2465_v11, %v2479_v27  ;;  %v2563_v41 = vsel %vm10166_vm3, %v2558_v18, %v2562_v20  ;;  %v2834_v1 = vrot.slane %v2832_v22, 4  ;;  %v2819_v49 = vunpack.c.l.u8.bf16 %v8739_v25 }
  0xb0   : > { %v2493_v19 = vsel %vm10166_vm3, %v2488_v2, %v2492_v59  ;;  %v2521_v12 = vsel %vm10166_vm3, %v2516_v4, %v2520_v3  ;;  %v2544_v14 = vrot.slane %v2543_v6, 4  ;;  %v2821_v50 = vunpack.c.l.u8.bf16 %v8741_v29  ;;  %v8749_v6 = vld [vmem:[%s10140_s26 + $0x88] sm:$0x3] }
  0xb1   : > { %9348 = vmatmul.mubr.msk.bf16.gmra.mrb[4].mxu0 %vm436_vm0, %v8670_v52  ;;  %v2449_v52 = vunpack.c.l.u8.bf16 %v8706_v35  ;;  %v8743_v35 = vld [vmem:[%s10140_s26 + $0x58] sm:$0x3]  ;;  %v2678_v11 = vunpack.c.l.u8.bf16 %v8718_v33  ;;  %v2679_v27 = vunpack.c.l.u8.bf16 %v8719_v15  ;;  %v2682_v10 = vunpack.c.l.u8.bf16 %v10552_v23  ;;  %v8725_v29 = vld [vmem:[%s10140_s26 + $0x88] sm:$0x3] }
  0xb2   : > { %9353 = vmatprep.mubr.msk.bf16.mxu0 %vm436_vm0, %v8684_v51  ;;  %v2529_v51 = vor.u32 %v2528_v26, %v2525_v38  ;;  %v8720_v38 = vld [vmem:[%s10140_s26 + $0x38] sm:$0x3]  ;;  %v8721_v26 = vld [vmem:[%s10140_s26 + $0x48] sm:$0x3]  ;;  %v2823_v45 = vunpack.c.l.u8.bf16 %v8743_v35 }
  0xb3   : > { %v2546_v7 = vshll.u32 %v2449_v52, 16  ;;  %v2680_v52 = vunpack.c.l.u8.bf16 %v8720_v38  ;;  %v2681_v53 = vunpack.c.l.u8.bf16 %v8721_v26  ;;  %v8726_v3 = vcombine.low %v2678_v11, %v2679_v27  ;;  %v8750_v11 = vld [vmem:[%s10140_s26 + $0x8a] sm:$0x1] }
  0xb4   : > { %v2530_v5 = vrot.slane %v2529_v51, 4  ;;  %v10575_v4 = vshrl.u32 %v2823_v45, 16  ;;  %v405_v26 = vunpack.c.l.u8.bf16 %v397_v8 }
  0xb5   : > { %v2548_v16 = vrot.slane %v2546_v7, 5  ;;  %v396_v7 = vld [vmem:[%s10140_s26 + $0x40] sm:$0x3]  ;;  %v8727_v9 = vcombine.low %v2680_v52, %v2681_v53  ;;  %v2685_v53 = vunpack.c.l.u8.bf16 %v8725_v29 }
  0xb6   : > { %v2890_v33 = vrot.slane %v10575_v4, 4  ;;  %v404_v38 = vunpack.c.l.u8.bf16 %v396_v7 }
  0xb7   : > { %v2549_v37 = vsel %vm10166_vm3, %v2544_v14, %v2548_v16  ;;  %v399_v14 = vld [vmem:[%s10140_s26 + $0x70] sm:$0x3] }
  0xb8   : > { %v8712_v51 = vcombine.low %v2549_v37, %v2563_v41  ;;  %v2829_v37 = vunpack.c.l.u8.bf16 %v8749_v6  ;;  %v8492_v27 = vcombine.low %v404_v38, %v405_v26  ;;  %v8761_v26 = vld [vmem:[%s10140_s26 + $0x2c] sm:$0x3] }
  0xb9   : > { %9354 = vmatmul.mubr.msk.bf16.vlgmr.msra.gmra.mrb[0].mxu0 %vm436_vm0, %v8685_v61  ;;  %v8737_v61 = vld [vmem:[%s10140_s26 + $0x28] sm:$0x3] }
  0xba   : > { %9362 = vmatpush3.bf16.msra.mxu0 %v10464_v31  ;;  %9357 = vmatprep.mubr.msk.bf16.mxu0 %vm436_vm0, %v8686_v62  ;;  %v2502_v31 = vrot.slane %v2501_v40, 4  ;;  %v2534_v62 = vrot.slane %v2532_v48, 5  ;;  %v2817_v39 = vunpack.c.l.u8.bf16 %v8737_v61  ;;  %v8745_v40 = vld [vmem:[%s10140_s26 + $0x68] sm:$0x3]  ;;  %v10571_v61 = vshll.u32 %v2821_v50, 16 }
  0xbb   : > { %9371 = vmatprep.subr.bf16.mxu0 %v10504_v32  ;;  %v2825_v2 = vunpack.c.l.u8.bf16 %v8745_v40  ;;  %9257 = vmatprep.mubr.msk.bf16.mxu1 %vm436_vm0, %v8492_v27  ;;  %v8780_v27 = vld [vmem:[%s10140_s26 + $0x2e] sm:$0x1] }
  0xbc   : > { %v2507_v0 = vsel %vm10166_vm3, %v2502_v31, %v2506_v60  ;;  %v2535_v13 = vsel %vm10166_vm3, %v2530_v5, %v2534_v62  ;;  %v2846_v63 = vshrl.u32 %v2817_v39, 16  ;;  %v2849_v28 = vshll.u32 %v2817_v39, 16  ;;  %v8747_v31 = vld [vmem:[%s10140_s26 + $0x78] sm:$0x3]  ;;  %v8740_v62 = vld [vmem:[%s10140_s26 + $0x3a] sm:$0x1] }
  0xbd   : > { %v8710_v30 = vcombine.low %v2493_v19, %v2507_v0  ;;  %v8711_v36 = vcombine.low %v2521_v12, %v2535_v13  ;;  %v10569_v60 = vshrl.u32 %v2821_v50, 16  ;;  %v10577_v5 = vshll.u32 %v2823_v45, 16  ;;  %v8742_v0 = vld [vmem:[%s10140_s26 + $0x4a] sm:$0x1]  ;;  %v8744_v12 = vld [vmem:[%s10140_s26 + $0x5a] sm:$0x1] }
  0xbe   : > { %v2848_v46 = vrot.slane %v2846_v63, 4  ;;  %v2851_v48 = vrot.slane %v2849_v28, 5  ;;  %v2683_v39 = vunpack.c.l.u8.bf16 %v8723_v54  ;;  %v2843_v19 = vrot.slane %v10557_v55, 5  ;;  %v398_v13 = vld [vmem:[%s10140_s26 + $0x60] sm:$0x3] }
  0xbf   : > { %v2876_v24 = vrot.slane %v10569_v60, 4  ;;  %v2902_v25 = vshrl.u32 %v2825_v2, 16  ;;  %v2905_v63 = vshll.u32 %v2825_v2, 16  ;;  %v8724_v28 = vld [vmem:[%s10140_s26 + $0x78] sm:$0x3]  ;;  %v2893_v15 = vrot.slane %v10577_v5, 5 }
  0xc0   : > { %v10567_v59 = vor.u32 %v2851_v48, %v2848_v46  ;;  %v2827_v35 = vunpack.c.l.u8.bf16 %v8747_v31  ;;  %v2822_v41 = vunpack.c.l.u8.bf16 %v8742_v0  ;;  %v2824_v42 = vunpack.c.l.u8.bf16 %v8744_v12  ;;  %v8748_v50 = vld [vmem:[%s10140_s26 + $0x7a] sm:$0x1] }
  0xc1   : > { %9358 = vmatmul.mubr.msk.bf16.gmra.mrb[4].mxu0 %vm436_vm0, %v8687_v57  ;;  %v10563_v57 = vshrl.u32 %v2819_v49, 16  ;;  %v2826_v46 = vunpack.c.l.u8.bf16 %v8746_v21  ;;  %v2904_v48 = vrot.slane %v2902_v25, 4  ;;  %v8728_v23 = vcombine.low %v2682_v10, %v2683_v39 }
  0xc2   : > { %9363 = vmatprep.mubr.msk.bf16.mxu0 %vm436_vm0, %v8709_v58  ;;  %v10565_v58 = vshll.u32 %v2819_v49, 16  ;;  %v2853_v22 = vrot.slane %v10567_v59, 4  ;;  %v2907_v49 = vrot.slane %v2905_v63, 5  ;;  %v2916_v40 = vshrl.u32 %v2827_v35, 16 }
  0xc3   : > { %v2862_v18 = vrot.slane %v10563_v57, 4  ;;  %v2919_v45 = vshll.u32 %v2827_v35, 16  ;;  %v2684_v52 = vunpack.c.l.u8.bf16 %v8724_v28  ;;  %v2930_v54 = vshrl.u32 %v2829_v37, 16 }
  0xc4   : > { %v2865_v20 = vrot.slane %v10565_v58, 5  ;;  %v2933_v55 = vshll.u32 %v2829_v37, 16  ;;  %v2883_v58 = vshll.u32 %v2822_v41, 16  ;;  %v2858_v59 = vsel %vm10166_vm3, %v2853_v22, %v2857_v17  ;;  %v8777_v22 = vld [vmem:[%s10140_s26 + $0x1c] sm:$0x3] }
  0xc5   : > { %v2911_v2 = vshll.u32 %v2826_v46, 16  ;;  %v2828_v31 = vunpack.c.l.u8.bf16 %v8748_v50  ;;  %v2921_v4 = vrot.slane %v2919_v45, 5  ;;  %v2894_v5 = vor.u32 %v2893_v15, %v2890_v33  ;;  %v10636_v41 = vld [vmem:[%s11532_s1 + $0x78] sm:$0xff]  }
  0xc6   : > { %v2866_v56 = vor.u32 %v2865_v20, %v2862_v18  ;;  %v2908_v6 = vor.u32 %v2907_v49, %v2904_v48  ;;  %v2932_v7 = vrot.slane %v2930_v54, 4  ;;  %v2935_v8 = vrot.slane %v2933_v55, 5  ;;  %v8762_v46 = vld [vmem:[%s10140_s26 + $0x3c] sm:$0x3]  ;;  %v8763_v48 = vld [vmem:[%s10140_s26 + $0x4c] sm:$0x3] }
  0xc7   : > { %v2895_v17 = vrot.slane %v2894_v5, 4  ;;  %v3194_v37 = vunpack.c.l.u8.bf16 %v8777_v22  ;;  %v8781_v45 = vld [vmem:[%s10140_s26 + $0x3c] sm:$0x3]  ;;  %v8783_v55 = vld [vmem:[%s10140_s26 + $0x4c] sm:$0x3] }
  0xc8   : > { %v2909_v18 = vrot.slane %v2908_v6, 4  ;;  %v2936_v21 = vor.u32 %v2935_v8, %v2932_v7  ;;  %v3200_v5 = vunpack.c.l.u8.bf16 %v8783_v55 }
  0xc9   : > { %9364 = vmatmul.mubr.msk.bf16.vlgmr.msra.gmra.mrb[0].mxu0 %vm436_vm0, %v8710_v30  ;;  %v2879_v30 = vrot.slane %v10571_v61, 5  ;;  %v2897_v61 = vshll.u32 %v2824_v42, 16  ;;  %v8778_v42 = vld [vmem:[%s10140_s26 + $0x1e] sm:$0x1]  ;;  %v3211_v49 = vshrl.u32 %v3194_v37, 16  ;;  %v3214_v50 = vshll.u32 %v3194_v37, 16 }
  0xca   : > { %9372 = vmatpush3.bf16.msra.mxu0 %v10504_v32  ;;  %9367 = vmatprep.mubr.msk.bf16.mxu0 %vm436_vm0, %v8711_v36  ;;  %v10559_v32 = vor.u32 %v2837_v43, %v2834_v1  ;;  %v2820_v36 = vunpack.c.l.u8.bf16 %v8740_v62  ;;  %v406_v1 = vunpack.c.l.u8.bf16 %v398_v13  ;;  %v407_v43 = vunpack.c.l.u8.bf16 %v399_v14 }
  0xcb   : > { %9381 = vmatprep.subr.bf16.mxu0 %v10539_v34  ;;  %v2880_v60 = vor.u32 %v2879_v30, %v2876_v24  ;;  %v2918_v62 = vrot.slane %v2916_v40, 4  ;;  %v2899_v12 = vrot.slane %v2897_v61, 5  ;;  %v2913_v13 = vrot.slane %v2911_v2, 5  ;;  %v8779_v24 = vld [vmem:[%s10140_s26 + $0x2c] sm:$0x3] }
  0xcc   : > { %v2839_v16 = vrot.slane %v10559_v32, 4  ;;  %v2869_v57 = vshll.u32 %v2820_v36, 16  ;;  %v2925_v14 = vshll.u32 %v2828_v31, 16  ;;  %v2937_v35 = vrot.slane %v2936_v21, 4  ;;  %v8760_v36 = vld [vmem:[%s10140_s26 + $0x1c] sm:$0x3] }
  0xcd   : > { %v2881_v0 = vrot.slane %v2880_v60, 4  ;;  %v2922_v20 = vor.u32 %v2921_v4, %v2918_v62  ;;  %v2900_v30 = vsel %vm10166_vm3, %v2895_v17, %v2899_v12  ;;  %v2914_v33 = vsel %vm10166_vm3, %v2909_v18, %v2913_v13  ;;  %v8785_v2 = vld [vmem:[%s10140_s26 + $0x5c] sm:$0x3]  ;;  %v8787_v31 = vld [vmem:[%s10140_s26 + $0x6c] sm:$0x3] }
  0xce   : > { %v2844_v32 = vsel %vm10166_vm3, %v2839_v16, %v2843_v19  ;;  %v2871_v10 = vrot.slane %v2869_v57, 5  ;;  %v2867_v19 = vrot.slane %v2866_v56, 4  ;;  %v2927_v28 = vrot.slane %v2925_v14, 5  ;;  %v8764_v57 = vld [vmem:[%s10140_s26 + $0x5c] sm:$0x3] }
  0xcf   : > { %v8751_v39 = vcombine.low %v2844_v32, %v2858_v59  ;;  %v2923_v15 = vrot.slane %v2922_v20, 4  ;;  %v3195_v54 = vunpack.c.l.u8.bf16 %v8778_v42  ;;  %v3059_v32 = vunpack.c.l.u8.bf16 %v8762_v46  ;;  %v8784_v12 = vld [vmem:[%s10140_s26 + $0x4e] sm:$0x1]  ;;  %v8786_v20 = vld [vmem:[%s10140_s26 + $0x5e] sm:$0x1] }
  0xd0   : > { %v2872_v25 = vsel %vm10166_vm3, %v2867_v19, %v2871_v10  ;;  %v3060_v56 = vunpack.c.l.u8.bf16 %v8763_v48  ;;  %v3213_v59 = vrot.slane %v3211_v49, 4  ;;  %v3216_v60 = vrot.slane %v3214_v50, 5  ;;  %v8782_v10 = vld [vmem:[%s10140_s26 + $0x3e] sm:$0x1] }
  0xd1   : > { %9368 = vmatmul.mubr.msk.bf16.gmra.mrb[4].mxu0 %vm436_vm0, %v8712_v51  ;;  %v8493_v51 = vcombine.low %v406_v1, %v407_v43  ;;  %v3196_v1 = vunpack.c.l.u8.bf16 %v8779_v24  ;;  %v8753_v43 = vcombine.low %v2900_v30, %v2914_v33  ;;  %v3198_v61 = vunpack.c.l.u8.bf16 %v8781_v45 }
  0xd2   : > { %9373 = vmatprep.mubr.msk.bf16.mxu0 %vm436_vm0, %v8726_v3  ;;  %v2830_v3 = vunpack.c.l.u8.bf16 %v8750_v11  ;;  %v3057_v11 = vunpack.c.l.u8.bf16 %v8760_v36  ;;  %v3061_v7 = vunpack.c.l.u8.bf16 %v8764_v57  ;;  %v3204_v19 = vunpack.c.l.u8.bf16 %v8787_v31  ;;  %v8766_v36 = vld [vmem:[%s10140_s26 + $0x7c] sm:$0x3] }
  0xd3   : > { %9258 = vmatmul.mubr.msk.bf16.vlgmr.msra.gmra.mrb[0].mxu1 %vm436_vm0, %v8493_v51  ;;  %v3228_v40 = vshll.u32 %v3196_v1, 16  ;;  %v2928_v51 = vsel %vm10166_vm3, %v2923_v15, %v2927_v28  ;;  %v3239_v13 = vshrl.u32 %v3198_v61, 16  ;;  %v3253_v17 = vshrl.u32 %v3200_v5, 16  ;;  %v8789_v28 = vld [vmem:[%s10140_s26 + $0x7c] sm:$0x3] }
  0xd4   : > { %v2939_v16 = vshll.u32 %v2830_v3, 16  ;;  %v3256_v18 = vshll.u32 %v3200_v5, 16  ;;  %v8769_v21 = vcombine.low %v3059_v32, %v3060_v56  ;;  %v3281_v33 = vshrl.u32 %v3204_v19, 16 }
  0xd5   : > { %v3230_v4 = vrot.slane %v3228_v40, 5  ;;  %v3284_v15 = vshll.u32 %v3204_v19, 16  ;;  %v3241_v42 = vrot.slane %v3239_v13, 4  ;;  %v3255_v48 = vrot.slane %v3253_v17, 4 }
  0xd6   : > { %v2941_v29 = vrot.slane %v2939_v16, 5  ;;  %v3242_v16 = vshll.u32 %v3198_v61, 16  ;;  %v3258_v49 = vrot.slane %v3256_v18, 5  ;;  %v3203_v50 = vunpack.c.l.u8.bf16 %v8786_v20 }
  0xd8   : > { %v3244_v46 = vrot.slane %v3242_v16, 5 }
  0xd9   : > { %9374 = vmatmul.mubr.msk.bf16.vlgmr.msra.gmra.mrb[0].mxu0 %vm436_vm0, %v8727_v9  ;;  %v8729_v9 = vcombine.low %v2684_v52, %v2685_v53  ;;  %v2942_v52 = vsel %vm10166_vm3, %v2937_v35, %v2941_v29  ;;  %v3058_v53 = vunpack.c.l.u8.bf16 %v8761_v26  ;;  %v8791_v35 = vld [vmem:[%s10140_s26 + $0x8c] sm:$0x3]  ;;  %v3201_v26 = vunpack.c.l.u8.bf16 %v8784_v12 }
  0xda   : > { %9382 = vmatpush3.bf16.msra.mxu0 %v10539_v34  ;;  %9377 = vmatprep.mubr.msk.bf16.mxu0 %vm436_vm0, %v8728_v23  ;;  %v2885_v34 = vrot.slane %v2883_v58, 5  ;;  %v3225_v23 = vshrl.u32 %v3196_v1, 16  ;;  %v3197_v58 = vunpack.c.l.u8.bf16 %v8780_v27  ;;  %v8754_v3 = vcombine.low %v2928_v51, %v2942_v52  ;;  %v8767_v1 = vld [vmem:[%s10140_s26 + $0x8c] sm:$0x3] }
  0xdb   : > { %9391 = vmatprep.subr.bf16.mxu0 %v10605_v44  ;;  %v8768_v6 = vcombine.low %v3057_v11, %v3058_v53  ;;  %v3206_v27 = vunpack.c.l.u8.bf16 %v8789_v28  ;;  %v3283_v51 = vrot.slane %v3281_v33, 4  ;;  %v3286_v52 = vrot.slane %v3284_v15, 5 }
  0xdc   : > { %v2886_v63 = vsel %vm10166_vm3, %v2881_v0, %v2885_v34  ;;  %v3227_v62 = vrot.slane %v3225_v23, 4  ;;  %v3217_v0 = vor.u32 %v3216_v60, %v3213_v59  ;;  %v3234_v34 = vshll.u32 %v3197_v58, 16  ;;  %v8790_v59 = vld [vmem:[%s10140_s26 + $0x7e] sm:$0x1]  ;;  %v8792_v60 = vld [vmem:[%s10140_s26 + $0x8e] sm:$0x1] }
  0xdd   : > { %v8752_v38 = vcombine.low %v2872_v25, %v2886_v63  ;;  %v3199_v25 = vunpack.c.l.u8.bf16 %v8782_v10  ;;  %v8788_v63 = vld [vmem:[%s10140_s26 + $0x6e] sm:$0x1]  ;;  %v3208_v23 = vunpack.c.l.u8.bf16 %v8791_v35  ;;  %v3063_v53 = vunpack.c.l.u8.bf16 %v8766_v36 }
  0xde   : > { %v3231_v14 = vor.u32 %v3230_v4, %v3227_v62  ;;  %v3218_v37 = vrot.slane %v3217_v0, 4  ;;  %v3205_v11 = vunpack.c.l.u8.bf16 %v8788_v63  ;;  %v3262_v32 = vshll.u32 %v3201_v26, 16 }
  0xdf   : > { %v3248_v55 = vshll.u32 %v3199_v25, 16  ;;  %v3259_v58 = vor.u32 %v3258_v49, %v3255_v48  ;;  %v3295_v61 = vshrl.u32 %v3206_v27, 16  ;;  %v3309_v31 = vshrl.u32 %v3208_v23, 16 }
  0xe0   : > { %v3276_v4 = vshll.u32 %v3203_v50, 16  ;;  %v3287_v5 = vor.u32 %v3286_v52, %v3283_v51  ;;  %v3264_v10 = vrot.slane %v3262_v32, 5  ;;  %v3207_v0 = vunpack.c.l.u8.bf16 %v8790_v59 }
  0xe1   : > { %9378 = vmatmul.mubr.msk.bf16.gmra.mrb[4].mxu0 %vm436_vm0, %v8729_v9  ;;  %v3220_v9 = vshll.u32 %v3195_v54, 16  ;;  %v3064_v54 = vunpack.c.l.u8.bf16 %v8767_v1  ;;  %v3260_v19 = vrot.slane %v3259_v58, 4  ;;  %v3311_v13 = vrot.slane %v3309_v31, 4 }
  0xe2   : > { %9383 = vmatprep.mubr.msk.bf16.mxu0 %vm436_vm0, %v8751_v39  ;;  %v3202_v39 = vunpack.c.l.u8.bf16 %v8785_v2  ;;  %v3298_v2 = vshll.u32 %v3206_v27, 16  ;;  %v3278_v17 = vrot.slane %v3276_v4, 5  ;;  %v3288_v18 = vrot.slane %v3287_v5, 4 }
  0xe3   : > { %v3222_v24 = vrot.slane %v3220_v9, 5  ;;  %v3250_v9 = vrot.slane %v3248_v55, 5  ;;  %v10056_v27 = vmov 1966171168  }
  0xe4   : > { %v3267_v29 = vshrl.u32 %v3202_v39, 16  ;;  %v3270_v30 = vshll.u32 %v3202_v39, 16  ;;  %v3300_v12 = vrot.slane %v3298_v2, 5 }
  0xe5   : > { %v3223_v56 = vsel %vm10166_vm3, %v3218_v37, %v3222_v24  ;;  %v3265_v24 = vsel %vm10166_vm3, %v3260_v19, %v3264_v10 }
  0xe6   : > { %v3269_v40 = vrot.slane %v3267_v29, 4  ;;  %v3272_v45 = vrot.slane %v3270_v30, 5 }
  0xe8   : > { %v3273_v62 = vor.u32 %v3272_v45, %v3269_v40  ;;  %v3447_v40 = vlaneseq  ;;  %v8489_v45 = vld [vmem:[%s11533_s2] ss:$0 sm:$0xff] }
  0xe9   : > { %9384 = vmatmul.mubr.msk.bf16.vlgmr.msra.gmra.mrb[0].mxu0 %vm436_vm0, %v8752_v38  ;;  %v3236_v38 = vrot.slane %v3234_v34, 5  ;;  %v3209_v34 = vunpack.c.l.u8.bf16 %v8792_v60 }
  0xea   : > { %9392 = vmatpush3.bf16.msra.mxu0 %v10605_v44  ;;  %9387 = vmatprep.mubr.msk.bf16.mxu0 %vm436_vm0, %v8753_v43  ;;  %v8765_v44 = vld [vmem:[%s10140_s26 + $0x6c] sm:$0x3]  ;;  %v3232_v43 = vrot.slane %v3231_v14, 4  ;;  %v3274_v16 = vrot.slane %v3273_v62, 4  ;;  %v10709_v55 = vshrl.u32 %v3447_v40, 7 }
  0xeb   : > { %9401 = vmatprep.subr.bf16.mxu0 %v10636_v41  ;;  %v3062_v8 = vunpack.c.l.u8.bf16 %v8765_v44  ;;  %v3245_v44 = vor.u32 %v3244_v46, %v3241_v42  ;;  %v3318_v28 = vshll.u32 %v3209_v34, 16  ;;  %v10054_v46 = vmov 0.0  }
  0xec   : > { %v3237_v57 = vsel %vm10166_vm3, %v3232_v43, %v3236_v38  ;;  %v3279_v29 = vsel %vm10166_vm3, %v3274_v16, %v3278_v17  ;;  %v9974_v43 = vld [vmem:[%s11534_s3] sm:$0xff]   ;;  %9411 = vmatprep.subr.bf16.mxu1 %v10054_v46  ;;  %9415 = vmatprep.mubr.msk.bf16.mxu1 %vm10055_vm4, %v10054_v46 }
  0xed   : > { %v8770_v22 = vcombine.low %v3061_v7, %v3062_v8  ;;  %v8771_v7 = vcombine.low %v3063_v53, %v3064_v54  ;;  %v8793_v8 = vcombine.low %v3223_v56, %v3237_v57  ;;  %v3246_v39 = vrot.slane %v3245_v44, 4  ;;  %9412 = vmatpush3.bf16.msra.mxu1 %v9974_v43 }
  0xee   : > { %v3320_v38 = vrot.slane %v3318_v28, 5  ;;  %9413 = vmatprep.subr.bf16.mxu1 %v10054_v46 }
  0xf1   : > { %9388 = vmatmul.mubr.msk.bf16.gmra.mrb[4].mxu0 %vm436_vm0, %v8754_v3  ;;  %v3312_v3 = vshll.u32 %v3208_v23, 16  ;;  %9414 = vmatpush3.bf16.msra.mxu1 %v9975_v47  ;;  %v3445_v23 = vunpack.c.l.s4 %v10056_v27 }
  0xf2   : > { %9393 = vmatprep.mubr.msk.bf16.mxu0 %vm436_vm0, %v8768_v6  ;;  %v3290_v6 = vshll.u32 %v3205_v11, 16  ;;  %9419 = vmatprep.subr.bf16.mxu1 %v10054_v46 }
  0xf3   : > { %v3314_v14 = vrot.slane %v3312_v3, 5  ;;  %v3446_v54 = vunpack.c.0.s8 %v3445_v23 }
  0xf4   : > { %v3292_v20 = vrot.slane %v3290_v6, 5 }
  0xf5   : > { %v3315_v63 = vor.u32 %v3314_v14, %v3311_v13 }
  0xf6   : > { %v3293_v30 = vsel %vm10166_vm3, %v3288_v18, %v3292_v20 }
  0xf7   : > { %v8795_v35 = vcombine.low %v3279_v29, %v3293_v30  ;;  %v3316_v37 = vrot.slane %v3315_v63, 4 }
  0xf9   : > { %9394 = vmatmul.mubr.msk.bf16.vlgmr.msra.gmra.mrb[0].mxu0 %vm436_vm0, %v8769_v21  ;;  %v3251_v21 = vsel %vm10166_vm3, %v3246_v39, %v3250_v9  ;;  %v3321_v42 = vsel %vm10166_vm3, %v3316_v37, %v3320_v38 }
  0xfa   : > { %9402 = vmatpush3.bf16.msra.mxu0 %v10636_v41  ;;  %9397 = vmatprep.mubr.msk.bf16.mxu0 %vm436_vm0, %v8770_v22  ;;  %v3297_v41 = vrot.slane %v3295_v61, 4  ;;  %v3304_v22 = vshll.u32 %v3207_v0, 16  ;;  %v8794_v33 = vcombine.low %v3251_v21, %v3265_v24  ;;  %v10712_v61 = vsub.s32 %v3446_v54, %v10709_v55 }
  0xfb   : > { %9647 = vmatprep.subr.bf16.mxu0 %v10054_v46 }
  0xfc   : > { %v3301_v25 = vor.u32 %v3300_v12, %v3297_v41  ;;  %v3306_v15 = vrot.slane %v3304_v22, 5 }
  0xfe   : > { %v3302_v36 = vrot.slane %v3301_v25, 4 }
 0x100   : > { %v3307_v26 = vsel %vm10166_vm3, %v3302_v36, %v3306_v15 }
 0x101   : > { %9398 = vmatmul.mubr.msk.bf16.gmra.mrb[4].mxu0 %vm436_vm0, %v8771_v7  ;;  %v8796_v1 = vcombine.low %v3307_v26, %v3321_v42 }
 0x102   : > { %9403 = vmatprep.mubr.msk.bf16.mxu0 %vm436_vm0, %v8793_v8 }
 0x109   : > { %9404 = vmatmul.mubr.msk.bf16.vlgmr.msra.gmra.mrb[0].mxu0 %vm436_vm0, %v8794_v33 }
 0x10a   : > { %9407 = vmatprep.mubr.msk.bf16.mxu0 %vm436_vm0, %v8795_v35 }
 0x111   : > { %9408 = vmatmul.mubr.msk.bf16.gmra.mrb[4].mxu0 %vm436_vm0, %v8796_v1  ;;  %vm7502_vm0 = vmand %vm7500_vm14, %vm7501_vm15 }
 0x112   : > { %9655 = vmatprep.mubr.msk.bf16.mxu0 %vm10055_vm4, %v10054_v46 }
 0x1a6   : > { %v9259_v48 = vpop.f32.mrb[0].mxu1 }
 0x1a7   : > { %v499_v49 = vpop.f32.mrb[1].mxu1  ;;  %v520_v2 = vadd.f32 %v9259_v48, %v8489_v45 }
 0x1a8   : > { %v9260_v50 = vpop.f32.mrb[2].mxu1  ;;  %v518_v62 = vadd.f32 %v8489_v45, %v499_v49 }
 0x1a9   : > { %v502_v11 = vpop.f32.mrb[3].mxu1  ;;  %v521_v39 = vadd.f32 %v9260_v50, %v8489_v45 }
 0x1aa   : > { %v519_v12 = vadd.f32 %v8489_v45, %v502_v11 }
 0x1dc   : > { %v9405_v51 = vpop.f32.mrb[0].mxu0 }
 0x1dd   : > { %v9720_v52 = vadd.f32 %v9405_v51, %v8489_v45  ;;  %v3388_v53 = vpop.f32.mrb[1].mxu0 }
 0x1de   : > { %v9721_v32 = vadd.f32 %v8489_v45, %v3388_v53  ;;  %v9406_v56 = vpop.f32.mrb[2].mxu0 }
 0x1df   : > { %v9722_v57 = vadd.f32 %v9406_v56, %v8489_v45  ;;  %v3391_v44 = vpop.f32.mrb[3].mxu0  ;;  %v3429_v59 = vmax.f32 %v9720_v52, 0.0 }
 0x1e0   : > { %v9723_v58 = vadd.f32 %v8489_v45, %v3391_v44  ;;  %v3427_v31 = vmax.f32 %v9721_v32, 0.0 }
 0x1e1   : > { %v3430_v60 = vmax.f32 %v9722_v57, 0.0 }
 0x1e2   : > { %v3428_v3 = vmax.f32 %v9723_v58, 0.0 }
 0x1e3   : > { %v3436_v4 = vpack.c.bf16 %v3430_v60, %v3429_v59  ;;  %v8803_v5 = vpack.c.bf16 %v3430_v60, %v3430_v60 }
 0x1e4   : > { %v3435_v6 = vpack.c.bf16 %v3428_v3, %v3427_v31  ;;  %v8802_v7 = vpack.c.bf16 %v3428_v3, %v3428_v3  ;;  %v9409_v8 = vpop.f32.mrb[4].mxu0 }
 0x1e5   : > { %v3499_v9 = vrot.slane %v3436_v4, %v10712_v61  ;;  %v3506_v10 = vrot.slane %v8803_v5, %v10712_v61  ;;  %v9725_v19 = vadd.f32 %v9409_v8, %v520_v2  ;;  %v3404_v0 = vpop.f32.mrb[5].mxu0 }
 0x1e6   : > { %v3450_v34 = vrot.slane %v3435_v6, %v10712_v61  ;;  %v3457_v41 = vrot.slane %v8802_v7, %v10712_v61  ;;  %v9727_v13 = vadd.f32 %v3404_v0, %v518_v62  ;;  %v9410_v14 = vpop.f32.mrb[6].mxu0 }
 0x1e7   : > { %v3507_v16 = vcombine.high %v3499_v9, %v3499_v9  ;;  %v3508_v17 = vcombine.high %v3506_v10, %v3506_v10  ;;  %v3515_v18 = vrot.slane %v3499_v9, %v10712_v61  ;;  %v3522_v20 = vrot.slane %v3506_v10, %v10712_v61  ;;  %v3407_v21 = vpop.f32.mrb[7].mxu0 }
 0x1e8   : > { %v3458_v22 = vcombine.high %v3450_v34, %v3450_v34  ;;  %v3459_v24 = vcombine.high %v3457_v41, %v3457_v41  ;;  %v3466_v25 = vrot.slane %v3450_v34, %v10712_v61  ;;  %v3473_v63 = vrot.slane %v3457_v41, %v10712_v61 }
 0x1e9   : > { %v3529_v28 = vrot.slane %v3507_v16, %v10712_v61  ;;  %v3536_v29 = vrot.slane %v3508_v17, %v10712_v61  ;;  %v3537_v30 = vcombine.high %v3515_v18, %v3515_v18  ;;  %v3538_v33 = vcombine.high %v3522_v20, %v3522_v20  ;;  %3680 = vst.msk [vmem:[#allocation2 + $0x8] sm:$0x1] %vm3671_vm5, %v3515_v18 }
 0x1ea   : > { %3684 = vst.msk [vmem:[#allocation2 + $0xc] sm:$0x1] %vm3671_vm5, %v3522_v20  ;;  %v3480_v15 = vrot.slane %v3458_v22, %v10712_v61  ;;  %v3487_v35 = vrot.slane %v3459_v24, %v10712_v61  ;;  %v3488_v36 = vcombine.high %v3466_v25, %v3466_v25  ;;  %v3489_v37 = vcombine.high %v3473_v63, %v3473_v63 }
 0x1eb   : > { %3672 = vst.msk [vmem:[#allocation2] sm:$0x1] %vm3671_vm5, %v3466_v25  ;;  %3676 = vst.msk [vmem:[#allocation2 + $0x4] sm:$0x1] %vm3671_vm5, %v3473_v63  ;;  %v3539_v38 = vcombine.high %v3529_v28, %v3529_v28  ;;  %v3540_v26 = vcombine.high %v3536_v29, %v3536_v29  ;;  %v9729_v43 = vadd.f32 %v9410_v14, %v521_v39  ;;  %v3433_v48 = vmax.f32 %v9725_v19, 0.0 }
 0x1ec   : > { %3681 = vst.msk [vmem:[#allocation2 + $0x9] sm:$0x1] %vm3671_vm5, %v3529_v28  ;;  %3682 = vst.msk [vmem:[#allocation2 + $0xa] sm:$0x1] %vm3671_vm5, %v3537_v30  ;;  %v3490_v42 = vcombine.high %v3480_v15, %v3480_v15  ;;  %v3491_v1 = vcombine.high %v3487_v35, %v3487_v35  ;;  %v9731_v47 = vadd.f32 %v3407_v21, %v519_v12  ;;  %v3431_v49 = vmax.f32 %v9727_v13, 0.0 }
 0x1ed   : > { %3685 = vst.msk [vmem:[#allocation2 + $0xd] sm:$0x1] %vm3671_vm5, %v3536_v29  ;;  %3686 = vst.msk [vmem:[#allocation2 + $0xe] sm:$0x1] %vm3671_vm5, %v3538_v33  ;;  %v3434_v50 = vmax.f32 %v9729_v43, 0.0 }
 0x1ee   : > { %3673 = vst.msk [vmem:[#allocation2 + $0x1] sm:$0x1] %vm3671_vm5, %v3480_v15  ;;  %3674 = vst.msk [vmem:[#allocation2 + $0x2] sm:$0x1] %vm3671_vm5, %v3488_v36  ;;  %v3432_v11 = vmax.f32 %v9731_v47, 0.0 }
 0x1ef   : > { %3677 = vst.msk [vmem:[#allocation2 + $0x5] sm:$0x1] %vm3671_vm5, %v3487_v35  ;;  %3678 = vst.msk [vmem:[#allocation2 + $0x6] sm:$0x1] %vm3671_vm5, %v3489_v37  ;;  %v3438_v27 = vpack.c.bf16 %v3434_v50, %v3433_v48  ;;  %v8805_v23 = vpack.c.bf16 %v3434_v50, %v3434_v50 }
 0x1f0   : > { %3683 = vst.msk [vmem:[#allocation2 + $0xb] sm:$0x1] %vm3671_vm5, %v3539_v38  ;;  %3687 = vst.msk [vmem:[#allocation2 + $0xf] sm:$0x1] %vm3671_vm5, %v3540_v26  ;;  %v3437_v40 = vpack.c.bf16 %v3432_v11, %v3431_v49  ;;  %v8804_v45 = vpack.c.bf16 %v3432_v11, %v3432_v11 }
 0x1f1   : > { %3675 = vst.msk [vmem:[#allocation2 + $0x3] sm:$0x1] %vm3671_vm5, %v3490_v42  ;;  %3679 = vst.msk [vmem:[#allocation2 + $0x7] sm:$0x1] %vm3671_vm5, %v3491_v1  ;;  %v3597_v53 = vrot.slane %v3438_v27, %v10712_v61  ;;  %v3604_v54 = vrot.slane %v8805_v23, %v10712_v61 }
 0x1f2   : > { %v8810_v51 = vld.sshfl [vmem:[#allocation2 + $0x8] sm:$0x1 pattern:$0x75316420]  ;;  %v3548_v32 = vrot.slane %v3437_v40, %v10712_v61  ;;  %v3555_v56 = vrot.slane %v8804_v45, %v10712_v61 }
 0x1f3   : > { %v8807_v52 = vld.sshfl [vmem:[#allocation2] sm:$0x1 pattern:$0x75316420]  ;;  %v3789_v58 = vrot.slane %v8810_v51, %v10712_v61  ;;  %v3605_v60 = vcombine.high %v3597_v53, %v3597_v53  ;;  %v3606_v2 = vcombine.high %v3604_v54, %v3604_v54  ;;  %v3613_v31 = vrot.slane %v3597_v53, %v10712_v61 }
 0x1f4   : > { %v8811_v57 = vld.sshfl [vmem:[#allocation2 + $0x9] sm:$0x1 pattern:$0x75316420]  ;;  %v3747_v44 = vrot.slane %v8807_v52, %v10712_v61  ;;  %v3620_v3 = vrot.slane %v3604_v54, %v10712_v61  ;;  %v3556_v4 = vcombine.high %v3548_v32, %v3548_v32  ;;  %v3557_v5 = vcombine.high %v3555_v56, %v3555_v56 }
 0x1f5   : > { %v3803_v59 = vrot.slane %v8811_v57, %v10712_v61  ;;  %v8808_v62 = vld.sshfl [vmem:[#allocation2 + $0x1] sm:$0x1 pattern:$0x75316420]  ;;  %v3564_v6 = vrot.slane %v3548_v32, %v10712_v61  ;;  %v3571_v7 = vrot.slane %v3555_v56, %v10712_v61  ;;  %v3627_v9 = vrot.slane %v3605_v60, %v10712_v61  ;;  %3696 = vst.msk [vmem:[#allocation2 + $0x18] sm:$0x1] %vm3671_vm5, %v3613_v31 }
 0x1f6   : > { %v8809_v8 = vld.sshfl [vmem:[#allocation2 + $0x2] sm:$0x1 pattern:$0x75316420]  ;;  %v3634_v10 = vrot.slane %v3606_v2, %v10712_v61  ;;  %v3635_v39 = vcombine.high %v3613_v31, %v3613_v31  ;;  %v3636_v19 = vcombine.high %v3620_v3, %v3620_v3  ;;  %3700 = vst.msk [vmem:[#allocation2 + $0x1c] sm:$0x1] %vm3671_vm5, %v3620_v3  ;;  %v3578_v34 = vrot.slane %v3556_v4, %v10712_v61 }
 0x1f7   : > { %v8812_v0 = vld.sshfl [vmem:[#allocation2 + $0xa] sm:$0x1 pattern:$0x75316420]  ;;  %v3585_v41 = vrot.slane %v3557_v5, %v10712_v61  ;;  %v3586_v12 = vcombine.high %v3564_v6, %v3564_v6  ;;  %v3587_v13 = vcombine.high %v3571_v7, %v3571_v7  ;;  %3688 = vst.msk [vmem:[#allocation2 + $0x10] sm:$0x1] %vm3671_vm5, %v3564_v6  ;;  %v3637_v14 = vcombine.high %v3627_v9, %v3627_v9 }
 0x1f8   : > { %3692 = vst.msk [vmem:[#allocation2 + $0x14] sm:$0x1] %vm3671_vm5, %v3571_v7  ;;  %v3638_v16 = vcombine.high %v3634_v10, %v3634_v10  ;;  %3697 = vst.msk [vmem:[#allocation2 + $0x19] sm:$0x1] %vm3671_vm5, %v3627_v9  ;;  %v3761_v17 = vrot.slane %v8808_v62, %v10712_v61  ;;  %v3775_v18 = vrot.slane %v8809_v8, %v10712_v61  ;;  %v3860_v24 = vunpack.c.l.b16 %v3747_v44  ;;  %v9976_v2 = vld [vmem:[%s11534_s3 + $0x10] sm:$0xff]   ;;  %v9977_v7 = vld [vmem:[%s11534_s3 + $0x18] sm:$0xff]  }
 0x1f9   : > { %3698 = vst.msk [vmem:[#allocation2 + $0x1a] sm:$0x1] %vm3671_vm5, %v3635_v39  ;;  %3701 = vst.msk [vmem:[#allocation2 + $0x1d] sm:$0x1] %vm3671_vm5, %v3634_v10  ;;  %v3588_v20 = vcombine.high %v3578_v34, %v3578_v34  ;;  %v3589_v21 = vcombine.high %v3585_v41, %v3585_v41  ;;  %v3817_v22 = vrot.slane %v8812_v0, %v10712_v61  ;;  %v10778_v28 = vunpack.c.l.b16 %v3789_v58 }
 0x1fa   : > { %3702 = vst.msk [vmem:[#allocation2 + $0x1e] sm:$0x1] %vm3671_vm5, %v3636_v19  ;;  %3689 = vst.msk [vmem:[#allocation2 + $0x11] sm:$0x1] %vm3671_vm5, %v3578_v34  ;;  %v10774_v25 = vunpack.c.l.b16 %v3761_v17  ;;  %v10776_v63 = vunpack.c.l.b16 %v3775_v18  ;;  %v10782_v29 = vunpack.c.l.b16 %v3803_v59  ;;  %v4107_v35 = vrot.slane %v3860_v24, 1 }
 0x1fb   : > { %3690 = vst.msk [vmem:[#allocation2 + $0x12] sm:$0x1] %vm3671_vm5, %v3586_v12  ;;  %3693 = vst.msk [vmem:[#allocation2 + $0x15] sm:$0x1] %vm3671_vm5, %v3585_v41  ;;  %v10784_v30 = vunpack.c.l.b16 %v3817_v22  ;;  %v3875_v38 = vrot.slane %v10778_v28, 5  ;;  %v4111_v58 = vrot.slane %v10778_v28, 6 }
 0x1fc   : > { %3694 = vst.msk [vmem:[#allocation2 + $0x16] sm:$0x1] %vm3671_vm5, %v3587_v13  ;;  %3699 = vst.msk [vmem:[#allocation2 + $0x1b] sm:$0x1] %vm3671_vm5, %v3637_v14  ;;  %v3869_v33 = vrot.slane %v10774_v25, 7  ;;  %v3872_v15 = vrot.slane %v10776_v63, 6  ;;  %v4108_v45 = vsel %vm3870_vm6, %v10774_v25, %v4107_v35 }
 0x1fd   : > { %3703 = vst.msk [vmem:[#allocation2 + $0x1f] sm:$0x1] %vm3671_vm5, %v3638_v16  ;;  %3691 = vst.msk [vmem:[#allocation2 + $0x13] sm:$0x1] %vm3671_vm5, %v3588_v20  ;;  %v3878_v1 = vrot.slane %v10782_v29, 4  ;;  %v3881_v49 = vrot.slane %v10784_v30, 3 }
 0x1fe   : > { %3695 = vst.msk [vmem:[#allocation2 + $0x17] sm:$0x1] %vm3671_vm5, %v3589_v21  ;;  %v8813_v36 = vld.sshfl [vmem:[#allocation2 + $0x10] sm:$0x1 pattern:$0x75316420]  ;;  %v3871_v37 = vsel %vm3870_vm6, %v3869_v33, %v3860_v24 }
 0x1ff   : > { %v3831_v26 = vrot.slane %v8813_v36, %v10712_v61  ;;  %v3874_v42 = vsel %vm3873_vm7, %v3872_v15, %v3871_v37  ;;  %v8833_v43 = vld.sshfl [vmem:[#allocation2 + $0x3] sm:$0x1 pattern:$0x75316420]  ;;  %v4109_v50 = vrot.slane %v10776_v63, 7  ;;  %v4113_v62 = vrot.slane %v10782_v29, 5 }
 0x200   : > { %v3877_v48 = vsel %vm3876_vm8, %v3875_v38, %v3874_v42  ;;  %v4245_v56 = vrot.slane %v8833_v43, %v10712_v61  ;;  %v4115_v8 = vrot.slane %v10784_v30, 4  ;;  %v8836_v9 = vld.sshfl [vmem:[#allocation2 + $0xb] sm:$0x1 pattern:$0x75316420]  ;;  %v4569_v41 = vrot.slane %v10774_v25, 1 }
 0x201   : > { %v8814_v47 = vld.sshfl [vmem:[#allocation2 + $0x11] sm:$0x1 pattern:$0x75316420]  ;;  %v10797_v23 = vunpack.c.l.b16 %v3831_v26  ;;  %v3880_v40 = vsel %vm3879_vm9, %v3878_v1, %v3877_v48  ;;  %v4110_v32 = vsel %vm3873_vm7, %v4109_v50, %v4108_v45  ;;  %v4340_v0 = vsel %vm3870_vm6, %v4109_v50, %v10774_v25  ;;  %v9978_v20 = vld [vmem:[%s11534_s3 + $0x20] sm:$0xff]  }
 0x202   : > { %v8815_v11 = vld.sshfl [vmem:[#allocation2 + $0x12] sm:$0x1 pattern:$0x75316420]  ;;  %v3845_v27 = vrot.slane %v8814_v47, %v10712_v61  ;;  %v3883_v52 = vsel %vm3882_vm10, %v3881_v49, %v3880_v40  ;;  %v4112_v31 = vsel %vm3876_vm8, %v4111_v58, %v4110_v32  ;;  %v4332_v4 = vunpack.c.l.b16 %v4245_v56 }
 0x203   : > { %v3859_v51 = vrot.slane %v8815_v11, %v10712_v61  ;;  %v3884_v54 = vrot.slane %v10797_v23, 2  ;;  %v4114_v5 = vsel %vm3879_vm9, %v4113_v62, %v4112_v31  ;;  %v4117_v6 = vrot.slane %v10797_v23, 3  ;;  %v8856_v25 = vld.sshfl [vmem:[#allocation2 + $0x5] sm:$0x1 pattern:$0x75316420] }
 0x204   : > { %v10804_v53 = vunpack.c.l.b16 %v3845_v27  ;;  %v4341_v10 = vrot.slane %v4332_v4, 6  ;;  %v4116_v39 = vsel %vm3882_vm10, %v4115_v8, %v4114_v5  ;;  %v4287_v12 = vrot.slane %v8836_v9, %v10712_v61  ;;  %v8839_v15 = vld.sshfl [vmem:[#allocation2 + $0x13] sm:$0x1 pattern:$0x75316420] }
 0x205   : > { %v3886_v57 = vsel %vm3885_vm11, %v3884_v54, %v3883_v52  ;;  %v10812_v59 = vunpack.c.l.b16 %v3859_v51  ;;  %v4118_v34 = vsel %vm3885_vm11, %v4117_v6, %v4116_v39  ;;  %v4571_v17 = vrot.slane %v4332_v4, 7  ;;  %v8857_v38 = vld.sshfl [vmem:[#allocation2 + $0x6] sm:$0x1 pattern:$0x75316420] }
 0x206   : > { %v3887_v44 = vrot.slane %v10804_v53, 1  ;;  %v4119_v19 = vrot.slane %v10804_v53, 2  ;;  %v4342_v14 = vsel %vm3873_vm7, %v4341_v10, %v4340_v0  ;;  %v4570_v18 = vsel %vm3870_vm6, %v10776_v63, %v4569_v41  ;;  %v9979_v63 = vld [vmem:[%s11534_s3 + $0x28] sm:$0xff]  }
 0x207   : > { %v4121_v13 = vrot.slane %v10812_v59, 1  ;;  %v10847_v21 = vunpack.c.l.b16 %v4287_v12  ;;  %v4344_v22 = vsel %vm3876_vm8, %v4113_v62, %v4342_v14  ;;  %v4572_v33 = vsel %vm3873_vm7, %v4571_v17, %v4570_v18  ;;  %v8855_v49 = vld.sshfl [vmem:[#allocation2 + $0x4] sm:$0x1 pattern:$0x75316420] }
 0x208   : > { %v3889_v60 = vsel %vm3888_vm12, %v3887_v44, %v3886_v57  ;;  %v4120_v16 = vsel %vm3888_vm12, %v4119_v19, %v4118_v34  ;;  %v4346_v35 = vsel %vm3879_vm9, %v4115_v8, %v4344_v22  ;;  %v4573_v36 = vrot.slane %v10782_v29, 6  ;;  %v8858_v40 = vld.sshfl [vmem:[#allocation2 + $0xc] sm:$0x1 pattern:$0x75316420] }
 0x209   : > { %v3890_v3 = vpack.c.b16 %v10812_v59, %v3889_v60  ;;  %v4122_v24 = vpack.c.b16 %v4121_v13, %v4120_v16  ;;  %v4347_v37 = vrot.slane %v10847_v21, 3  ;;  %v4693_v26 = vrot.slane %v8856_v25, %v10712_v61  ;;  %v8859_v52 = vld.sshfl [vmem:[#allocation2 + $0xd] sm:$0x1 pattern:$0x75316420] }
 0x20a   : > { %v4574_v42 = vsel %vm3876_vm8, %v4573_v36, %v4572_v33  ;;  %v4329_v1 = vrot.slane %v8839_v15, %v10712_v61  ;;  %v4575_v47 = vrot.slane %v10784_v30, 5  ;;  %v4707_v50 = vrot.slane %v8857_v38, %v10712_v61  ;;  %v8860_v56 = vld.sshfl [vmem:[#allocation2 + $0xe] sm:$0x1 pattern:$0x75316420] }
 0x20b   : > { %9416 = vmatmul.mubr.msk.bf16.vlgmr.msra.gmra.mrb[4].mxu1 %vm3903_vm13, %v3890_v3  ;;  %v4348_v43 = vsel %vm3882_vm10, %v4347_v37, %v4346_v35  ;;  %v4579_v27 = vrot.slane %v10804_v53, 3  ;;  %v10870_v45 = vunpack.c.l.b16 %v4693_v26  ;;  %v4577_v51 = vrot.slane %v10847_v21, 4  ;;  %v8861_v60 = vld.sshfl [vmem:[#allocation2 + $0x14] sm:$0x1 pattern:$0x75316420] }
 0x20c   : > { %9420 = vmatpush3.bf16.msra.mxu1 %v9976_v2  ;;  %9423 = vmatprep.mubr.msk.bf16.mxu1 %vm10055_vm4, %v10054_v46  ;;  %v4350_v48 = vsel %vm3885_vm11, %v4119_v19, %v4348_v43  ;;  %v4576_v11 = vsel %vm3879_vm9, %v4575_v47, %v4574_v42  ;;  %v10874_v54 = vunpack.c.l.b16 %v4329_v1  ;;  %v4679_v57 = vrot.slane %v8855_v49, %v10712_v61  ;;  %v9980_v3 = vld [vmem:[%s11534_s3 + $0x30] sm:$0xff]   ;;  %v8928_v37 = vld.sshfl [vmem:[#allocation2 + $0xa] sm:$0x1 pattern:$0x75316420] }
 0x20d   : > { %9421 = vmatprep.subr.bf16.mxu1 %v10054_v46  ;;  %v4352_v32 = vsel %vm3888_vm12, %v4121_v13, %v4350_v48  ;;  %v4578_v44 = vsel %vm3882_vm10, %v4577_v51, %v4576_v11  ;;  %v4581_v58 = vrot.slane %v10812_v59, 2  ;;  %v4721_v2 = vrot.slane %v8858_v40, %v10712_v61  ;;  %v8862_v4 = vld.sshfl [vmem:[#allocation2 + $0x15] sm:$0x1 pattern:$0x75316420]  ;;  %v9981_v13 = vld [vmem:[%s11534_s3 + $0x38] sm:$0xff]  }
 0x20e   : > { %v10881_v31 = vunpack.c.l.b16 %v4707_v50  ;;  %v4580_v62 = vsel %vm3885_vm11, %v4579_v27, %v4578_v44  ;;  %v4735_v5 = vrot.slane %v8859_v52, %v10712_v61  ;;  %v4801_v6 = vrot.slane %v10870_v45, 7  ;;  %v10890_v8 = vld.sshfl [vmem:[#allocation2 + $0x16] sm:$0x1 pattern:$0x75316420] }
 0x20f   : > { %v4749_v9 = vrot.slane %v8860_v56, %v10712_v61  ;;  %v4583_v10 = vrot.slane %v10874_v54, 1  ;;  %v4763_v39 = vrot.slane %v8861_v60, %v10712_v61  ;;  %v4792_v19 = vunpack.c.l.b16 %v4679_v57  ;;  %v8930_v43 = vld.sshfl [vmem:[#allocation2 + $0x11] sm:$0x1 pattern:$0x75316420] }
 0x210   : > { %9422 = vmatpush3.bf16.msra.mxu1 %v9977_v7  ;;  %v4353_v7 = vpack.c.b16 %v10874_v54, %v4352_v32  ;;  %v4582_v0 = vsel %vm3888_vm12, %v4581_v58, %v4580_v62  ;;  %v10897_v34 = vunpack.c.l.b16 %v4721_v2  ;;  %v4803_v41 = vrot.slane %v10881_v31, 6  ;;  %v8931_v51 = vld.sshfl [vmem:[#allocation2 + $0x12] sm:$0x1 pattern:$0x75316420] }
 0x211   : > { %9427 = vmatprep.subr.bf16.mxu1 %v10054_v46  ;;  %v5725_v12 = vrot.slane %v10782_v29, 7  ;;  %v4777_v14 = vrot.slane %v8862_v4, %v10712_v61  ;;  %v4791_v16 = vrot.slane %v10890_v8, %v10712_v61  ;;  %v10909_v17 = vunpack.c.l.b16 %v4735_v5 }
 0x212   : > { %v4802_v18 = vsel %vm3870_vm6, %v4801_v6, %v4792_v19  ;;  %v5729_v25 = vrot.slane %v10797_v23, 5  ;;  %v4584_v33 = vpack.c.b16 %v4583_v10, %v4582_v0  ;;  %v10919_v15 = vunpack.c.l.b16 %v4763_v39 }
 0x213   : > { %v5726_v22 = vsel %vm3870_vm6, %v5725_v12, %v10778_v28  ;;  %v5731_v35 = vrot.slane %v10804_v53, 4  ;;  %v5733_v36 = vrot.slane %v10812_v59, 3  ;;  %v4804_v38 = vsel %vm3873_vm7, %v4803_v41, %v4802_v18 }
 0x214   : > { %v4805_v26 = vrot.slane %v10897_v34, 5  ;;  %v5955_v1 = vrot.slane %v10778_v28, 1  ;;  %v5957_v48 = vrot.slane %v10784_v30, 7  ;;  %v5959_v49 = vrot.slane %v10797_v23, 6 }
 0x215   : > { %v5961_v50 = vrot.slane %v10804_v53, 5  ;;  %v5031_v11 = vrot.slane %v4792_v19, 1  ;;  %v5963_v28 = vrot.slane %v10812_v59, 4  ;;  %v10936_v52 = vunpack.c.l.b16 %v4777_v14  ;;  %v9982_v59 = vld [vmem:[%s11534_s3 + $0x40] sm:$0xff]  }
 0x216   : > { %v5956_v40 = vsel %vm3870_vm6, %v10782_v29, %v5955_v1  ;;  %v4806_v32 = vsel %vm3876_vm8, %v4805_v26, %v4804_v38  ;;  %v4807_v53 = vrot.slane %v10909_v17, 4  ;;  %v6079_v29 = vrot.slane %v8928_v37, %v10712_v61 }
 0x217   : > { %9424 = vmatmul.mubr.msk.bf16.vlgmr.msra.gmra.mrb[4].mxu1 %vm3903_vm13, %v4122_v24  ;;  %v5727_v24 = vrot.slane %v10784_v30, 6  ;;  %v5958_v23 = vsel %vm3873_vm7, %v5957_v48, %v5956_v40  ;;  %v5033_v44 = vrot.slane %v10881_v31, 7  ;;  %v6107_v60 = vrot.slane %v8930_v43, %v10712_v61 }
 0x218   : > { %9428 = vmatpush3.bf16.msra.mxu1 %v9978_v20  ;;  %9431 = vmatprep.mubr.msk.bf16.mxu1 %vm10055_vm4, %v10054_v46  ;;  %v10913_v20 = vunpack.c.l.b16 %v4749_v9  ;;  %v5960_v56 = vsel %vm3876_vm8, %v5959_v49, %v5958_v23  ;;  %v6121_v2 = vrot.slane %v8931_v51, %v10712_v61  ;;  %v5032_v62 = vsel %vm3870_vm6, %v10870_v45, %v5031_v11 }
 0x219   : > { %9429 = vmatprep.subr.bf16.mxu1 %v10054_v46  ;;  %v5728_v42 = vsel %vm3873_vm7, %v5727_v24, %v5726_v22  ;;  %v5962_v58 = vsel %vm3879_vm9, %v5961_v50, %v5960_v56  ;;  %v6179_v9 = vunpack.c.l.b16 %v6079_v29  ;;  %v6181_v10 = vunpack.c.l.b16 %v6107_v60  ;;  %v8887_v56 = vld.sshfl [vmem:[#allocation2 + $0x17] sm:$0x1 pattern:$0x75316420] }
 0x21a   : > { %v5730_v47 = vsel %vm3876_vm8, %v5729_v25, %v5728_v42  ;;  %v10958_v4 = vsel %vm3882_vm10, %v5963_v28, %v5962_v58  ;;  %v4809_v6 = vrot.slane %v10913_v20, 3  ;;  %v6182_v39 = vunpack.c.l.b16 %v6121_v2 }
 0x21b   : > { %v5732_v27 = vsel %vm3879_vm9, %v5731_v35, %v5730_v47  ;;  %v4811_v19 = vrot.slane %v10919_v15, 2  ;;  %v4813_v0 = vrot.slane %v10936_v52, 1  ;;  %v5035_v41 = vrot.slane %v10897_v34, 6 }
 0x21c   : > { %9430 = vmatpush3.bf16.msra.mxu1 %v9979_v63  ;;  %v8927_v63 = vld.sshfl [vmem:[#allocation2 + $0x9] sm:$0x1 pattern:$0x75316420]  ;;  %v10940_v30 = vsel %vm3882_vm10, %v5733_v36, %v5732_v27  ;;  %v6189_v12 = vrot.slane %v10847_v21, 6  ;;  %v5034_v18 = vsel %vm3873_vm7, %v5033_v44, %v5032_v62  ;;  %v6187_v22 = vrot.slane %v6179_v9, 7 }
 0x21d   : > { %9435 = vmatprep.subr.bf16.mxu1 %v10054_v46  ;;  %v6065_v57 = vrot.slane %v8927_v63, %v10712_v61  ;;  %v6191_v24 = vrot.slane %v6181_v10, 5  ;;  %v6419_v36 = vrot.slane %v10847_v21, 7  ;;  %v6195_v37 = vrot.slane %v10874_v54, 3 }
 0x21e   : > { %v6421_v38 = vrot.slane %v6181_v10, 6  ;;  %v6423_v26 = vrot.slane %v6182_v39, 5  ;;  %v6425_v47 = vrot.slane %v10874_v54, 4  ;;  %v10987_v48 = vunpack.c.l.b16 %v4791_v16 }
 0x21f   : > { %v6178_v5 = vunpack.c.l.b16 %v6065_v57  ;;  %v5036_v21 = vsel %vm3876_vm8, %v5035_v41, %v5034_v18  ;;  %v5037_v11 = vrot.slane %v10909_v17, 5  ;;  %v5039_v27 = vrot.slane %v10913_v20, 4  ;;  %v8884_v16 = vld.sshfl [vmem:[#allocation2 + $0xf] sm:$0x1 pattern:$0x75316420] }
 0x220   : > { %v5043_v58 = vrot.slane %v10936_v52, 2  ;;  %v6651_v2 = vrot.slane %v10913_v20, 6  ;;  %v5211_v62 = vrot.slane %v8884_v16, %v10712_v61  ;;  %v5253_v10 = vrot.slane %v8887_v56, %v10712_v61  ;;  %v9985_v41 = vld [vmem:[%s11534_s3 + $0x58] sm:$0xff]  }
 0x221   : > { %v6417_v35 = vrot.slane %v6178_v5, 1  ;;  %v6188_v63 = vsel %vm3870_vm6, %v6187_v22, %v6178_v5  ;;  %v5038_v23 = vsel %vm3879_vm9, %v5037_v11, %v5036_v21  ;;  %v6653_v5 = vrot.slane %v10919_v15, 5 }
 0x222   : > { %v6190_v1 = vsel %vm3873_vm7, %v6189_v12, %v6188_v63  ;;  %v6881_v18 = vrot.slane %v10913_v20, 7  ;;  %v5264_v22 = vsel %vm3870_vm6, %v5033_v44, %v10870_v45  ;;  %v8979_v44 = vld.sshfl [vmem:[#allocation2 + $0x16] sm:$0x1 pattern:$0x75316420] }
 0x223   : > { %9432 = vmatmul.mubr.msk.bf16.vlgmr.msra.gmra.mrb[4].mxu1 %vm3903_vm13, %v4353_v7  ;;  %v8881_v7 = vld.sshfl [vmem:[#allocation2 + $0x7] sm:$0x1 pattern:$0x75316420]  ;;  %v6418_v43 = vsel %vm3870_vm6, %v6179_v9, %v6417_v35  ;;  %v6192_v49 = vsel %vm3876_vm8, %v6191_v24, %v6190_v1  ;;  %v5040_v9 = vsel %vm3882_vm10, %v5039_v27, %v5038_v23  ;;  %v11059_v1 = vunpack.c.l.b16 %v5253_v10 }
 0x224   : > { %9436 = vmatpush3.bf16.msra.mxu1 %v9980_v3  ;;  %9439 = vmatprep.mubr.msk.bf16.mxu1 %vm10055_vm4, %v10054_v46  ;;  %v4808_v3 = vsel %vm3879_vm9, %v4807_v53, %v4806_v32  ;;  %v5169_v25 = vrot.slane %v8881_v7, %v10712_v61  ;;  %v6420_v50 = vsel %vm3873_vm7, %v6419_v36, %v6418_v43  ;;  %v6649_v32 = vrot.slane %v10909_v17, 7  ;;  %v8975_v7 = vld.sshfl [vmem:[#allocation2 + $0xd] sm:$0x1 pattern:$0x75316420] }
 0x225   : > { %9437 = vmatprep.subr.bf16.mxu1 %v10054_v46  ;;  %v4810_v14 = vsel %vm3882_vm10, %v4809_v6, %v4808_v3  ;;  %v6422_v40 = vsel %vm3876_vm8, %v6421_v38, %v6420_v50  ;;  %v5041_v53 = vrot.slane %v10919_v15, 3  ;;  %v6655_v6 = vrot.slane %v10936_v52, 4  ;;  %v8978_v35 = vld.sshfl [vmem:[#allocation2 + $0x15] sm:$0x1 pattern:$0x75316420] }
 0x226   : > { %v4812_v42 = vsel %vm3885_vm11, %v4811_v19, %v4810_v14  ;;  %v6424_v51 = vsel %vm3879_vm9, %v6423_v26, %v6422_v40  ;;  %v11007_v57 = vunpack.c.l.b16 %v5169_v25  ;;  %v6650_v60 = vsel %vm3870_vm6, %v6649_v32, %v10897_v34 }
 0x227   : > { %v4814_v8 = vsel %vm3888_vm12, %v4813_v0, %v4812_v42  ;;  %v11010_v29 = vsel %vm3882_vm10, %v6425_v47, %v6424_v51  ;;  %v6657_v19 = vrot.slane %v10987_v48, 3  ;;  %v8976_v0 = vld.sshfl [vmem:[#allocation2 + $0xe] sm:$0x1 pattern:$0x75316420]  ;;  %v6879_v14 = vrot.slane %v10897_v34, 1 }
 0x228   : > { %9438 = vmatpush3.bf16.msra.mxu1 %v9981_v13  ;;  %v9983_v13 = vld [vmem:[%s11534_s3 + $0x48] sm:$0xff]   ;;  %v4815_v3 = vpack.c.b16 %v10987_v48, %v4814_v8  ;;  %v5265_v12 = vrot.slane %v11007_v57, 6  ;;  %v6883_v25 = vrot.slane %v10919_v15, 6  ;;  %v5042_v34 = vsel %vm3885_vm11, %v5041_v53, %v5040_v9 }
 0x229   : > { %9443 = vmatprep.subr.bf16.mxu1 %v10054_v46  ;;  %v6880_v63 = vsel %vm3870_vm6, %v10909_v17, %v6879_v14  ;;  %v5045_v38 = vrot.slane %v10987_v48, 1  ;;  %v11055_v26 = vunpack.c.l.b16 %v5211_v62  ;;  %v6989_v42 = vrot.slane %v8975_v7, %v10712_v61 }
 0x22a   : > { %v6882_v15 = vsel %vm3873_vm7, %v6881_v18, %v6880_v63  ;;  %v7003_v47 = vrot.slane %v8976_v0, %v10712_v61  ;;  %v7031_v21 = vrot.slane %v8978_v35, %v10712_v61  ;;  %v5266_v50 = vsel %vm3873_vm7, %v5265_v12, %v5264_v22 }
 0x22b   : > { %v6884_v43 = vsel %vm3876_vm8, %v6883_v25, %v6882_v15  ;;  %v7045_v40 = vrot.slane %v8979_v44, %v10712_v61  ;;  %v7102_v16 = vunpack.c.l.b16 %v6989_v42  ;;  %v7113_v53 = vrot.slane %v11055_v26, 6 }
 0x22c   : > { %v7103_v51 = vunpack.c.l.b16 %v7003_v47  ;;  %v7105_v32 = vunpack.c.l.b16 %v7031_v21  ;;  %v7343_v9 = vrot.slane %v11055_v26, 7  ;;  %v5271_v14 = vrot.slane %v11055_v26, 3 }
 0x22d   : > { %v7106_v23 = vunpack.c.l.b16 %v7045_v40  ;;  %v7341_v7 = vrot.slane %v7102_v16, 1  ;;  %v5495_v22 = vrot.slane %v11007_v57, 7  ;;  %v5497_v15 = vrot.slane %v10909_v17, 6  ;;  %v9989_v17 = vld [vmem:[%s11534_s3 + $0x78] sm:$0xff]  }
 0x22e   : > { %v7345_v10 = vrot.slane %v7105_v32, 6  ;;  %v5503_v21 = vrot.slane %v10936_v52, 3  ;;  %v8910_v40 = vld.sshfl [vmem:[#allocation2 + $0x19] sm:$0x1 pattern:$0x75316420] }
 0x22f   : > { %9440 = vmatmul.mubr.msk.bf16.vlgmr.msra.gmra.mrb[4].mxu1 %vm3903_vm13, %v4584_v33  ;;  %v6193_v33 = vrot.slane %v6182_v39, 4  ;;  %v6652_v39 = vsel %vm3873_vm7, %v6651_v2, %v6650_v60  ;;  %v7115_v60 = vrot.slane %v7105_v32, 5  ;;  %v9986_v2 = vld [vmem:[%s11534_s3 + $0x60] sm:$0xff]   ;;  %v7117_v62 = vrot.slane %v7106_v23, 4 }
 0x230   : > { %9444 = vmatpush3.bf16.msra.mxu1 %v9982_v59  ;;  %9447 = vmatprep.mubr.msk.bf16.mxu1 %vm10055_vm4, %v10054_v46  ;;  %v9984_v59 = vld [vmem:[%s11534_s3 + $0x50] sm:$0xff]   ;;  %v7347_v0 = vrot.slane %v7106_v23, 5  ;;  %v7342_v12 = vsel %vm3870_vm6, %v7103_v51, %v7341_v7  ;;  %v5701_v32 = vrot.slane %v8910_v40, %v10712_v61 }
 0x231   : > { %9445 = vmatprep.subr.bf16.mxu1 %v10054_v46  ;;  %v6194_v54 = vsel %vm3879_vm9, %v6193_v33, %v6192_v49  ;;  %v6885_v33 = vrot.slane %v10936_v52, 5  ;;  %v5044_v49 = vsel %vm3888_vm12, %v5043_v58, %v5042_v34  ;;  %v5507_v52 = vrot.slane %v11059_v1, 1 }
 0x232   : > { %v10999_v28 = vsel %vm3882_vm10, %v6195_v37, %v6194_v54  ;;  %v6887_v37 = vrot.slane %v10987_v48, 4  ;;  %v5046_v56 = vpack.c.b16 %v5045_v38, %v5044_v49  ;;  %v5505_v49 = vrot.slane %v10987_v48, 2 }
 0x233   : > { %v6886_v54 = vsel %vm3879_vm9, %v6885_v33, %v6884_v43  ;;  %v5499_v43 = vrot.slane %v10913_v20, 5 }
 0x234   : > { %9446 = vmatpush3.bf16.msra.mxu1 %v9983_v13  ;;  %v6654_v13 = vsel %vm3876_vm8, %v6653_v5, %v6652_v39  ;;  %v11072_v8 = vsel %vm3882_vm10, %v6887_v37, %v6886_v54  ;;  %v7119_v5 = vrot.slane %v11059_v1, 3  ;;  %v5493_v39 = vrot.slane %v10870_v45, 1  ;;  %v9987_v45 = vld [vmem:[%s11534_s3 + $0x68] sm:$0xff]  }
 0x235   : > { %9451 = vmatprep.subr.bf16.mxu1 %v10054_v46  ;;  %v6656_v24 = vsel %vm3879_vm9, %v6655_v6, %v6654_v13  ;;  %v7349_v13 = vrot.slane %v11059_v1, 4 }
 0x236   : > { %v11049_v36 = vsel %vm3882_vm10, %v6657_v19, %v6656_v24  ;;  %v5494_v35 = vsel %vm3870_vm6, %v10881_v31, %v5493_v39  ;;  %v9988_v31 = vld [vmem:[%s11534_s3 + $0x70] sm:$0xff]  }
 0x237   : > { %v5496_v57 = vsel %vm3873_vm7, %v5495_v22, %v5494_v35 }
 0x238   : > { %v5498_v42 = vsel %vm3876_vm8, %v5497_v15, %v5496_v57 }
 0x239   : > { %v5500_v47 = vsel %vm3879_vm9, %v5499_v43, %v5498_v42 }
 0x23b   : > { %9448 = vmatmul.mubr.msk.bf16.vlgmr.msra.gmra.mrb[4].mxu1 %vm3903_vm13, %v4815_v3  ;;  %v5268_v3 = vsel %vm3876_vm8, %v5037_v11, %v5266_v50  ;;  %v8909_v50 = vld.sshfl [vmem:[#allocation2 + $0x18] sm:$0x1 pattern:$0x75316420] }
 0x23c   : > { %9452 = vmatpush3.bf16.msra.mxu1 %v9984_v59  ;;  %9455 = vmatprep.mubr.msk.bf16.mxu1 %vm10055_vm4, %v10054_v46  ;;  %v7111_v59 = vrot.slane %v7103_v51, 7  ;;  %v5270_v11 = vsel %vm3879_vm9, %v5039_v27, %v5268_v3  ;;  %v7344_v27 = vsel %vm3873_vm7, %v7343_v9, %v7342_v12  ;;  %v9993_v9 = vld [vmem:[%s11534_s3 + $0x98] sm:$0xff]   ;;  %v9995_v12 = vld [vmem:[%s11534_s3 + $0xa8] sm:$0xff]  }
 0x23d   : > { %9453 = vmatprep.subr.bf16.mxu1 %v10054_v46  ;;  %v7346_v25 = vsel %vm3876_vm8, %v7345_v10, %v7344_v27  ;;  %v5272_v33 = vsel %vm3882_vm10, %v5271_v14, %v5270_v11  ;;  %v9994_v11 = vld [vmem:[%s11534_s3 + $0xa0] sm:$0xff]   ;;  %v9996_v27 = vld [vmem:[%s11534_s3 + $0xb0] sm:$0xff]  }
 0x23e   : > { %v7112_v6 = vsel %vm3870_vm6, %v7111_v59, %v7102_v16  ;;  %v7348_v34 = vsel %vm3879_vm9, %v7347_v0, %v7346_v25  ;;  %v5274_v63 = vsel %vm3885_vm11, %v5043_v58, %v5272_v33  ;;  %v5687_v16 = vrot.slane %v8909_v50, %v10712_v61  ;;  %v9997_v25 = vld [vmem:[%s11534_s3 + $0xb8] sm:$0xff]  }
 0x23f   : > { %v7114_v19 = vsel %vm3873_vm7, %v7113_v53, %v7112_v6  ;;  %v11115_v37 = vsel %vm3882_vm10, %v7349_v13, %v7348_v34  ;;  %v5276_v44 = vsel %vm3888_vm12, %v5045_v38, %v5274_v63  ;;  %v5501_v38 = vrot.slane %v11055_v26, 4  ;;  %v9990_v26 = vld [vmem:[%s11534_s3 + $0x80] sm:$0xff]   ;;  %v8911_v53 = vld.sshfl [vmem:[#allocation2 + $0x1a] sm:$0x1 pattern:$0x75316420] }
 0x240   : > { %9454 = vmatpush3.bf16.msra.mxu1 %v9985_v41  ;;  %v7116_v41 = vsel %vm3876_vm8, %v7115_v60, %v7114_v19  ;;  %v5277_v58 = vpack.c.b16 %v11059_v1, %v5276_v44  ;;  %v5722_v23 = vunpack.c.l.b16 %v5687_v16  ;;  %v9991_v1 = vld [vmem:[%s11534_s3 + $0x88] sm:$0xff]   ;;  %v5715_v60 = vrot.slane %v8911_v53, %v10712_v61  ;;  %v9992_v6 = vld [vmem:[%s11534_s3 + $0x90] sm:$0xff]   ;;  %v8957_v33 = vld.sshfl [vmem:[#allocation2 + $0x1c] sm:$0x1 pattern:$0x75316420] }
 0x241   : > { %9459 = vmatprep.subr.bf16.mxu1 %v10054_v46  ;;  %v7118_v18 = vsel %vm3879_vm9, %v7117_v62, %v7116_v41  ;;  %v5502_v20 = vsel %vm3882_vm10, %v5501_v38, %v5500_v47  ;;  %v8958_v63 = vld.sshfl [vmem:[#allocation2 + $0x1d] sm:$0x1 pattern:$0x75316420]  ;;  %v6611_v57 = vrot.slane %v8957_v33, %v10712_v61  ;;  %v10003_v53 = vld [vmem:[%s11534_s3 + $0xe8] sm:$0xff]  }
 0x242   : > { %v11104_v24 = vsel %vm3882_vm10, %v7119_v5, %v7118_v18  ;;  %v5504_v54 = vsel %vm3885_vm11, %v5503_v21, %v5502_v20  ;;  %v5735_v59 = vrot.slane %v5722_v23, 2  ;;  %v5724_v5 = vunpack.c.l.b16 %v5715_v60  ;;  %v8959_v47 = vld.sshfl [vmem:[#allocation2 + $0x1e] sm:$0x1 pattern:$0x75316420] }
 0x243   : > { %v5506_v51 = vsel %vm3888_vm12, %v5505_v49, %v5504_v54  ;;  %v6625_v42 = vrot.slane %v8958_v63, %v10712_v61  ;;  %v6646_v43 = vunpack.c.l.b16 %v6611_v57  ;;  %v6639_v38 = vrot.slane %v8959_v47, %v10712_v61  ;;  %v10001_v16 = vld [vmem:[%s11534_s3 + $0xd8] sm:$0xff]  }
 0x244   : > { %v5508_v48 = vpack.c.b16 %v5507_v52, %v5506_v51  ;;  %v5969_v0 = vrot.slane %v5724_v5, 1  ;;  %v6429_v34 = vrot.slane %v5724_v5, 2  ;;  %v10000_v52 = vld [vmem:[%s11534_s3 + $0xd0] sm:$0xff]  }
 0x245   : > { %v6647_v21 = vunpack.c.l.b16 %v6625_v42  ;;  %v6648_v54 = vunpack.c.l.b16 %v6639_v38 }
 0x247   : > { %9456 = vmatmul.mubr.msk.bf16.vlgmr.msra.gmra.mrb[4].mxu1 %vm3903_vm13, %v5046_v56  ;;  %v5723_v56 = vunpack.c.l.b16 %v5701_v32  ;;  %v6661_v49 = vrot.slane %v6647_v21, 1 }
 0x248   : > { %9460 = vmatpush3.bf16.msra.mxu1 %v9986_v2  ;;  %9463 = vmatprep.mubr.msk.bf16.mxu1 %vm10055_vm4, %v10054_v46  ;;  %v5736_v2 = vsel %vm3885_vm11, %v5735_v59, %v10940_v30  ;;  %v5965_v30 = vrot.slane %v5722_v23, 3  ;;  %v10002_v23 = vld [vmem:[%s11534_s3 + $0xe0] sm:$0xff]  }
 0x249   : > { %9461 = vmatprep.subr.bf16.mxu1 %v10054_v46  ;;  %v5737_v3 = vrot.slane %v5723_v56, 1  ;;  %v5967_v39 = vrot.slane %v5723_v56, 2 }
 0x24a   : > { %v5966_v10 = vsel %vm3885_vm11, %v5965_v30, %v10958_v4  ;;  %v8935_v4 = vld.sshfl [vmem:[#allocation2 + $0x1b] sm:$0x1 pattern:$0x75316420] }
 0x24b   : > { %v5738_v62 = vsel %vm3888_vm12, %v5737_v3, %v5736_v2  ;;  %v5968_v19 = vsel %vm3888_vm12, %v5967_v39, %v5966_v10  ;;  %v6177_v13 = vrot.slane %v8935_v4, %v10712_v61  ;;  %v10004_v3 = vld [vmem:[%s11534_s3 + $0xf0] sm:$0xff]  }
 0x24c   : > { %9462 = vmatpush3.bf16.msra.mxu1 %v9987_v45  ;;  %v5739_v7 = vpack.c.b16 %v5724_v5, %v5738_v62  ;;  %v5970_v41 = vpack.c.b16 %v5969_v0, %v5968_v19  ;;  %v6198_v45 = vsel %vm3885_vm11, %v5967_v39, %v10999_v28  ;;  %v6427_v28 = vrot.slane %v5723_v56, 3  ;;  %v10005_v5 = vld [vmem:[%s11534_s3 + $0xf8] sm:$0xff]   ;;  %v10006_v39 = vld [vmem:[%s11536_s5] sm:$0xff]   ;;  %v10008_v19 = vld [vmem:[%s11536_s5 + $0x10] sm:$0xff]  }
 0x24d   : > { %9467 = vmatprep.subr.bf16.mxu1 %v10054_v46  ;;  %v6200_v14 = vsel %vm3888_vm12, %v5969_v0, %v6198_v45  ;;  %v6186_v18 = vunpack.c.l.b16 %v6177_v13  ;;  %v10009_v0 = vld [vmem:[%s11536_s5 + $0x18] sm:$0xff]  }
 0x24e   : > { %v6428_v35 = vsel %vm3885_vm11, %v6427_v28, %v11010_v29  ;;  %v9999_v29 = vld [vmem:[%s11534_s3 + $0xc8] sm:$0xff]  }
 0x24f   : > { %v6201_v22 = vpack.c.b16 %v6186_v18, %v6200_v14  ;;  %v6430_v44 = vsel %vm3888_vm12, %v6429_v34, %v6428_v35  ;;  %v6431_v15 = vrot.slane %v6186_v18, 1 }
 0x253   : > { %9464 = vmatmul.mubr.msk.bf16.vlgmr.msra.gmra.mrb[4].mxu1 %vm3903_vm13, %v5277_v58  ;;  %v6432_v58 = vpack.c.b16 %v6431_v15, %v6430_v44 }
 0x254   : > { %9468 = vmatpush3.bf16.msra.mxu1 %v9988_v31  ;;  %9471 = vmatprep.mubr.msk.bf16.mxu1 %vm10055_vm4, %v10054_v46  ;;  %v9998_v31 = vld [vmem:[%s11534_s3 + $0xc0] sm:$0xff]  }
 0x255   : > { %9469 = vmatprep.subr.bf16.mxu1 %v10054_v46 }
 0x258   : > { %9470 = vmatpush3.bf16.msra.mxu1 %v9989_v17  ;;  %v6659_v17 = vrot.slane %v6646_v43, 2 }
 0x259   : > { %9475 = vmatprep.subr.bf16.mxu1 %v10054_v46 }
 0x25a   : > { %v6660_v20 = vsel %vm3885_vm11, %v6659_v17, %v11049_v36  ;;  %v6889_v36 = vrot.slane %v6646_v43, 3 }
 0x25b   : > { %v6662_v50 = vsel %vm3888_vm12, %v6661_v49, %v6660_v20 }
 0x25c   : > { %v6663_v40 = vpack.c.b16 %v6648_v54, %v6662_v50  ;;  %v6890_v51 = vsel %vm3885_vm11, %v6889_v36, %v11072_v8  ;;  %v8983_v8 = vld.sshfl [vmem:[#allocation2 + $0x1f] sm:$0x1 pattern:$0x75316420]  ;;  %v7503_v50 = vld [vmem:[#allocation3] sm:$0x3] }
 0x25d   : > { %v7101_v56 = vrot.slane %v8983_v8, %v10712_v61  ;;  %v10042_v8 = vld [vmem:[%s11538_s7] sm:$0xff]  }
 0x25e   : > { %9648 = vmatpush3.bf16.msra.mxu0 %v10042_v8  ;;  %v8350_v8 = vld [vmem:[%s11540_s9 + $0x10] sm:$0xff] }
 0x25f   : > { %9472 = vmatmul.mubr.msk.bf16.vlgmr.msra.gmra.mrb[4].mxu1 %vm3903_vm13, %v5508_v48  ;;  %v6893_v48 = vrot.slane %v6648_v54, 1  ;;  %v7110_v2 = vunpack.c.l.b16 %v7101_v56  ;;  %v10011_v56 = vld [vmem:[%s11536_s5 + $0x28] sm:$0xff]   ;;  %9649 = vmatprep.subr.bf16.mxu0 %v10054_v46 }
 0x260   : > { %9476 = vmatpush3.bf16.msra.mxu1 %v9990_v26  ;;  %9479 = vmatprep.mubr.msk.bf16.mxu1 %vm10055_vm4, %v10054_v46  ;;  %v6891_v26 = vrot.slane %v6647_v21, 2 }
 0x261   : > { %9477 = vmatprep.subr.bf16.mxu1 %v10054_v46  ;;  %v7355_v30 = vrot.slane %v7110_v2, 1 }
 0x262   : > { %v6892_v32 = vsel %vm3888_vm12, %v6891_v26, %v6890_v51  ;;  %v7122_v59 = vsel %vm3885_vm11, %v6891_v26, %v11104_v24  ;;  %v7351_v24 = vrot.slane %v6647_v21, 3 }
 0x263   : > { %v7124_v60 = vsel %vm3888_vm12, %v6893_v48, %v7122_v59 }
 0x264   : > { %9478 = vmatpush3.bf16.msra.mxu1 %v9991_v1  ;;  %v6894_v1 = vpack.c.b16 %v6893_v48, %v6892_v32  ;;  %v7125_v62 = vpack.c.b16 %v7110_v2, %v7124_v60  ;;  %v10010_v48 = vld [vmem:[%s11536_s5 + $0x20] sm:$0xff]   ;;  %v10043_v60 = vld [vmem:[%s11538_s7 + $0x8] sm:$0xff]   ;;  %v10012_v2 = vld [vmem:[%s11536_s5 + $0x30] sm:$0xff]  }
 0x265   : > { %9483 = vmatprep.subr.bf16.mxu1 %v10054_v46  ;;  %9650 = vmatpush3.bf16.msra.mxu0 %v10043_v60  ;;  %v8352_v60 = vld [vmem:[%s11540_s9 + $0x20] sm:$0xff] }
 0x266   : > { %9651 = vmatprep.subr.bf16.mxu0 %v10054_v46 }
 0x26b   : > { %9480 = vmatmul.mubr.msk.bf16.vlgmr.msra.gmra.mrb[4].mxu1 %vm3903_vm13, %v5739_v7  ;;  %v7353_v7 = vrot.slane %v6648_v54, 2  ;;  %v7509_v54 = vld [vmem:[#allocation3 + $0x4] sm:$0x3] }
 0x26c   : > { %9484 = vmatpush3.bf16.msra.mxu1 %v9992_v6  ;;  %9487 = vmatprep.mubr.msk.bf16.mxu1 %vm10055_vm4, %v10054_v46  ;;  %v7352_v6 = vsel %vm3885_vm11, %v7351_v24, %v11115_v37  ;;  %v10007_v37 = vld [vmem:[%s11536_s5 + $0x8] sm:$0xff]  }
 0x26d   : > { %9485 = vmatprep.subr.bf16.mxu1 %v10054_v46 }
 0x270   : > { %9486 = vmatpush3.bf16.msra.mxu1 %v9993_v9  ;;  %v7354_v9 = vsel %vm3888_vm12, %v7353_v7, %v7352_v6  ;;  %v10015_v7 = vld [vmem:[%s11536_s5 + $0x48] sm:$0xff]  }
 0x271   : > { %9491 = vmatprep.subr.bf16.mxu1 %v10054_v46  ;;  %v7356_v10 = vpack.c.b16 %v7355_v30, %v7354_v9  ;;  %v10016_v9 = vld [vmem:[%s11536_s5 + $0x50] sm:$0xff]   ;;  %v10017_v30 = vld [vmem:[%s11536_s5 + $0x58] sm:$0xff]  }
 0x277   : > { %9488 = vmatmul.mubr.msk.bf16.vlgmr.msra.gmra.mrb[4].mxu1 %vm3903_vm13, %v5970_v41 }
 0x278   : > { %9492 = vmatpush3.bf16.msra.mxu1 %v9994_v11  ;;  %9495 = vmatprep.mubr.msk.bf16.mxu1 %vm10055_vm4, %v10054_v46  ;;  %v8806_v11 = vld [vmem:[%s11535_s4] ss:$0 sm:$0xff] }
 0x279   : > { %9493 = vmatprep.subr.bf16.mxu1 %v10054_v46 }
 0x27c   : > { %9494 = vmatpush3.bf16.msra.mxu1 %v9995_v12 }
 0x27d   : > { %9499 = vmatprep.subr.bf16.mxu1 %v10054_v46 }
 0x283   : > { %9496 = vmatmul.mubr.msk.bf16.vlgmr.msra.gmra.mrb[4].mxu1 %vm3903_vm13, %v6201_v22  ;;  %v10057_v22 = vmov 1935823168  }
 0x284   : > { %9500 = vmatpush3.bf16.msra.mxu1 %v9996_v27  ;;  %9503 = vmatprep.mubr.msk.bf16.mxu1 %vm10055_vm4, %v10054_v46 }
 0x285   : > { %9501 = vmatprep.subr.bf16.mxu1 %v10054_v46 }
 0x288   : > { %9502 = vmatpush3.bf16.msra.mxu1 %v9997_v25  ;;  %v7475_v25 = vunpack.c.l.s4 %v10057_v22  ;;  %v10027_v22 = vld [vmem:[%s11536_s5 + $0xa8] sm:$0xff]  }
 0x289   : > { %9507 = vmatprep.subr.bf16.mxu1 %v10054_v46 }
 0x28a   : > { %v7476_v63 = vunpack.c.0.s8 %v7475_v25  ;;  %v10028_v25 = vld [vmem:[%s11536_s5 + $0xb0] sm:$0xff]  }
 0x28f   : > { %9504 = vmatmul.mubr.msk.bf16.vlgmr.msra.gmra.mrb[4].mxu1 %vm3903_vm13, %v6432_v58  ;;  %v7479_v58 = vsub.s32 %v7476_v63, %v10709_v55  ;;  %v10031_v63 = vld [vmem:[%s11536_s5 + $0xc8] sm:$0xff]  }
 0x290   : > { %9508 = vmatpush3.bf16.msra.mxu1 %v9998_v31  ;;  %9511 = vmatprep.mubr.msk.bf16.mxu1 %vm10055_vm4, %v10054_v46 }
 0x291   : > { %9509 = vmatprep.subr.bf16.mxu1 %v10054_v46 }
 0x294   : > { %9510 = vmatpush3.bf16.msra.mxu1 %v9999_v29 }
 0x295   : > { %9515 = vmatprep.subr.bf16.mxu1 %v10054_v46 }
 0x29b   : > { %9512 = vmatmul.mubr.msk.bf16.vlgmr.msra.gmra.mrb[4].mxu1 %vm3903_vm13, %v6663_v40 }
 0x29c   : > { %9516 = vmatpush3.bf16.msra.mxu1 %v10000_v52  ;;  %9519 = vmatprep.mubr.msk.bf16.mxu1 %vm10055_vm4, %v10054_v46 }
 0x29d   : > { %9517 = vmatprep.subr.bf16.mxu1 %v10054_v46 }
 0x2a0   : > { %9518 = vmatpush3.bf16.msra.mxu1 %v10001_v16 }
 0x2a1   : > { %9523 = vmatprep.subr.bf16.mxu1 %v10054_v46 }
 0x2a7   : > { %9520 = vmatmul.mubr.msk.bf16.vlgmr.msra.gmra.mrb[4].mxu1 %vm3903_vm13, %v6894_v1 }
 0x2a8   : > { %9524 = vmatpush3.bf16.msra.mxu1 %v10002_v23  ;;  %9527 = vmatprep.mubr.msk.bf16.mxu1 %vm10055_vm4, %v10054_v46  ;;  %v10058_v23 = vmov 1983009808  }
 0x2a9   : > { %9525 = vmatprep.subr.bf16.mxu1 %v10054_v46  ;;  %v7602_v1 = vunpack.c.l.s4 %v10058_v23 }
 0x2ab   : > { %v7603_v59 = vunpack.c.0.s8 %v7602_v1 }
 0x2ac   : > { %9526 = vmatpush3.bf16.msra.mxu1 %v10003_v53 }
 0x2ad   : > { %9531 = vmatprep.subr.bf16.mxu1 %v10054_v46 }
 0x2b3   : > { %9528 = vmatmul.mubr.msk.bf16.vlgmr.msra.gmra.mrb[4].mxu1 %vm3903_vm13, %v7125_v62  ;;  %v10044_v62 = vld [vmem:[%s11538_s7 + $0x10] sm:$0xff]  }
 0x2b4   : > { %9532 = vmatpush3.bf16.msra.mxu1 %v10004_v3  ;;  %9535 = vmatprep.mubr.msk.bf16.mxu1 %vm10055_vm4, %v10054_v46  ;;  %v11312_v3 = vsub.s32 %v7603_v59, %v10709_v55  ;;  %v10014_v55 = vld [vmem:[%s11536_s5 + $0x40] sm:$0xff]  }
 0x2b5   : > { %9533 = vmatprep.subr.bf16.mxu1 %v10054_v46  ;;  %9652 = vmatpush3.bf16.msra.mxu0 %v10044_v62  ;;  %v8354_v62 = vld [vmem:[%s11540_s9 + $0x30] sm:$0xff] }
 0x2b6   : > { %9653 = vmatprep.subr.bf16.mxu0 %v10054_v46 }
 0x2b8   : > { %9534 = vmatpush3.bf16.msra.mxu1 %v10005_v5  ;;  %v10013_v5 = vld [vmem:[%s11536_s5 + $0x38] sm:$0xff]  }
 0x2b9   : > { %9539 = vmatprep.subr.bf16.mxu1 %v10054_v46 }
 0x2bf   : > { %9536 = vmatmul.mubr.msk.bf16.vlgmr.msra.gmra.mrb[4].mxu1 %vm3903_vm13, %v7356_v10 }
 0x2c0   : > { %9547 = vmatprep.mubr.msk.bf16.mxu1 %vm10055_vm4, %v10054_v46  ;;  %9540 = vmatpush3.bf16.msra.mxu1 %v10006_v39  ;;  %v10018_v39 = vld [vmem:[%s11536_s5 + $0x60] sm:$0xff]  }
 0x2c1   : > { %9541 = vmatprep.subr.bf16.mxu1 %v10054_v46 }
 0x2c4   : > { %9542 = vmatpush3.bf16.msra.mxu1 %v10007_v37 }
 0x2c5   : > { %9543 = vmatprep.subr.bf16.mxu1 %v10054_v46 }
 0x2c8   : > { %9544 = vmatpush3.bf16.msra.mxu1 %v10008_v19  ;;  %v10019_v19 = vld [vmem:[%s11536_s5 + $0x68] sm:$0xff]  }
 0x2c9   : > { %9545 = vmatprep.subr.bf16.mxu1 %v10054_v46 }
 0x2cc   : > { %9546 = vmatpush3.bf16.msra.mxu1 %v10009_v0  ;;  %v10020_v0 = vld [vmem:[%s11536_s5 + $0x70] sm:$0xff]  }
 0x2cd   : > { %9551 = vmatprep.subr.bf16.mxu1 %v10054_v46 }
 0x392   : > { %v7406_v41 = vpop.f32.mrb[4].mxu1 }
 0x393   : > { %v9732_v12 = vadd.f32 %v8806_v11, %v7406_v41  ;;  %v9537_v4 = vpop.f32.mrb[5].mxu1  ;;  %v10022_v41 = vld [vmem:[%s11536_s5 + $0x80] sm:$0xff]  }
 0x394   : > { %v7409_v13 = vpop.f32.mrb[6].mxu1  ;;  %v10023_v4 = vld [vmem:[%s11536_s5 + $0x88] sm:$0xff]  }
 0x395   : > { %v9733_v45 = vadd.f32 %v8806_v11, %v7409_v13  ;;  %v9538_v14 = vpop.f32.mrb[7].mxu1  ;;  %v7415_v18 = vmax.f32 %v9732_v12, 0.0  ;;  %v10021_v11 = vld [vmem:[%s11536_s5 + $0x78] sm:$0xff]   ;;  %v10024_v13 = vld [vmem:[%s11536_s5 + $0x90] sm:$0xff]  }
 0x397   : > { %v7416_v27 = vmax.f32 %v9733_v45, 0.0  ;;  %v10025_v45 = vld [vmem:[%s11536_s5 + $0x98] sm:$0xff]  }
 0x399   : > { %v7417_v28 = vpack.c.bf16 %v7416_v27, %v7415_v18  ;;  %v8999_v33 = vpack.c.bf16 %v7416_v27, %v7416_v27  ;;  %v10026_v18 = vld [vmem:[%s11536_s5 + $0xa0] sm:$0xff]  }
 0x39b   : > { %v7426_v35 = vrot.slane %v7417_v28, %v10712_v61  ;;  %v7433_v34 = vrot.slane %v8999_v33, %v10712_v61  ;;  %v10029_v28 = vld [vmem:[%s11536_s5 + $0xb8] sm:$0xff]  }
 0x39d   : > { %v7434_v57 = vcombine.high %v7426_v35, %v7426_v35  ;;  %v7441_v44 = vrot.slane %v7426_v35, %v10712_v61  ;;  %v7448_v15 = vrot.slane %v7433_v34, %v10712_v61  ;;  %v10030_v35 = vld [vmem:[%s11536_s5 + $0xc0] sm:$0xff]  }
 0x39f   : > { %v7455_v31 = vrot.slane %v7434_v57, %v10712_v61  ;;  %v7456_v42 = vcombine.high %v7441_v44, %v7441_v44  ;;  %v7466_v21 = vunpack.i.l.s16 %v7448_v15  ;;  %v7506_v61 = vld [vmem:[#allocation3 + $0x2] sm:$0x3]  ;;  %v10032_v57 = vld [vmem:[%s11536_s5 + $0xd0] sm:$0xff]  }
 0x3a0   : > { %v10034_v15 = vld [vmem:[%s11536_s5 + $0xe0] sm:$0xff]  }
 0x3a1   : > { %v7457_v43 = vcombine.high %v7455_v31, %v7455_v31  ;;  %v7460_v29 = vunpack.i.l.s16 %v7455_v31  ;;  %v7461_v47 = vunpack.i.h.s16 %v7455_v31  ;;  %v7463_v17 = vunpack.i.h.s16 %v7456_v42 }
 0x3a3   : > { %v9000_v38 = vpack.i.b16 %v7456_v42, %v7461_v47  ;;  %v7473_v20 = vcombine.low %v7441_v44, %v7460_v29  ;;  %v7489_v49 = vcombine.low %v7457_v43, %v7466_v21  ;;  %v10033_v44 = vld [vmem:[%s11536_s5 + $0xd8] sm:$0xff]   ;;  %v10035_v42 = vld [vmem:[%s11536_s5 + $0xe8] sm:$0xff]   ;;  %v10038_v47 = vld [vmem:[%s11536_s5 + $0x100] sm:$0xff]  }
 0x3a4   : > { %v10037_v43 = vld [vmem:[%s11536_s5 + $0xf8] sm:$0xff]  }
 0x3a5   : > { %v7480_v52 = vrot.slane %v7473_v20, %v7479_v58  ;;  %v7481_v40 = vcombine.low %v9000_v38, %v7463_v17  ;;  %v7496_v16 = vrot.slane %v7489_v49, %v7479_v58  ;;  %v10039_v17 = vld [vmem:[%s11536_s5 + $0x108] sm:$0xff]   ;;  %v10040_v38 = vld [vmem:[%s11536_s5 + $0x110] sm:$0xff]   ;;  %v10041_v20 = vld [vmem:[%s11536_s5 + $0x118] sm:$0xff]  }
 0x3a7   : > { %v7488_v36 = vrot.slane %v7481_v40, %v7479_v58  ;;  %v7504_v51 = vsel %vm7502_vm0, %v7480_v52, %v7503_v50  ;;  %v7510_v26 = vsel %vm7502_vm0, %v7496_v16, %v7509_v54  ;;  %v10036_v58 = vld [vmem:[%s11536_s5 + $0xf0] sm:$0xff]   ;;  %v10045_v54 = vld [vmem:[%s11538_s7 + $0x18] sm:$0xff]   ;;  %v10059_v52 = vmov 0.0|0.0   ;;  %v7512_v40 = vld [vmem:[%s11537_s6] sm:$0x1] }
 0x3a8   : > { %7505 = vst [vmem:[#allocation3] sm:$0x3] %v7504_v51  ;;  %7511 = vst [vmem:[#allocation3 + $0x4] sm:$0x3] %v7510_v26  ;;  %9654 = vmatpush3.bf16.msra.mxu0 %v10045_v54  ;;  %v8348_v51 = vld [vmem:[%s11540_s9] sm:$0xff]  ;;  %v8349_v26 = vld [vmem:[%s11540_s9 + $0x8] sm:$0xff] }
 0x3a9   : > { %v7507_v32 = vsel %vm7502_vm0, %v7488_v36, %v7506_v61  ;;  %9694 = vmatprep.subr.bf16.mxu0 %v10059_v52  ;;  %v9695_v1 = vpack.c.bf16 %v8349_v26, %v8348_v51 }
 0x3aa   : > { %7508 = vst [vmem:[#allocation3 + $0x2] sm:$0x3] %v7507_v32 }
 0x3af   : > { %v7514_v53 = vld [vmem:[#allocation3] sm:$0x1]  ;;  %v9011_v10 = vld.sshfl [vmem:[#allocation3] sm:$0x2 pattern:$0x76325410] }
 0x3b0   : > { %9548 = vmatmul.mubr.msk.bf16.vlgmr.msra.gmra.mrb[8].mxu1 %vm7547_vm1, %v7514_v53  ;;  %v7607_v24 = vrot.slane %v7514_v53, %v11312_v3  ;;  %v7696_v37 = vrot.slane %v9011_v10, 1  ;;  %v8017_v31 = vld [vmem:[#allocation3 + $0x4] sm:$0x1] }
 0x3b1   : > { %9552 = vmatpush3.bf16.msra.mxu1 %v10010_v48  ;;  %9559 = vmatprep.mubr.msk.bf16.mxu1 %vm10055_vm4, %v10054_v46  ;;  %v7766_v12 = vld [vmem:[#allocation3 + $0x2] sm:$0x1]  ;;  %v9027_v33 = vld.sshfl [vmem:[#allocation3 + $0x2] sm:$0x2 pattern:$0x76325410]  ;;  %v8109_v29 = vrot.slane %v8017_v31, %v11312_v3 }
 0x3b2   : > { %9553 = vmatprep.subr.bf16.mxu1 %v10054_v46  ;;  %v7609_v6 = vshrl.u32 %v7607_v24, 16  ;;  %v7858_v14 = vrot.slane %v7766_v12, %v11312_v3  ;;  %v7947_v34 = vrot.slane %v9027_v33, 1  ;;  %v9043_v49 = vld.sshfl [vmem:[#allocation3 + $0x4] sm:$0x2 pattern:$0x76325410] }
 0x3b3   : > { %v8111_v21 = vshrl.u32 %v8109_v29, 16  ;;  %v8198_v50 = vrot.slane %v9043_v49, 1  ;;  %v8356_v24 = vld [vmem:[%s11540_s9 + $0x40] sm:$0xff] }
 0x3b4   : > { %v7860_v27 = vshrl.u32 %v7858_v14, 16  ;;  %v8360_v10 = vld [vmem:[%s11540_s9 + $0x60] sm:$0xff] }
 0x3b5   : > { %9554 = vmatpush3.bf16.msra.mxu1 %v10011_v56  ;;  %v8351_v56 = vld [vmem:[%s11540_s9 + $0x18] sm:$0xff] }
 0x3b6   : > { %9555 = vmatprep.subr.bf16.mxu1 %v10054_v46  ;;  %v9698_v59 = vpack.c.bf16 %v8351_v56, %v8350_v8 }
 0x3b9   : > { %9556 = vmatpush3.bf16.msra.mxu1 %v10012_v2  ;;  %v8353_v2 = vld [vmem:[%s11540_s9 + $0x28] sm:$0xff] }
 0x3ba   : > { %9557 = vmatprep.subr.bf16.mxu1 %v10054_v46  ;;  %v9701_v3 = vpack.c.bf16 %v8353_v2, %v8352_v60 }
 0x3bd   : > { %9558 = vmatpush3.bf16.msra.mxu1 %v10013_v5 }
 0x3be   : > { %9563 = vmatprep.subr.bf16.mxu1 %v10054_v46 }
 0x3c0   : > { %9560 = vmatmul.mubr.msk.bf16.vlgmr.msra.gmra.mrb[8].mxu1 %vm7547_vm1, %v7609_v6 }
 0x3c1   : > { %9564 = vmatpush3.bf16.msra.mxu1 %v10014_v55  ;;  %9571 = vmatprep.mubr.msk.bf16.mxu1 %vm10055_vm4, %v10054_v46  ;;  %v8357_v55 = vld [vmem:[%s11540_s9 + $0x48] sm:$0xff] }
 0x3c2   : > { %9565 = vmatprep.subr.bf16.mxu1 %v10054_v46  ;;  %v9707_v6 = vpack.c.bf16 %v8357_v55, %v8356_v24 }
 0x3c5   : > { %9566 = vmatpush3.bf16.msra.mxu1 %v10015_v7  ;;  %v8358_v7 = vld [vmem:[%s11540_s9 + $0x50] sm:$0xff] }
 0x3c6   : > { %9567 = vmatprep.subr.bf16.mxu1 %v10054_v46 }
 0x3c9   : > { %9568 = vmatpush3.bf16.msra.mxu1 %v10016_v9  ;;  %v8359_v9 = vld [vmem:[%s11540_s9 + $0x58] sm:$0xff] }
 0x3ca   : > { %9569 = vmatprep.subr.bf16.mxu1 %v10054_v46 }
 0x3cd   : > { %9570 = vmatpush3.bf16.msra.mxu1 %v10017_v30  ;;  %v9710_v30 = vpack.c.bf16 %v8359_v9, %v8358_v7 }
 0x3ce   : > { %9575 = vmatprep.subr.bf16.mxu1 %v10054_v46 }
 0x3d0   : > { %9572 = vmatmul.mubr.msk.bf16.vlgmr.msra.gmra.mrb[8].mxu1 %vm7547_vm1, %v7696_v37 }
 0x3d1   : > { %9576 = vmatpush3.bf16.msra.mxu1 %v10018_v39  ;;  %9583 = vmatprep.mubr.msk.bf16.mxu1 %vm10055_vm4, %v10054_v46  ;;  %v8361_v39 = vld [vmem:[%s11540_s9 + $0x68] sm:$0xff] }
 0x3d2   : > { %9577 = vmatprep.subr.bf16.mxu1 %v10054_v46  ;;  %v9713_v37 = vpack.c.bf16 %v8361_v39, %v8360_v10 }
 0x3d5   : > { %9578 = vmatpush3.bf16.msra.mxu1 %v10019_v19  ;;  %v8362_v19 = vld [vmem:[%s11540_s9 + $0x70] sm:$0xff] }
 0x3d6   : > { %9579 = vmatprep.subr.bf16.mxu1 %v10054_v46 }
 0x3d9   : > { %9580 = vmatpush3.bf16.msra.mxu1 %v10020_v0  ;;  %v8363_v0 = vld [vmem:[%s11540_s9 + $0x78] sm:$0xff] }
 0x3da   : > { %9581 = vmatprep.subr.bf16.mxu1 %v10054_v46 }
 0x3dd   : > { %9582 = vmatpush3.bf16.msra.mxu1 %v10021_v11  ;;  %v9716_v11 = vpack.c.bf16 %v8363_v0, %v8362_v19 }
 0x3de   : > { %9587 = vmatprep.subr.bf16.mxu1 %v10054_v46 }
 0x3e0   : > { %9584 = vmatmul.mubr.msk.bf16.vlgmr.msra.gmra.mrb[8].mxu1 %vm7547_vm1, %v7766_v12 }
 0x3e1   : > { %9588 = vmatpush3.bf16.msra.mxu1 %v10022_v41  ;;  %9595 = vmatprep.mubr.msk.bf16.mxu1 %vm10055_vm4, %v10054_v46  ;;  %v8269_v41 = vld [vmem:[%s11539_s8] sm:$0x1] }
 0x3e2   : > { %9589 = vmatprep.subr.bf16.mxu1 %v10054_v46 }
 0x3e5   : > { %9590 = vmatpush3.bf16.msra.mxu1 %v10023_v4 }
 0x3e6   : > { %9591 = vmatprep.subr.bf16.mxu1 %v10054_v46 }
 0x3e9   : > { %9592 = vmatpush3.bf16.msra.mxu1 %v10024_v13 }
 0x3ea   : > { %9593 = vmatprep.subr.bf16.mxu1 %v10054_v46 }
 0x3ed   : > { %9594 = vmatpush3.bf16.msra.mxu1 %v10025_v45 }
 0x3ee   : > { %9599 = vmatprep.subr.bf16.mxu1 %v10054_v46 }
 0x3f0   : > { %9596 = vmatmul.mubr.msk.bf16.vlgmr.msra.gmra.mrb[8].mxu1 %vm7547_vm1, %v7860_v27  ;;  %v8364_v27 = vld [vmem:[%s11541_s10] sm:$0x1] }
 0x3f1   : > { %9600 = vmatpush3.bf16.msra.mxu1 %v10026_v18  ;;  %9607 = vmatprep.mubr.msk.bf16.mxu1 %vm10055_vm4, %v10054_v46 }
 0x3f2   : > { %9601 = vmatprep.subr.bf16.mxu1 %v10054_v46 }
 0x3f5   : > { %9602 = vmatpush3.bf16.msra.mxu1 %v10027_v22 }
 0x3f6   : > { %9603 = vmatprep.subr.bf16.mxu1 %v10054_v46 }
 0x3f9   : > { %9604 = vmatpush3.bf16.msra.mxu1 %v10028_v25 }
 0x3fa   : > { %9605 = vmatprep.subr.bf16.mxu1 %v10054_v46 }
 0x3fd   : > { %9606 = vmatpush3.bf16.msra.mxu1 %v10029_v28 }
 0x3fe   : > { %9611 = vmatprep.subr.bf16.mxu1 %v10054_v46 }
 0x400   : > { %9608 = vmatmul.mubr.msk.bf16.vlgmr.msra.gmra.mrb[8].mxu1 %vm7547_vm1, %v7947_v34 }
 0x401   : > { %9612 = vmatpush3.bf16.msra.mxu1 %v10030_v35  ;;  %9619 = vmatprep.mubr.msk.bf16.mxu1 %vm10055_vm4, %v10054_v46 }
 0x402   : > { %9613 = vmatprep.subr.bf16.mxu1 %v10054_v46 }
 0x405   : > { %9614 = vmatpush3.bf16.msra.mxu1 %v10031_v63 }
 0x406   : > { %9615 = vmatprep.subr.bf16.mxu1 %v10054_v46 }
 0x409   : > { %9616 = vmatpush3.bf16.msra.mxu1 %v10032_v57 }
 0x40a   : > { %9617 = vmatprep.subr.bf16.mxu1 %v10054_v46 }
 0x40d   : > { %9618 = vmatpush3.bf16.msra.mxu1 %v10033_v44 }
 0x40e   : > { %9623 = vmatprep.subr.bf16.mxu1 %v10054_v46 }
 0x410   : > { %9620 = vmatmul.mubr.msk.bf16.vlgmr.msra.gmra.mrb[8].mxu1 %vm7547_vm1, %v8017_v31 }
 0x411   : > { %9624 = vmatpush3.bf16.msra.mxu1 %v10034_v15  ;;  %9631 = vmatprep.mubr.msk.bf16.mxu1 %vm10055_vm4, %v10054_v46 }
 0x412   : > { %9625 = vmatprep.subr.bf16.mxu1 %v10054_v46 }
 0x415   : > { %9626 = vmatpush3.bf16.msra.mxu1 %v10035_v42 }
 0x416   : > { %9627 = vmatprep.subr.bf16.mxu1 %v10054_v46 }
 0x419   : > { %9628 = vmatpush3.bf16.msra.mxu1 %v10036_v58 }
 0x41a   : > { %9629 = vmatprep.subr.bf16.mxu1 %v10054_v46 }
 0x41d   : > { %9630 = vmatpush3.bf16.msra.mxu1 %v10037_v43 }
 0x41e   : > { %9635 = vmatprep.subr.bf16.mxu1 %v10054_v46 }
 0x420   : > { %9632 = vmatmul.mubr.msk.bf16.vlgmr.msra.gmra.mrb[8].mxu1 %vm7547_vm1, %v8111_v21 }
 0x421   : > { %9636 = vmatpush3.bf16.msra.mxu1 %v10038_v47  ;;  %9643 = vmatprep.mubr.msk.bf16.mxu1 %vm10055_vm4, %v10054_v46 }
 0x422   : > { %9637 = vmatprep.subr.bf16.mxu1 %v10054_v46 }
 0x425   : > { %9638 = vmatpush3.bf16.msra.mxu1 %v10039_v17 }
 0x426   : > { %9639 = vmatprep.subr.bf16.mxu1 %v10054_v46 }
 0x429   : > { %9640 = vmatpush3.bf16.msra.mxu1 %v10040_v38 }
 0x42a   : > { %9641 = vmatprep.subr.bf16.mxu1 %v10054_v46 }
 0x42d   : > { %9642 = vmatpush3.bf16.msra.mxu1 %v10041_v20 }
 0x430   : > { %9644 = vmatmul.mubr.msk.bf16.vlgmr.msra.gmra.mrb[8].mxu1 %vm7547_vm1, %v8198_v50 }
 0x503   : > { %v8260_v16 = vpop.f32.mrb[8].mxu1 }
 0x504   : > { %v9734_v61 = vadd.f32 %v8260_v16, %v7512_v40  ;;  %v9645_v36 = vpop.f32.mrb[9].mxu1 }
 0x505   : > { %v8263_v32 = vpop.f32.mrb[10].mxu1 }
 0x506   : > { %v8267_v48 = vmax.f32 %v9734_v61, 0.0  ;;  %v9646_v23 = vpop.f32.mrb[11].mxu1 }
 0x508   : > { %v8268_v53 = vpack.c.bf16 %v8267_v48, %v8267_v48 }
 0x50a   : > { %9656 = vmatmul.mubr.msk.bf16.vlgmr.msra.gmra.mrb[8].mxu0 %vm7547_vm1, %v8268_v53 }
 0x50b   : > { %9696 = vmatpush3.bf16.msra.mxu0 %v9695_v1  ;;  %9691 = vmatprep.mubr.msk.f32.mxu0 %vm10055_vm4, %v10054_v46  ;;  %v8355_v46 = vld [vmem:[%s11540_s9 + $0x38] sm:$0xff] }
 0x50c   : > { %9697 = vmatprep.subr.bf16.mxu0 %v10059_v52  ;;  %v9704_v5 = vpack.c.bf16 %v8355_v46, %v8354_v62 }
 0x50f   : > { %9699 = vmatpush3.bf16.msra.mxu0 %v9698_v59 }
 0x510   : > { %9700 = vmatprep.subr.bf16.mxu0 %v10059_v52 }
 0x513   : > { %9702 = vmatpush3.bf16.msra.mxu0 %v9701_v3 }
 0x514   : > { %9703 = vmatprep.subr.bf16.mxu0 %v10059_v52 }
 0x517   : > { %9705 = vmatpush3.bf16.msra.mxu0 %v9704_v5 }
 0x518   : > { %9706 = vmatprep.subr.bf16.mxu0 %v10059_v52 }
 0x51b   : > { %9708 = vmatpush3.bf16.msra.mxu0 %v9707_v6 }
 0x51c   : > { %9709 = vmatprep.subr.bf16.mxu0 %v10059_v52 }
 0x51f   : > { %9711 = vmatpush3.bf16.msra.mxu0 %v9710_v30 }
 0x520   : > { %9712 = vmatprep.subr.bf16.mxu0 %v10059_v52 }
 0x523   : > { %9714 = vmatpush3.bf16.msra.mxu0 %v9713_v37 }
 0x524   : > { %9715 = vmatprep.subr.bf16.mxu0 %v10059_v52 }
 0x527   : > { %9717 = vmatpush3.bf16.msra.mxu0 %v9716_v11 }
 0x5dd   : > { %v8340_v12 = vpop.f32.mrb[8].mxu0 }
 0x5de   : > { %v8346_v4 = vadd.f32 %v8340_v12, %v8269_v41  ;;  %v9657_v13 = vpop.f32.mrb[9].mxu0 }
 0x5df   : > { %v8343_v45 = vpop.f32.mrb[10].mxu0 }
 0x5e0   : > { %v8347_v14 = vmax.f32 %v8346_v4, 0.0  ;;  %v9658_v18 = vpop.f32.mrb[11].mxu0 }
 0x5e2   : > { %9692 = vmatmul.mubr.f32.vlgmr.msra.gmra.mrb[12].mxu0 %v8347_v14 }
 0x6b5   : > { %v8431_v22 = vpop.f32.mrb[12].mxu0 }
 0x6b6   : > { %v8432_v25 = vadd.f32 %v8431_v22, %v8364_v27  ;;  %v9693_v28 = vpop.f32.mrb[13].mxu0 }
 0x6b8   : > { %8435 = vst [vmem:[%s382_s22] sm:$0x1] %v8432_v25 }
 0x6b9 PF: > { %s21_s17 = sadd.s32 1, %s10052_s17  }
 0x6ba   : > { %p18_p4 = scmp.ge.s32.totalorder %s21_s17, 4  }
 0x6bc   :  { %20 = sbr.rel (!%p18_p4) target bundleno = 1 (0x1), region = 110 }

</bundles_post_ra>
